<compile_context>
chip_gen: v5e
topology: v5e:2x2
jax: 0.10.0
libtpu: 0.0.40
codegen_flags: <defaults>
</compile_context>

<pallas_src>
import functools

import jax
import jax.numpy as jnp
from jax.experimental import pallas as pl
from jax.experimental.pallas import tpu as pltpu

IN_CHANNELS = 3
BN_EPS = 1e-5
KH = KW = 3
NUM_TAPS = KH * KW


def _conv_stats_kernel(x_ref, w_ref, y_ref, psum_ref, psq_ref, patch_ref,
                       *, W, Wp, TR, C_IN):
    """Pass 1: 3x3 conv as ONE (TR,27)@(27,C_out) matmul + partial BN stats.

    x_ref     : (1, Rp, C_in)     flattened zero-padded NHWC image rows
    w_ref     : (27, C_out)       tap-major weight matrix (tap = di*3 + dj)
    y_ref     : (1, TR, C_out)    conv output rows for this row tile
    psum_ref  : (1, 1, 8, C_out)  per-step partial sum   (row 0; rows 1..7 = 0)
    psq_ref   : (1, 1, 8, C_out)  per-step partial sumsq (row 0; rows 1..7 = 0)
    patch_ref : (TR, 27)          VMEM scratch: packed 9-tap patch block
    """
    j = pl.program_id(1)
    r0 = j * TR
    if TR % 8 == 0:
        r0 = pl.multiple_of(r0, 8)

    # Pack the 9 shifted windows into the patch scratch: lane block
    # [t*C_in, (t+1)*C_in) holds tap t = di*3 + dj.
    for t in range(NUM_TAPS):
        di, dj = divmod(t, KW)
        shift = di * Wp + dj
        patch_ref[:, t * C_IN:(t + 1) * C_IN] = (
            x_ref[0, pl.ds(r0 + shift, TR), :].astype(patch_ref.dtype))

    # One MXU matmul per row tile.  (Conv bias intentionally omitted: it is
    # cancelled exactly by the training-mode BN mean subtraction.)
    acc = jnp.dot(patch_ref[...], w_ref[...],
                  preferred_element_type=jnp.float32)          # (TR, C_out) f32

    # Zero the 2 junk columns per image row (they read row-wrapped data) so
    # they contribute nothing to the BN statistics or the stored intermediate.
    # TR is a multiple of Wp, so this mask is grid-invariant.
    ridx = jax.lax.broadcasted_iota(jnp.int32, (TR, 1), 0)
    yv = jnp.where((ridx % Wp) < W, acc, 0.0)

    y_ref[0] = yv.astype(y_ref.dtype)

    # Per-grid-step partial statistics (fully "parallel" grid -> megacore-
    # shardable on v7x); the wrapper reduces the partials.
    c_out = yv.shape[-1]
    rows8 = jax.lax.broadcasted_iota(jnp.int32, (8, c_out), 0)
    psum_ref[...] = jnp.where(
        rows8 == 0, jnp.sum(yv, axis=0, keepdims=True), 0.0)[None, None]
    psq_ref[...] = jnp.where(
        rows8 == 0, jnp.sum(yv * yv, axis=0, keepdims=True), 0.0)[None, None]


def _bn_relu_kernel(y_ref, scale_ref, shift_ref, o_ref, *, W):
    """Pass 2: out = relu(y * scale + shift); junk-column slice folded in."""
    y = y_ref[0, :, :W, :].astype(jnp.float32)                 # (TH, W, C_out)
    o_ref[0] = jnp.maximum(y * scale_ref[...] + shift_ref[...],
                           0.0).astype(o_ref.dtype)


def _pick_h_tile(h, wp, max_rows=1024):
    """Largest divisor `th` of h with th*wp a multiple of 8 and <= max_rows."""
    for th in range(h, 0, -1):
        if h % th == 0 and (th * wp) % 8 == 0 and th * wp <= max_rows:
            return th
    # TODO(synk): huge / awkward H would need pl.cdiv + remainder handling;
    # full-height blocks are always layout-legal but can stress v7x's VMEM.
    return h


@functools.partial(jax.jit, static_argnames=("compute_dtype", "row_cap"))
def conv_bn_relu(x, weight, bias, gamma, beta, compute_dtype=jnp.float32,
                 row_cap=1024):
    """x: (N, C_in, H, W) NCHW.  weight: (C_out, C_in, 3, 3).  Returns NCHW.

    `bias` is accepted for interface parity but not applied: training-mode
    BatchNorm subtracts the per-channel batch mean, which cancels it exactly.
    """
    del bias
    n, c_in, h, w = x.shape
    c_out, c_in_w, kh, kw = weight.shape
    assert (kh, kw) == (KH, KW) and c_in_w == c_in

    wp = w + 2                               # padded image row width
    r = h * wp                               # conv-output rows per image
    rp = (h + 2) * wp + 2                    # padded input rows per image
    th = _pick_h_tile(h, wp, row_cap)        # image rows per grid step
    tr = th * wp                             # conv-output rows per grid step
    tiles = h // th
    k = NUM_TAPS * c_in                      # 27

    # ---- XLA-side prep (cheap): pad + flatten image, tap-major weights. ----
    x_nhwc = jnp.transpose(x, (0, 2, 3, 1))                       # (N,H,W,C)
    x_p = jnp.pad(x_nhwc, ((0, 0), (1, 1), (1, 1), (0, 0)))       # (N,H+2,W+2,C)
    x_flat = jnp.pad(x_p.reshape(n, (h + 2) * wp, c_in),
                     ((0, 0), (0, 2), (0, 0))).astype(compute_dtype)  # (N,Rp,C)
    w_mat = jnp.transpose(weight, (2, 3, 1, 0)).reshape(k, c_out)
    w_mat = w_mat.astype(compute_dtype)                           # (27, C_out)

    # ---- Pass 1: conv + per-step partial channel statistics. ---------------
    y, psum, psq = pl.pallas_call(
        functools.partial(_conv_stats_kernel, W=w, Wp=wp, TR=tr, C_IN=c_in),
        grid=(n, tiles),
        in_specs=[
            pl.BlockSpec((1, rp, c_in), lambda i, j: (i, 0, 0)),   # per-image
            pl.BlockSpec((k, c_out), lambda i, j: (0, 0)),         # resident
        ],
        out_specs=[
            pl.BlockSpec((1, tr, c_out), lambda i, j: (i, j, 0)),
            pl.BlockSpec((1, 1, 8, c_out), lambda i, j: (i, j, 0, 0)),
            pl.BlockSpec((1, 1, 8, c_out), lambda i, j: (i, j, 0, 0)),
        ],
        out_shape=(
            jax.ShapeDtypeStruct((n, r, c_out), compute_dtype),
            jax.ShapeDtypeStruct((n, tiles, 8, c_out), jnp.float32),
            jax.ShapeDtypeStruct((n, tiles, 8, c_out), jnp.float32),
        ),
        scratch_shapes=[pltpu.VMEM((tr, k), compute_dtype)],
        compiler_params=pltpu.CompilerParams(
            dimension_semantics=("parallel", "parallel")),
    )(x_flat, w_mat)

    # ---- Fold BN (biased batch stats) + affine into one scale / shift. -----
    m = jnp.float32(n * h * w)
    ch_sum = jnp.sum(psum, axis=(0, 1, 2))                        # (C_out,)
    ch_sq = jnp.sum(psq, axis=(0, 1, 2))
    mean = ch_sum / m
    var = jnp.maximum(ch_sq / m - mean * mean, 0.0)
    inv = jax.lax.rsqrt(var + BN_EPS)
    scale = (gamma.astype(jnp.float32) * inv).reshape(1, c_out)
    shift = (beta.astype(jnp.float32) - mean * scale[0]).reshape(1, c_out)

    # ---- Pass 2: normalize + affine + ReLU; junk columns sliced by spec. ---
    y4 = y.reshape(n, h, wp, c_out)          # free row-major metadata reshape
    out_nhwc = pl.pallas_call(
        functools.partial(_bn_relu_kernel, W=w),
        grid=(n, tiles),
        in_specs=[
            pl.BlockSpec((1, th, wp, c_out), lambda i, j: (i, j, 0, 0)),
            pl.BlockSpec((1, c_out), lambda i, j: (0, 0)),         # resident
            pl.BlockSpec((1, c_out), lambda i, j: (0, 0)),         # resident
        ],
        out_specs=pl.BlockSpec((1, th, w, c_out), lambda i, j: (i, j, 0, 0)),
        out_shape=jax.ShapeDtypeStruct((n, h, w, c_out), jnp.float32),
        compiler_params=pltpu.CompilerParams(
            dimension_semantics=("parallel", "parallel")),
    )(y4, scale, shift)

    # TODO(synk): an NHWC consumer could take out_nhwc directly and skip this
    # transpose; it exists only to match the module's NCHW output layout.
    return jnp.transpose(out_nhwc, (0, 3, 1, 2))


def _reference(x, weight, bias, gamma, beta):
    y = jax.lax.conv_general_dilated(
        x, weight, window_strides=(1, 1), padding=((1, 1), (1, 1)),
        dimension_numbers=("NCHW", "OIHW", "NCHW"))
    y = y + bias[None, :, None, None]
    mu = jnp.mean(y, axis=(0, 2, 3), keepdims=True)
    var = jnp.mean(jnp.square(y - mu), axis=(0, 2, 3), keepdims=True)
    y = (y - mu) / jnp.sqrt(var + BN_EPS)
    y = y * gamma[None, :, None, None] + beta[None, :, None, None]
    return jnp.maximum(y, 0.0)


if __name__ == "__main__":
    key = jax.random.PRNGKey(0)
    kx, kw_, kb, kg, kbt = jax.random.split(key, 5)

    N, C_IN, H, W = 2, IN_CHANNELS, 16, 16
    C_OUT = 8

    x = jax.random.normal(kx, (N, C_IN, H, W), dtype=jnp.float32)
    weight = jax.random.normal(kw_, (C_OUT, C_IN, 3, 3), dtype=jnp.float32) * 0.1
    bias = jax.random.normal(kb, (C_OUT,), dtype=jnp.float32) * 0.1
    gamma = 1.0 + 0.1 * jax.random.normal(kg, (C_OUT,), dtype=jnp.float32)
    beta = 0.1 * jax.random.normal(kbt, (C_OUT,), dtype=jnp.float32)

    ref = jax.block_until_ready(_reference(x, weight, bias, gamma, beta))

    # Full-precision path (single row tile per image at this size).
    out = jax.block_until_ready(conv_bn_relu(x, weight, bias, gamma, beta))
    assert out.shape == (N, C_OUT, H, W), out.shape
    assert jnp.allclose(out, ref, atol=1e-4, rtol=1e-4), (
        float(jnp.max(jnp.abs(out - ref))))

    # Forced multi-tile path: exercises row-tiled indexing + partial-stat
    # reduction across several grid steps.
    out_tiled = jax.block_until_ready(
        conv_bn_relu(x, weight, bias, gamma, beta, row_cap=128))
    assert jnp.allclose(out_tiled, ref, atol=1e-4, rtol=1e-4), (
        float(jnp.max(jnp.abs(out_tiled - ref))))

    # bf16-matmul fast path (valid on v5e/v6e/v7x); stats / normalize stay f32.
    out_bf16 = jax.block_until_ready(
        conv_bn_relu(x, weight, bias, gamma, beta, compute_dtype=jnp.bfloat16))
    assert jnp.allclose(out_bf16, ref, atol=8e-2, rtol=8e-2), (
        float(jnp.max(jnp.abs(out_bf16 - ref))))

    print("KERNEL_OK")
</pallas_src>

<mosaic_0001>
module attributes {stable_mosaic.version = 11 : i64} {
  func.func @_conv_stats_kernel(%arg0: i32, %arg1: i32, %arg2: memref<1x326x3xf32, #tpu.memory_space<vmem>>, %arg3: memref<27x8xf32, #tpu.memory_space<vmem>>, %arg4: memref<1x288x8xf32, #tpu.memory_space<vmem>>, %arg5: memref<1x1x8x8xf32, #tpu.memory_space<vmem>>, %arg6: memref<1x1x8x8xf32, #tpu.memory_space<vmem>>, %arg7: memref<288x27xf32, #tpu.memory_space<vmem>>) attributes {dimension_semantics = [#tpu.dimension_semantics<parallel>, #tpu.dimension_semantics<parallel>], iteration_bounds = array<i64: 2, 1>, scalar_prefetch = 0 : i64, scratch_operands = 1 : i64, tpu.core_type = #tpu.core_type<tc>, window_params = [{transform_indices = @transform_0, window_bounds = array<i64: 1, 326, 3>}, {pipeline_mode = #tpu.pipeline_mode<synchronous>, transform_indices = @transform_1, window_bounds = array<i64: 27, 8>}, {transform_indices = @transform_2, window_bounds = array<i64: 1, 288, 8>}, {transform_indices = @transform_3, window_bounds = array<i64: 1, 1, 8, 8>}, {transform_indices = @transform_4, window_bounds = array<i64: 1, 1, 8, 8>}]} {
    %c288_i32 = arith.constant 288 : i32
    %0 = arith.muli %arg1, %c288_i32 : i32
    %1 = tpu.assume_multiple %0, 8 : i32
    %c0_i32 = arith.constant 0 : i32
    %2 = arith.addi %1, %c0_i32 : i32
    %c0 = arith.constant 0 : index
    %3 = arith.index_cast %2 : i32 to index
    %c0_0 = arith.constant 0 : index
    %4 = vector.load %arg2[%c0, %3, %c0_0] : memref<1x326x3xf32, #tpu.memory_space<vmem>>, vector<1x288x3xf32>
    %5 = vector.shape_cast %4 : vector<1x288x3xf32> to vector<288x3xf32>
    %c0_1 = arith.constant 0 : index
    %c0_2 = arith.constant 0 : index
    %6 = vector.load %arg7[%c0_1, %c0_2] : memref<288x27xf32, #tpu.memory_space<vmem>>, vector<288x3xf32>
    tpu.vector_store %arg7[%c0_1, %c0_2], %5 {strides = array<i32>} : memref<288x27xf32, #tpu.memory_space<vmem>>, vector<288x3xf32>,
    %c1_i32 = arith.constant 1 : i32
    %7 = arith.addi %1, %c1_i32 : i32
    %c0_3 = arith.constant 0 : index
    %8 = arith.index_cast %7 : i32 to index
    %c0_4 = arith.constant 0 : index
    %9 = vector.load %arg2[%c0_3, %8, %c0_4] : memref<1x326x3xf32, #tpu.memory_space<vmem>>, vector<1x288x3xf32>
    %10 = vector.shape_cast %9 : vector<1x288x3xf32> to vector<288x3xf32>
    %c0_5 = arith.constant 0 : index
    %c3 = arith.constant 3 : index
    %11 = vector.load %arg7[%c0_5, %c3] : memref<288x27xf32, #tpu.memory_space<vmem>>, vector<288x3xf32>
    tpu.vector_store %arg7[%c0_5, %c3], %10 {strides = array<i32>} : memref<288x27xf32, #tpu.memory_space<vmem>>, vector<288x3xf32>,
    %c2_i32 = arith.constant 2 : i32
    %12 = arith.addi %1, %c2_i32 : i32
    %c0_6 = arith.constant 0 : index
    %13 = arith.index_cast %12 : i32 to index
    %c0_7 = arith.constant 0 : index
    %14 = vector.load %arg2[%c0_6, %13, %c0_7] : memref<1x326x3xf32, #tpu.memory_space<vmem>>, vector<1x288x3xf32>
    %15 = vector.shape_cast %14 : vector<1x288x3xf32> to vector<288x3xf32>
    %c0_8 = arith.constant 0 : index
    %c6 = arith.constant 6 : index
    %16 = vector.load %arg7[%c0_8, %c6] : memref<288x27xf32, #tpu.memory_space<vmem>>, vector<288x3xf32>
    tpu.vector_store %arg7[%c0_8, %c6], %15 {strides = array<i32>} : memref<288x27xf32, #tpu.memory_space<vmem>>, vector<288x3xf32>,
    %c18_i32 = arith.constant 18 : i32
    %17 = arith.addi %1, %c18_i32 : i32
    %c0_9 = arith.constant 0 : index
    %18 = arith.index_cast %17 : i32 to index
    %c0_10 = arith.constant 0 : index
    %19 = vector.load %arg2[%c0_9, %18, %c0_10] : memref<1x326x3xf32, #tpu.memory_space<vmem>>, vector<1x288x3xf32>
    %20 = vector.shape_cast %19 : vector<1x288x3xf32> to vector<288x3xf32>
    %c0_11 = arith.constant 0 : index
    %c9 = arith.constant 9 : index
    %21 = vector.load %arg7[%c0_11, %c9] : memref<288x27xf32, #tpu.memory_space<vmem>>, vector<288x3xf32>
    tpu.vector_store %arg7[%c0_11, %c9], %20 {strides = array<i32>} : memref<288x27xf32, #tpu.memory_space<vmem>>, vector<288x3xf32>,
    %c19_i32 = arith.constant 19 : i32
    %22 = arith.addi %1, %c19_i32 : i32
    %c0_12 = arith.constant 0 : index
    %23 = arith.index_cast %22 : i32 to index
    %c0_13 = arith.constant 0 : index
    %24 = vector.load %arg2[%c0_12, %23, %c0_13] : memref<1x326x3xf32, #tpu.memory_space<vmem>>, vector<1x288x3xf32>
    %25 = vector.shape_cast %24 : vector<1x288x3xf32> to vector<288x3xf32>
    %c0_14 = arith.constant 0 : index
    %c12 = arith.constant 12 : index
    %26 = vector.load %arg7[%c0_14, %c12] : memref<288x27xf32, #tpu.memory_space<vmem>>, vector<288x3xf32>
    tpu.vector_store %arg7[%c0_14, %c12], %25 {strides = array<i32>} : memref<288x27xf32, #tpu.memory_space<vmem>>, vector<288x3xf32>,
    %c20_i32 = arith.constant 20 : i32
    %27 = arith.addi %1, %c20_i32 : i32
    %c0_15 = arith.constant 0 : index
    %28 = arith.index_cast %27 : i32 to index
    %c0_16 = arith.constant 0 : index
    %29 = vector.load %arg2[%c0_15, %28, %c0_16] : memref<1x326x3xf32, #tpu.memory_space<vmem>>, vector<1x288x3xf32>
    %30 = vector.shape_cast %29 : vector<1x288x3xf32> to vector<288x3xf32>
    %c0_17 = arith.constant 0 : index
    %c15 = arith.constant 15 : index
    %31 = vector.load %arg7[%c0_17, %c15] : memref<288x27xf32, #tpu.memory_space<vmem>>, vector<288x3xf32>
    tpu.vector_store %arg7[%c0_17, %c15], %30 {strides = array<i32>} : memref<288x27xf32, #tpu.memory_space<vmem>>, vector<288x3xf32>,
    %c36_i32 = arith.constant 36 : i32
    %32 = arith.addi %1, %c36_i32 : i32
    %c0_18 = arith.constant 0 : index
    %33 = arith.index_cast %32 : i32 to index
    %c0_19 = arith.constant 0 : index
    %34 = vector.load %arg2[%c0_18, %33, %c0_19] : memref<1x326x3xf32, #tpu.memory_space<vmem>>, vector<1x288x3xf32>
    %35 = vector.shape_cast %34 : vector<1x288x3xf32> to vector<288x3xf32>
    %c0_20 = arith.constant 0 : index
    %c18 = arith.constant 18 : index
    %36 = vector.load %arg7[%c0_20, %c18] : memref<288x27xf32, #tpu.memory_space<vmem>>, vector<288x3xf32>
    tpu.vector_store %arg7[%c0_20, %c18], %35 {strides = array<i32>} : memref<288x27xf32, #tpu.memory_space<vmem>>, vector<288x3xf32>,
    %c37_i32 = arith.constant 37 : i32
    %37 = arith.addi %1, %c37_i32 : i32
    %c0_21 = arith.constant 0 : index
    %38 = arith.index_cast %37 : i32 to index
    %c0_22 = arith.constant 0 : index
    %39 = vector.load %arg2[%c0_21, %38, %c0_22] : memref<1x326x3xf32, #tpu.memory_space<vmem>>, vector<1x288x3xf32>
    %40 = vector.shape_cast %39 : vector<1x288x3xf32> to vector<288x3xf32>
    %c0_23 = arith.constant 0 : index
    %c21 = arith.constant 21 : index
    %41 = vector.load %arg7[%c0_23, %c21] : memref<288x27xf32, #tpu.memory_space<vmem>>, vector<288x3xf32>
    tpu.vector_store %arg7[%c0_23, %c21], %40 {strides = array<i32>} : memref<288x27xf32, #tpu.memory_space<vmem>>, vector<288x3xf32>,
    %c38_i32 = arith.constant 38 : i32
    %42 = arith.addi %1, %c38_i32 : i32
    %c0_24 = arith.constant 0 : index
    %43 = arith.index_cast %42 : i32 to index
    %c0_25 = arith.constant 0 : index
    %44 = vector.load %arg2[%c0_24, %43, %c0_25] : memref<1x326x3xf32, #tpu.memory_space<vmem>>, vector<1x288x3xf32>
    %45 = vector.shape_cast %44 : vector<1x288x3xf32> to vector<288x3xf32>
    %c0_26 = arith.constant 0 : index
    %c24 = arith.constant 24 : index
    %46 = vector.load %arg7[%c0_26, %c24] : memref<288x27xf32, #tpu.memory_space<vmem>>, vector<288x3xf32>
    tpu.vector_store %arg7[%c0_26, %c24], %45 {strides = array<i32>} : memref<288x27xf32, #tpu.memory_space<vmem>>, vector<288x3xf32>,
    %c0_27 = arith.constant 0 : index
    %c0_28 = arith.constant 0 : index
    %47 = vector.load %arg7[%c0_27, %c0_28] : memref<288x27xf32, #tpu.memory_space<vmem>>, vector<288x27xf32>
    %c0_29 = arith.constant 0 : index
    %c0_30 = arith.constant 0 : index
    %48 = vector.load %arg3[%c0_29, %c0_30] : memref<27x8xf32, #tpu.memory_space<vmem>>, vector<27x8xf32>
    %cst = arith.constant dense<0.000000e+00> : vector<288x8xf32>
    %49 = tpu.matmul %47, %48, %cst {dimension_numbers = #tpu.dot_dimension_numbers<[1], [0], [0], [1], [0, 0, 1, 1], [], []>} : vector<288x27xf32>, vector<27x8xf32>, vector<288x8xf32> -> vector<288x8xf32>
    %50 = tpu.iota {dimensions = array<i32: 0>} : vector<288x1xi32>
    %c18_i32_31 = arith.constant 18 : i32
    %c0_i32_32 = arith.constant 0 : i32
    %51 = arith.cmpi eq, %c18_i32_31, %c0_i32_32 : i32
    %c1_i32_33 = arith.constant 1 : i32
    %52 = arith.select %51, %c1_i32_33, %c18_i32_31 : i32
    %53 = vector.broadcast %52 : i32 to vector<288x1xi32>
    %54 = arith.remsi %50, %53 : vector<288x1xi32>
    %c0_i32_34 = arith.constant 0 : i32
    %55 = vector.broadcast %c0_i32_34 : i32 to vector<288x1xi32>
    %56 = arith.cmpi ne, %54, %55 : vector<288x1xi32>
    %c0_i32_35 = arith.constant 0 : i32
    %57 = vector.broadcast %c0_i32_35 : i32 to vector<288x1xi32>
    %58 = arith.cmpi slt, %54, %57 : vector<288x1xi32>
    %c0_i32_36 = arith.constant 0 : i32
    %59 = arith.cmpi slt, %52, %c0_i32_36 : i32
    %60 = vector.broadcast %59 : i1 to vector<288x1xi1>
    %61 = vector.broadcast %60 : vector<288x1xi1> to vector<288x1xi1>
    %62 = arith.xori %58, %61 : vector<288x1xi1>
    %63 = arith.andi %62, %56 : vector<288x1xi1>
    %64 = vector.broadcast %52 : i32 to vector<288x1xi32>
    %65 = arith.addi %54, %64 : vector<288x1xi32>
    %66 = arith.select %63, %65, %54 : vector<288x1xi1>, vector<288x1xi32>
    %c16_i32 = arith.constant 16 : i32
    %67 = vector.broadcast %c16_i32 : i32 to vector<288x1xi32>
    %68 = arith.cmpi slt, %66, %67 : vector<288x1xi32>
    %cst_37 = arith.constant 0.000000e+00 : f32
    %69 = vector.shape_cast %68 : vector<288x1xi1> to vector<288x1xi1>
    %70 = vector.broadcast %69 : vector<288x1xi1> to vector<288x8xi1>
    %71 = vector.broadcast %cst_37 : f32 to vector<288x8xf32>
    %72 = arith.select %70, %49, %71 : vector<288x8xi1>, vector<288x8xf32>
    %c0_38 = arith.constant 0 : index
    %c0_39 = arith.constant 0 : index
    %c0_40 = arith.constant 0 : index
    %73 = vector.load %arg4[%c0_38, %c0_39, %c0_40] : memref<1x288x8xf32, #tpu.memory_space<vmem>>, vector<1x288x8xf32>
    %74 = vector.shape_cast %73 : vector<1x288x8xf32> to vector<288x8xf32>
    %75 = vector.shape_cast %72 : vector<288x8xf32> to vector<1x288x8xf32>
    tpu.vector_store %arg4[%c0_38, %c0_39, %c0_40], %75 {strides = array<i32>} : memref<1x288x8xf32, #tpu.memory_space<vmem>>, vector<1x288x8xf32>,
    %76 = tpu.iota {dimensions = array<i32: 0>} : vector<8x8xi32>
    %c0_i32_41 = arith.constant 0 : i32
    %77 = vector.broadcast %c0_i32_41 : i32 to vector<8x8xi32>
    %78 = arith.cmpi eq, %76, %77 : vector<8x8xi32>
    %cst_42 = arith.constant dense<0.000000e+00> : vector<8xf32>
    %79 = vector.multi_reduction <add>, %72, %cst_42 [0] : vector<288x8xf32> to vector<8xf32>
    %80 = vector.shape_cast %79 : vector<8xf32> to vector<1x8xf32>
    %cst_43 = arith.constant 0.000000e+00 : f32
    %81 = vector.shape_cast %80 : vector<1x8xf32> to vector<1x8xf32>
    %82 = vector.broadcast %81 : vector<1x8xf32> to vector<8x8xf32>
    %83 = vector.broadcast %cst_43 : f32 to vector<8x8xf32>
    %84 = arith.select %78, %82, %83 : vector<8x8xi1>, vector<8x8xf32>
    %85 = vector.shape_cast %84 : vector<8x8xf32> to vector<1x1x8x8xf32>
    %c0_44 = arith.constant 0 : index
    %c0_45 = arith.constant 0 : index
    %c0_46 = arith.constant 0 : index
    %c0_47 = arith.constant 0 : index
    %86 = vector.load %arg5[%c0_44, %c0_45, %c0_46, %c0_47] : memref<1x1x8x8xf32, #tpu.memory_space<vmem>>, vector<1x1x8x8xf32>
    tpu.vector_store %arg5[%c0_44, %c0_45, %c0_46, %c0_47], %85 {strides = array<i32>} : memref<1x1x8x8xf32, #tpu.memory_space<vmem>>, vector<1x1x8x8xf32>,
    %c0_i32_48 = arith.constant 0 : i32
    %87 = vector.broadcast %c0_i32_48 : i32 to vector<8x8xi32>
    %88 = arith.cmpi eq, %76, %87 : vector<8x8xi32>
    %89 = arith.mulf %72, %72 : vector<288x8xf32>
    %cst_49 = arith.constant dense<0.000000e+00> : vector<8xf32>
    %90 = vector.multi_reduction <add>, %89, %cst_49 [0] : vector<288x8xf32> to vector<8xf32>
    %91 = vector.shape_cast %90 : vector<8xf32> to vector<1x8xf32>
    %cst_50 = arith.constant 0.000000e+00 : f32
    %92 = vector.shape_cast %91 : vector<1x8xf32> to vector<1x8xf32>
    %93 = vector.broadcast %92 : vector<1x8xf32> to vector<8x8xf32>
    %94 = vector.broadcast %cst_50 : f32 to vector<8x8xf32>
    %95 = arith.select %88, %93, %94 : vector<8x8xi1>, vector<8x8xf32>
    %96 = vector.shape_cast %95 : vector<8x8xf32> to vector<1x1x8x8xf32>
    %c0_51 = arith.constant 0 : index
    %c0_52 = arith.constant 0 : index
    %c0_53 = arith.constant 0 : index
    %c0_54 = arith.constant 0 : index
    %97 = vector.load %arg6[%c0_51, %c0_52, %c0_53, %c0_54] : memref<1x1x8x8xf32, #tpu.memory_space<vmem>>, vector<1x1x8x8xf32>
    tpu.vector_store %arg6[%c0_51, %c0_52, %c0_53, %c0_54], %96 {strides = array<i32>} : memref<1x1x8x8xf32, #tpu.memory_space<vmem>>, vector<1x1x8x8xf32>,
    return
  }
  func.func @transform_0(%arg0: i32, %arg1: i32) -> (i32, i32, i32) {
    %c0_i32 = arith.constant 0 : i32
    %c0_i32_0 = arith.constant 0 : i32
    %c0_i32_1 = arith.constant 0 : i32
    return %arg0, %c0_i32, %c0_i32_0 : i32, i32, i32
  }
  func.func @transform_1(%arg0: i32, %arg1: i32) -> (i32, i32) {
    %c0_i32 = arith.constant 0 : i32
    %c0_i32_0 = arith.constant 0 : i32
    %c0_i32_1 = arith.constant 0 : i32
    return %c0_i32, %c0_i32_0 : i32, i32
  }
  func.func @transform_2(%arg0: i32, %arg1: i32) -> (i32, i32, i32) {
    %c0_i32 = arith.constant 0 : i32
    %c0_i32_0 = arith.constant 0 : i32
    return %arg0, %arg1, %c0_i32 : i32, i32, i32
  }
  func.func @transform_3(%arg0: i32, %arg1: i32) -> (i32, i32, i32, i32) {
    %c0_i32 = arith.constant 0 : i32
    %c0_i32_0 = arith.constant 0 : i32
    %c0_i32_1 = arith.constant 0 : i32
    return %arg0, %arg1, %c0_i32, %c0_i32_0 : i32, i32, i32, i32
  }
  func.func @transform_4(%arg0: i32, %arg1: i32) -> (i32, i32, i32, i32) {
    %c0_i32 = arith.constant 0 : i32
    %c0_i32_0 = arith.constant 0 : i32
    %c0_i32_1 = arith.constant 0 : i32
    return %arg0, %arg1, %c0_i32, %c0_i32_0 : i32, i32, i32, i32
  }
}

module attributes {stable_mosaic.version = 11 : i64} {
  func.func @_bn_relu_kernel(%arg0: i32, %arg1: i32, %arg2: memref<1x16x18x8xf32, #tpu.memory_space<vmem>>, %arg3: memref<1x8xf32, #tpu.memory_space<vmem>>, %arg4: memref<1x8xf32, #tpu.memory_space<vmem>>, %arg5: memref<1x16x16x8xf32, #tpu.memory_space<vmem>>) attributes {dimension_semantics = [#tpu.dimension_semantics<parallel>, #tpu.dimension_semantics<parallel>], iteration_bounds = array<i64: 2, 1>, scalar_prefetch = 0 : i64, scratch_operands = 0 : i64, tpu.core_type = #tpu.core_type<tc>, window_params = [{transform_indices = @transform_0, window_bounds = array<i64: 1, 16, 18, 8>}, {pipeline_mode = #tpu.pipeline_mode<synchronous>, transform_indices = @transform_1, window_bounds = array<i64: 1, 8>}, {pipeline_mode = #tpu.pipeline_mode<synchronous>, transform_indices = @transform_2, window_bounds = array<i64: 1, 8>}, {transform_indices = @transform_3, window_bounds = array<i64: 1, 16, 16, 8>}]} {
    %c0 = arith.constant 0 : index
    %c0_0 = arith.constant 0 : index
    %c0_1 = arith.constant 0 : index
    %c0_2 = arith.constant 0 : index
    %0 = vector.load %arg2[%c0, %c0_0, %c0_1, %c0_2] : memref<1x16x18x8xf32, #tpu.memory_space<vmem>>, vector<1x16x16x8xf32>
    %1 = vector.shape_cast %0 : vector<1x16x16x8xf32> to vector<16x16x8xf32>
    %c0_3 = arith.constant 0 : index
    %c0_4 = arith.constant 0 : index
    %2 = vector.load %arg3[%c0_3, %c0_4] : memref<1x8xf32, #tpu.memory_space<vmem>>, vector<1x8xf32>
    %3 = vector.shape_cast %2 : vector<1x8xf32> to vector<1x1x8xf32>
    %4 = vector.broadcast %3 : vector<1x1x8xf32> to vector<16x16x8xf32>
    %5 = arith.mulf %1, %4 : vector<16x16x8xf32>
    %c0_5 = arith.constant 0 : index
    %c0_6 = arith.constant 0 : index
    %6 = vector.load %arg4[%c0_5, %c0_6] : memref<1x8xf32, #tpu.memory_space<vmem>>, vector<1x8xf32>
    %7 = vector.shape_cast %6 : vector<1x8xf32> to vector<1x1x8xf32>
    %8 = vector.broadcast %7 : vector<1x1x8xf32> to vector<16x16x8xf32>
    %9 = arith.addf %5, %8 : vector<16x16x8xf32>
    %cst = arith.constant 0.000000e+00 : f32
    %10 = vector.broadcast %cst : f32 to vector<16x16x8xf32>
    %11 = arith.maximumf %9, %10 : vector<16x16x8xf32>
    %c0_7 = arith.constant 0 : index
    %c0_8 = arith.constant 0 : index
    %c0_9 = arith.constant 0 : index
    %c0_10 = arith.constant 0 : index
    %12 = vector.load %arg5[%c0_7, %c0_8, %c0_9, %c0_10] : memref<1x16x16x8xf32, #tpu.memory_space<vmem>>, vector<1x16x16x8xf32>
    %13 = vector.shape_cast %12 : vector<1x16x16x8xf32> to vector<16x16x8xf32>
    %14 = vector.shape_cast %11 : vector<16x16x8xf32> to vector<1x16x16x8xf32>
    tpu.vector_store %arg5[%c0_7, %c0_8, %c0_9, %c0_10], %14 {strides = array<i32>} : memref<1x16x16x8xf32, #tpu.memory_space<vmem>>, vector<1x16x16x8xf32>,
    return
  }
  func.func @transform_0(%arg0: i32, %arg1: i32) -> (i32, i32, i32, i32) {
    %c0_i32 = arith.constant 0 : i32
    %c0_i32_0 = arith.constant 0 : i32
    %c0_i32_1 = arith.constant 0 : i32
    return %arg0, %arg1, %c0_i32, %c0_i32_0 : i32, i32, i32, i32
  }
  func.func @transform_1(%arg0: i32, %arg1: i32) -> (i32, i32) {
    %c0_i32 = arith.constant 0 : i32
    %c0_i32_0 = arith.constant 0 : i32
    %c0_i32_1 = arith.constant 0 : i32
    return %c0_i32, %c0_i32_0 : i32, i32
  }
  func.func @transform_2(%arg0: i32, %arg1: i32) -> (i32, i32) {
    %c0_i32 = arith.constant 0 : i32
    %c0_i32_0 = arith.constant 0 : i32
    %c0_i32_1 = arith.constant 0 : i32
    return %c0_i32, %c0_i32_0 : i32, i32
  }
  func.func @transform_3(%arg0: i32, %arg1: i32) -> (i32, i32, i32, i32) {
    %c0_i32 = arith.constant 0 : i32
    %c0_i32_0 = arith.constant 0 : i32
    %c0_i32_1 = arith.constant 0 : i32
    return %arg0, %arg1, %c0_i32, %c0_i32_0 : i32, i32, i32, i32
  }
}

</mosaic_0001>

<bundles_post_ra>
// kernel: conv_bn_relu.3
= control target key start
LH: loop header
LB: loop body
LE: loop exit
PB: predicated region body
PF: predicated region fallthrough
CT: control target
= control target key end

     0   :  { %s562_s12 = smov 0   ;;  %s564_s13 = smov 0   ;;  %s769_s0 = inlined_call_operand.vmem [shape: f32[2,16,18,8], index: 0, kind: input, shape index: {}]   ;;  %s770_s1 = inlined_call_operand.vmem [shape: f32[1,8], index: 1, kind: input, shape index: {}]   ;;  %s771_s2 = inlined_call_operand.vmem [shape: f32[1,8], index: 2, kind: input, shape index: {}]   ;;  %s772_s3 = inlined_call_operand.vmem [shape: f32[2,16,16,8], index: 3, kind: output, shape index: {}]  }
   0x1   :  { %s566_s14 = smov 0  }
   0x2 LB: > { %s25_s15 = sadd.s32 1, %s536_s13  ;;  %p484_p0 = scmp.ge.s32.totalorder %s540_s14, 1  ;;  %s540_s14 = sphi %s566_s14, %s13_s14   ;;  %s536_s13 = sphi %s564_s13, %s774_s13   ;;  %s532_s12 = sphi %s562_s12, %s773_s12  }
   0x3   : > { %p27_p1 = scmp.ge.s32.totalorder %s25_s15, 2  ;;  %p159_p2 = scmp.lt.s32.totalorder %s540_s14, 3 }
   0x5   : > { %s776_s15 = smov (%p27_p1, %s25_s15), 0  ;;  %p160_p3 = pnand %p484_p0, %p159_p2 }
   0x6   : > { %p194_p4 = scmp.lt.s32.totalorder (!%p160_p3), %s532_s12, 1 }
   0x7   : > { %163 = sbr.rel (%p160_p3) target bundleno = 55 (0x37), region = 32 }
   0xc   : > { %s778_s12 = smov (!%p194_p4, %s532_s12), 1  ;;  %v583_v0 = vld [vmem:[%s770_s1] ss:$0 sm:$0xff]  ;;  %vm351_vm0 = vcmask 64512  }
   0xd   : > { %s491_s16 = smul.u32 384, %s778_s12  ;;  %v593_v1 = vld [vmem:[%s771_s2] ss:$0 sm:$0xff]  ;;  %s490_s24 = sshll.u32 %s778_s12, 8 }
   0xe   : > { %s616_s27 = scalar_lea.vmem %s772_s3, %s490_s24 }
   0xf   : > { %s588_s21 = scalar_lea.vmem %s769_s0, %s491_s16 }
  0x10   : > { %v215_v2 = vld [vmem:[%s588_s21] sm:$0xff]  ;;  %v216_v3 = vld [vmem:[%s588_s21 + $0x8] sm:$0xff]  ;;  %v217_v4 = vld [vmem:[%s588_s21 + $0x18] sm:$0xff] }
  0x11   : > { %v251_v5 = vmul.f32 %v583_v0, %v215_v2  ;;  %v252_v6 = vmul.f32 %v583_v0, %v216_v3  ;;  %v253_v7 = vmul.f32 %v583_v0, %v217_v4  ;;  %v218_v8 = vld [vmem:[%s588_s21 + $0x20] sm:$0xff]  ;;  %v219_v9 = vld [vmem:[%s588_s21 + $0x30] sm:$0xff]  ;;  %v220_v10 = vld [vmem:[%s588_s21 + $0x38] sm:$0xff] }
  0x12   : > { %v254_v11 = vmul.f32 %v583_v0, %v218_v8  ;;  %v255_v12 = vmul.f32 %v583_v0, %v219_v9  ;;  %v256_v13 = vmul.f32 %v583_v0, %v220_v10  ;;  %v221_v14 = vld [vmem:[%s588_s21 + $0x48] sm:$0xff]  ;;  %v222_v15 = vld [vmem:[%s588_s21 + $0x50] sm:$0xff]  ;;  %v223_v24 = vld [vmem:[%s588_s21 + $0x60] sm:$0xff] }
  0x13   : > { %v287_v16 = vadd.f32 %v593_v1, %v251_v5  ;;  %v288_v17 = vadd.f32 %v593_v1, %v252_v6  ;;  %v289_v18 = vadd.f32 %v593_v1, %v253_v7  ;;  %v257_v19 = vmul.f32 %v583_v0, %v221_v14  ;;  %v224_v25 = vld [vmem:[%s588_s21 + $0x68] sm:$0xff]  ;;  %v225_v26 = vld [vmem:[%s588_s21 + $0x78] sm:$0xff]  ;;  %v226_v31 = vld [vmem:[%s588_s21 + $0x80] sm:$0xff] }
  0x14   : > { %v290_v20 = vadd.f32 %v593_v1, %v254_v11  ;;  %v291_v21 = vadd.f32 %v593_v1, %v255_v12  ;;  %v292_v22 = vadd.f32 %v593_v1, %v256_v13  ;;  %v258_v23 = vmul.f32 %v583_v0, %v222_v15  ;;  %v227_v32 = vld [vmem:[%s588_s21 + $0x90] sm:$0xff]  ;;  %v228_v33 = vld [vmem:[%s588_s21 + $0x98] sm:$0xff]  ;;  %v229_v37 = vld [vmem:[%s588_s21 + $0xa8] sm:$0xff] }
  0x15   : > { %v319_v27 = vmax.f32 %v287_v16, 0.0  ;;  %v320_v28 = vmax.f32 %v288_v17, 0.0  ;;  %v321_v29 = vmax.f32 %v289_v18, 0.0  ;;  %v293_v30 = vadd.f32 %v593_v1, %v257_v19  ;;  %v230_v42 = vld [vmem:[%s588_s21 + $0xb0] sm:$0xff]  ;;  %v231_v54 = vld [vmem:[%s588_s21 + $0xc0] sm:$0xff]  ;;  %v232_v55 = vld [vmem:[%s588_s21 + $0xc8] sm:$0xff] }
  0x16   : > { %v322_v34 = vmax.f32 %v290_v20, 0.0  ;;  %v323_v35 = vmax.f32 %v291_v21, 0.0  ;;  %v294_v36 = vadd.f32 %v593_v1, %v258_v23  ;;  %v324_v38 = vmax.f32 %v292_v22, 0.0  ;;  %v233_v56 = vld [vmem:[%s588_s21 + $0xd8] sm:$0xff]  ;;  %v234_v59 = vld [vmem:[%s588_s21 + $0xe0] sm:$0xff]  ;;  %v235_v63 = vld [vmem:[%s588_s21 + $0xf0] sm:$0xff] }
  0x17   : > { %352 = vst.msk [vmem:[%s616_s27] sm:$0xff] %vm351_vm0, %v319_v27  ;;  %v259_v39 = vmul.f32 %v583_v0, %v223_v24  ;;  %v260_v40 = vmul.f32 %v583_v0, %v224_v25  ;;  %v261_v41 = vmul.f32 %v583_v0, %v225_v26  ;;  %v325_v43 = vmax.f32 %v293_v30, 0.0  ;;  %v236_v6 = vld [vmem:[%s588_s21 + $0xf8] sm:$0xff]  ;;  %v237_v10 = vld [vmem:[%s588_s21 + $0x108] sm:$0xff]  ;;  %v238_v14 = vld [vmem:[%s588_s21 + $0x110] sm:$0xff] }
  0x18   : > { %353 = vst.msk [vmem:[%s616_s27 + $0x8] sm:$0xff] %vm351_vm0, %v320_v28  ;;  %v262_v44 = vmul.f32 %v583_v0, %v226_v31  ;;  %v263_v45 = vmul.f32 %v583_v0, %v227_v32  ;;  %v264_v46 = vmul.f32 %v583_v0, %v228_v33  ;;  %v265_v50 = vmul.f32 %v583_v0, %v229_v37  ;;  %v239_v18 = vld [vmem:[%s588_s21 + $0x120] sm:$0xff]  ;;  %v240_v22 = vld [vmem:[%s588_s21 + $0x128] sm:$0xff]  ;;  %v241_v26 = vld [vmem:[%s588_s21 + $0x138] sm:$0xff] }
  0x19   : > { %354 = vst.msk [vmem:[%s616_s27 + $0x10] sm:$0xff] %vm351_vm0, %v321_v29  ;;  %v295_v47 = vadd.f32 %v593_v1, %v259_v39  ;;  %v296_v48 = vadd.f32 %v593_v1, %v260_v40  ;;  %v297_v49 = vadd.f32 %v593_v1, %v261_v41  ;;  %v326_v51 = vmax.f32 %v294_v36, 0.0  ;;  %v242_v30 = vld [vmem:[%s588_s21 + $0x140] sm:$0xff] }
  0x1a   : > { %355 = vst.msk [vmem:[%s616_s27 + $0x18] sm:$0xff] %vm351_vm0, %v322_v34  ;;  %v298_v52 = vadd.f32 %v593_v1, %v262_v44  ;;  %v266_v53 = vmul.f32 %v583_v0, %v230_v42  ;;  %v299_v58 = vadd.f32 %v593_v1, %v263_v45  ;;  %v300_v62 = vadd.f32 %v593_v1, %v264_v46  ;;  %v243_v34 = vld [vmem:[%s588_s21 + $0x150] sm:$0xff]  ;;  %v245_v42 = vld [vmem:[%s588_s21 + $0x168] sm:$0xff] }
  0x1b   : > { %356 = vst.msk [vmem:[%s616_s27 + $0x20] sm:$0xff] %vm351_vm0, %v323_v35  ;;  %v327_v57 = vmax.f32 %v295_v47, 0.0  ;;  %v328_v60 = vmax.f32 %v296_v48, 0.0  ;;  %v329_v61 = vmax.f32 %v297_v49, 0.0  ;;  %v301_v2 = vadd.f32 %v593_v1, %v265_v50  ;;  %v246_v46 = vld [vmem:[%s588_s21 + $0x170] sm:$0xff] }
  0x1c   : > { %357 = vst.msk [vmem:[%s616_s27 + $0x28] sm:$0xff] %vm351_vm0, %v324_v38  ;;  %v267_v3 = vmul.f32 %v583_v0, %v231_v54  ;;  %v268_v4 = vmul.f32 %v583_v0, %v232_v55  ;;  %v269_v5 = vmul.f32 %v583_v0, %v233_v56  ;;  %v330_v7 = vmax.f32 %v298_v52, 0.0  ;;  %v244_v38 = vld [vmem:[%s588_s21 + $0x158] sm:$0xff] }
  0x1d   : > { %358 = vst.msk [vmem:[%s616_s27 + $0x30] sm:$0xff] %vm351_vm0, %v325_v43  ;;  %v302_v8 = vadd.f32 %v593_v1, %v266_v53  ;;  %v270_v9 = vmul.f32 %v583_v0, %v234_v59  ;;  %v331_v11 = vmax.f32 %v299_v58, 0.0  ;;  %v271_v13 = vmul.f32 %v583_v0, %v235_v63 }
  0x1e   : > { %359 = vst.msk [vmem:[%s616_s27 + $0x38] sm:$0xff] %vm351_vm0, %v326_v51  ;;  %v303_v12 = vadd.f32 %v593_v1, %v267_v3  ;;  %v332_v15 = vmax.f32 %v300_v62, 0.0  ;;  %v304_v16 = vadd.f32 %v593_v1, %v268_v4  ;;  %v272_v17 = vmul.f32 %v583_v0, %v236_v6 }
  0x1f   : > { %360 = vst.msk [vmem:[%s616_s27 + $0x40] sm:$0xff] %vm351_vm0, %v327_v57  ;;  %v333_v19 = vmax.f32 %v301_v2, 0.0  ;;  %v305_v20 = vadd.f32 %v593_v1, %v269_v5  ;;  %v273_v21 = vmul.f32 %v583_v0, %v237_v10  ;;  %v334_v23 = vmax.f32 %v302_v8, 0.0 }
  0x20   : > { %361 = vst.msk [vmem:[%s616_s27 + $0x48] sm:$0xff] %vm351_vm0, %v328_v60  ;;  %v306_v24 = vadd.f32 %v593_v1, %v270_v9  ;;  %v274_v25 = vmul.f32 %v583_v0, %v238_v14  ;;  %v335_v27 = vmax.f32 %v303_v12, 0.0  ;;  %v307_v28 = vadd.f32 %v593_v1, %v271_v13 }
  0x21   : > { %362 = vst.msk [vmem:[%s616_s27 + $0x50] sm:$0xff] %vm351_vm0, %v329_v61  ;;  %v275_v29 = vmul.f32 %v583_v0, %v239_v18  ;;  %v336_v31 = vmax.f32 %v304_v16, 0.0  ;;  %v308_v32 = vadd.f32 %v593_v1, %v272_v17  ;;  %v276_v33 = vmul.f32 %v583_v0, %v240_v22 }
  0x22   : > { %363 = vst.msk [vmem:[%s616_s27 + $0x58] sm:$0xff] %vm351_vm0, %v330_v7  ;;  %v337_v35 = vmax.f32 %v305_v20, 0.0  ;;  %v309_v36 = vadd.f32 %v593_v1, %v273_v21  ;;  %v277_v37 = vmul.f32 %v583_v0, %v241_v26  ;;  %v338_v39 = vmax.f32 %v306_v24, 0.0 }
  0x23   : > { %364 = vst.msk [vmem:[%s616_s27 + $0x60] sm:$0xff] %vm351_vm0, %v331_v11  ;;  %v310_v40 = vadd.f32 %v593_v1, %v274_v25  ;;  %v278_v41 = vmul.f32 %v583_v0, %v242_v30  ;;  %v339_v43 = vmax.f32 %v307_v28, 0.0  ;;  %v311_v44 = vadd.f32 %v593_v1, %v275_v29 }
  0x24   : > { %365 = vst.msk [vmem:[%s616_s27 + $0x68] sm:$0xff] %vm351_vm0, %v332_v15  ;;  %v279_v45 = vmul.f32 %v583_v0, %v243_v34  ;;  %v340_v47 = vmax.f32 %v308_v32, 0.0  ;;  %v312_v48 = vadd.f32 %v593_v1, %v276_v33  ;;  %v280_v49 = vmul.f32 %v583_v0, %v244_v38 }
  0x25   : > { %366 = vst.msk [vmem:[%s616_s27 + $0x70] sm:$0xff] %vm351_vm0, %v333_v19  ;;  %v341_v50 = vmax.f32 %v309_v36, 0.0  ;;  %v313_v51 = vadd.f32 %v593_v1, %v277_v37  ;;  %v281_v52 = vmul.f32 %v583_v0, %v245_v42  ;;  %v342_v53 = vmax.f32 %v310_v40, 0.0 }
  0x26   : > { %367 = vst.msk [vmem:[%s616_s27 + $0x78] sm:$0xff] %vm351_vm0, %v334_v23  ;;  %v314_v54 = vadd.f32 %v593_v1, %v278_v41  ;;  %v282_v55 = vmul.f32 %v583_v0, %v246_v46  ;;  %v343_v56 = vmax.f32 %v311_v44, 0.0  ;;  %v315_v57 = vadd.f32 %v593_v1, %v279_v45 }
  0x27   : > { %368 = vst.msk [vmem:[%s616_s27 + $0x80] sm:$0xff] %vm351_vm0, %v335_v27  ;;  %v344_v58 = vmax.f32 %v312_v48, 0.0  ;;  %v316_v59 = vadd.f32 %v593_v1, %v280_v49  ;;  %v345_v60 = vmax.f32 %v313_v51, 0.0  ;;  %v317_v0 = vadd.f32 %v593_v1, %v281_v52 }
  0x28   : > { %369 = vst.msk [vmem:[%s616_s27 + $0x88] sm:$0xff] %vm351_vm0, %v336_v31  ;;  %v346_v61 = vmax.f32 %v314_v54, 0.0  ;;  %v318_v62 = vadd.f32 %v593_v1, %v282_v55  ;;  %v347_v63 = vmax.f32 %v315_v57, 0.0 }
  0x29   : > { %370 = vst.msk [vmem:[%s616_s27 + $0x90] sm:$0xff] %vm351_vm0, %v337_v35  ;;  %v348_v2 = vmax.f32 %v316_v59, 0.0  ;;  %v349_v3 = vmax.f32 %v317_v0, 0.0 }
  0x2a   : > { %371 = vst.msk [vmem:[%s616_s27 + $0x98] sm:$0xff] %vm351_vm0, %v338_v39  ;;  %v350_v4 = vmax.f32 %v318_v62, 0.0 }
  0x2b   : > { %372 = vst.msk [vmem:[%s616_s27 + $0xa0] sm:$0xff] %vm351_vm0, %v339_v43 }
  0x2c   : > { %373 = vst.msk [vmem:[%s616_s27 + $0xa8] sm:$0xff] %vm351_vm0, %v340_v47 }
  0x2d   : > { %374 = vst.msk [vmem:[%s616_s27 + $0xb0] sm:$0xff] %vm351_vm0, %v341_v50 }
  0x2e   : > { %375 = vst.msk [vmem:[%s616_s27 + $0xb8] sm:$0xff] %vm351_vm0, %v342_v53 }
  0x2f   : > { %376 = vst.msk [vmem:[%s616_s27 + $0xc0] sm:$0xff] %vm351_vm0, %v343_v56 }
  0x30   : > { %377 = vst.msk [vmem:[%s616_s27 + $0xc8] sm:$0xff] %vm351_vm0, %v344_v58 }
  0x31   : > { %378 = vst.msk [vmem:[%s616_s27 + $0xd0] sm:$0xff] %vm351_vm0, %v345_v60 }
  0x32   : > { %379 = vst.msk [vmem:[%s616_s27 + $0xd8] sm:$0xff] %vm351_vm0, %v346_v61 }
  0x33   : > { %380 = vst.msk [vmem:[%s616_s27 + $0xe0] sm:$0xff] %vm351_vm0, %v347_v63 }
  0x34   : > { %381 = vst.msk [vmem:[%s616_s27 + $0xe8] sm:$0xff] %vm351_vm0, %v348_v2 }
  0x35   : > { %382 = vst.msk [vmem:[%s616_s27 + $0xf0] sm:$0xff] %vm351_vm0, %v349_v3 }
  0x36   : > { %383 = vst.msk [vmem:[%s616_s27 + $0xf8] sm:$0xff] %vm351_vm0, %v350_v4 }
  0x37 PF: > { %s13_s14 = sadd.s32 1, %s540_s14   ;;  %s773_s12 = smov %s536_s13 }
  0x38   : > { %p10_p5 = scmp.ge.s32.totalorder %s13_s14, 4   ;;  %s774_s13 = smov %s776_s15 }
  0x3a   :  { %12 = sbr.rel (!%p10_p5) target bundleno = 2 (0x2), region = 62 }

// kernel: conv_bn_relu.2
= control target key start
LH: loop header
LB: loop body
LE: loop exit
PB: predicated region body
PF: predicated region fallthrough
CT: control target
= control target key end

     0   :  { %s4631_s15 = smov 0   ;;  %s4633_s16 = smov 0   ;;  %s7225_s0 = inlined_call_operand.vmem [shape: f32[2,326,3], index: 0, kind: input, shape index: {}]   ;;  %s7226_s1 = inlined_call_operand.vmem [shape: f32[27,8], index: 1, kind: input, shape index: {}]   ;;  %s7227_s2 = inlined_call_operand.vmem [shape: f32[2,288,8], index: 2, kind: output, shape index: {0}]   ;;  %s7228_s3 = inlined_call_operand.vmem [shape: f32[2,1,8,8], index: 3, kind: output, shape index: {1}]   ;;  %s7229_s4 = inlined_call_operand.vmem [shape: f32[2,1,8,8], index: 4, kind: output, shape index: {2}]  }
   0x1   :  { %s4635_s17 = smov 0  }
   0x2 LB: > { %s27_s18 = sadd.s32 1, %s4591_s16  ;;  %p4193_p0 = scmp.ge.s32.totalorder %s4595_s17, 1  ;;  %s4595_s17 = sphi %s4635_s17, %s15_s17   ;;  %s4591_s16 = sphi %s4633_s16, %s7353_s16   ;;  %s4587_s15 = sphi %s4631_s15, %s7352_s15  }
   0x3   : > { %p29_p1 = scmp.ge.s32.totalorder %s27_s18, 2  ;;  %p185_p2 = scmp.lt.s32.totalorder %s4595_s17, 3 }
   0x5   : > { %s7355_s18 = smov (%p29_p1, %s27_s18), 0  ;;  %p186_p3 = pnand %p4193_p0, %p185_p2 }
   0x6   : > { %p229_p4 = scmp.lt.s32.totalorder (!%p186_p3), %s4587_s15, 1  ;;  %s4597_s23 = smov (!%p186_p3), 3  }
   0x7   : > { %189 = sbr.rel (%p186_p3) target bundleno = 1056 (0x420), region = 28  ;;  %s4598_s24 = smov (!%p186_p3), 6  }
   0x8   : > { %s4599_s25 = smov (!%p186_p3), 9   ;;  %s4600_s26 = smov (!%p186_p3), 12  }
   0x9   : > { %s4601_s27 = smov (!%p186_p3), 15   ;;  %s4602_s28 = smov (!%p186_p3), 18  }
   0xa   : > { %s4603_s29 = smov (!%p186_p3), 21   ;;  %s4604_s30 = smov (!%p186_p3), 24  }
   0xc   : > { %s7357_s15 = smov (!%p229_p4, %s4587_s15), 1  ;;  %vm296_vm0 = vcmask 23552   ;;  %vm515_vm1 = vcmask 48152   ;;  %vm734_vm2 = vcmask 72752   ;;  %vm953_vm3 = vcmask 97352  }
   0xd   : > { %s4537_s19 = smul.u32 328, %s7357_s15  ;;  %vm1172_vm4 = vcmask 121952   ;;  %vm1391_vm5 = vcmask 146552   ;;  %vm1610_vm6 = vcmask 171152   ;;  %vm2234_vm7 = vcmask 1042432   ;;  %s4196_s21 = sshll.u32 %s7357_s15, 3 }
   0xe   : > { %vm1829_vm8 = vcmask 195752   ;;  %vm2048_vm9 = vcmask 220352   ;;  %vm2125_vm10 = vcmask 220160   ;;  %s4538_s13 = smul.u32 288, %s7357_s15 }
   0xf   : > { %s4655_s22 = scalar_lea.vmem %s7225_s0, %s4537_s19 }
  0x10   : > { %v4202_v0 = vld [vmem:[%s4655_s22 + $0x21] sm:$0xff]  ;;  %v4200_v1 = vld [vmem:[%s4655_s22 + $0x11] sm:$0xff]  ;;  %v4203_v3 = vld [vmem:[%s4655_s22 + $0x29] sm:$0xff]  ;;  %s5886_s20 = scalar_lea.vmem %s7227_s2, %s4538_s13 }
  0x11   : > { %v4198_v2 = vld [vmem:[%s4655_s22 + $0x1] sm:$0xff]  ;;  %415 = vrot.lane.b32.xlu2 %v4202_v0, %s4597_s23  ;;  %411 = vrot.lane.b32.xlu1 %v4200_v1, %s4597_s23  ;;  %v4201_v4 = vld [vmem:[%s4655_s22 + $0x19] sm:$0xff] }
  0x12   : > { %407 = vrot.lane.b32.xlu0 %v4198_v2, %s4597_s23  ;;  %v4199_v5 = vld [vmem:[%s4655_s22 + $0x9] sm:$0xff]  ;;  %v4206_v6 = vld [vmem:[%s4655_s22 + $0x41] sm:$0xff]  ;;  %v4205_v7 = vld [vmem:[%s4655_s22 + $0x39] sm:$0xff] }
  0x13   : > { %v4204_v8 = vld [vmem:[%s4655_s22 + $0x31] sm:$0xff]  ;;  %v4209_v9 = vld [vmem:[%s4655_s22 + $0x59] sm:$0xff]  ;;  %v4207_v11 = vld [vmem:[%s4655_s22 + $0x49] sm:$0xff] }
  0x14   : > { %v4208_v10 = vld [vmem:[%s4655_s22 + $0x51] sm:$0xff]  ;;  %v4211_v13 = vld [vmem:[%s4655_s22 + $0x69] sm:$0xff]  ;;  %v4210_v14 = vld [vmem:[%s4655_s22 + $0x61] sm:$0xff] }
  0x15   : > { %v4212_v12 = vld [vmem:[%s4655_s22 + $0x71] sm:$0xff]  ;;  %v4215_v15 = vld [vmem:[%s4655_s22 + $0x89] sm:$0xff]  ;;  %v4214_v16 = vld [vmem:[%s4655_s22 + $0x81] sm:$0xff] }
  0x16   : > { %v4213_v17 = vld [vmem:[%s4655_s22 + $0x79] sm:$0xff]  ;;  %v4218_v18 = vld [vmem:[%s4655_s22 + $0xa1] sm:$0xff]  ;;  %v4216_v20 = vld [vmem:[%s4655_s22 + $0x91] sm:$0xff] }
  0x17   : > { %v4217_v19 = vld [vmem:[%s4655_s22 + $0x99] sm:$0xff]  ;;  %v4220_v22 = vld [vmem:[%s4655_s22 + $0xb1] sm:$0xff]  ;;  %v4219_v23 = vld [vmem:[%s4655_s22 + $0xa9] sm:$0xff] }
  0x18   : > { %v4221_v21 = vld [vmem:[%s4655_s22 + $0xb9] sm:$0xff]  ;;  %v4224_v25 = vld [vmem:[%s4655_s22 + $0xd1] sm:$0xff]  ;;  %v4223_v26 = vld [vmem:[%s4655_s22 + $0xc9] sm:$0xff] }
  0x19   : > { %417 = vrot.lane.b32.xlu2 %v4203_v3, %s4597_s23  ;;  %413 = vrot.lane.b32.xlu1 %v4201_v4, %s4597_s23  ;;  %v264_v24 = vld [vmem:[%s4655_s22 + $0x20] sm:$0xff]  ;;  %v265_v28 = vld [vmem:[%s4655_s22 + $0x28] sm:$0xff] }
  0x1a   : > { %409 = vrot.lane.b32.xlu0 %v4199_v5, %s4597_s23  ;;  %301 = vst.msk [vmem:[#allocation2 + $0x20] sm:$0xff] %vm296_vm0, %v264_v24  ;;  %v4222_v27 = vld [vmem:[%s4655_s22 + $0xc1] sm:$0xff]  ;;  %v4227_v29 = vld [vmem:[%s4655_s22 + $0xe9] sm:$0xff]  ;;  %v4225_v31 = vld [vmem:[%s4655_s22 + $0xd9] sm:$0xff] }
  0x1b   : > { %302 = vst.msk [vmem:[#allocation2 + $0x28] sm:$0xff] %vm296_vm0, %v265_v28  ;;  %v4226_v30 = vld [vmem:[%s4655_s22 + $0xe1] sm:$0xff]  ;;  %v4229_v34 = vld [vmem:[%s4655_s22 + $0xf9] sm:$0xff]  ;;  %v4228_v35 = vld [vmem:[%s4655_s22 + $0xf1] sm:$0xff] }
  0x1c   : > { %v268_v32 = vld [vmem:[%s4655_s22 + $0x40] sm:$0xff]  ;;  %v271_v36 = vld [vmem:[%s4655_s22 + $0x58] sm:$0xff]  ;;  %v262_v38 = vld [vmem:[%s4655_s22 + $0x10] sm:$0xff] }
  0x1d   : > { %305 = vst.msk [vmem:[#allocation2 + $0x40] sm:$0xff] %vm296_vm0, %v268_v32  ;;  %v4230_v33 = vld [vmem:[%s4655_s22 + $0x101] sm:$0xff]  ;;  %v4233_v39 = vld [vmem:[%s4655_s22 + $0x119] sm:$0xff]  ;;  %v4232_v40 = vld [vmem:[%s4655_s22 + $0x111] sm:$0xff] }
  0x1e   : > { %v260_v37 = vld [vmem:[%s4655_s22] sm:$0xff]  ;;  %308 = vst.msk [vmem:[#allocation2 + $0x58] sm:$0xff] %vm296_vm0, %v271_v36  ;;  %v4231_v41 = vld [vmem:[%s4655_s22 + $0x109] sm:$0xff]  ;;  %v263_v44 = vld [vmem:[%s4655_s22 + $0x18] sm:$0xff] }
  0x1f   : > { %299 = vst.msk [vmem:[#allocation2 + $0x10] sm:$0xff] %vm296_vm0, %v262_v38  ;;  %v274_v43 = vld [vmem:[%s4655_s22 + $0x70] sm:$0xff]  ;;  %v261_v45 = vld [vmem:[%s4655_s22 + $0x8] sm:$0xff]  ;;  %v267_v51 = vld [vmem:[%s4655_s22 + $0x38] sm:$0xff] }
  0x20   : > { %297 = vst.msk [vmem:[#allocation2] sm:$0xff] %vm296_vm0, %v260_v37  ;;  %v4747_v46 = vld [vmem:[%s4655_s22 + $0x12] sm:$0xff]  ;;  %v4235_v47 = vld [vmem:[%s4655_s22 + $0xa] sm:$0xff]  ;;  %v4234_v48 = vld [vmem:[%s4655_s22 + $0x2] sm:$0xff] }
  0x21   : > { %423 = vrot.lane.b32.xlu2 %v4206_v6, %s4597_s23  ;;  %421 = vrot.lane.b32.xlu1 %v4205_v7, %s4597_s23  ;;  %311 = vst.msk [vmem:[#allocation2 + $0x70] sm:$0xff] %vm296_vm0, %v274_v43  ;;  %v277_v50 = vld [vmem:[%s4655_s22 + $0x88] sm:$0xff]  ;;  %v266_v52 = vld [vmem:[%s4655_s22 + $0x30] sm:$0xff] }
  0x22   : > { %419 = vrot.lane.b32.xlu0 %v4204_v8, %s4597_s23  ;;  %300 = vst.msk [vmem:[#allocation2 + $0x18] sm:$0xff] %vm296_vm0, %v263_v44  ;;  %v4763_v53 = vld [vmem:[%s4655_s22 + $0x2a] sm:$0xff]  ;;  %v4766_v54 = vld [vmem:[%s4655_s22 + $0x22] sm:$0xff]  ;;  %v4770_v55 = vld [vmem:[%s4655_s22 + $0x1a] sm:$0xff] }
  0x23   : > { %298 = vst.msk [vmem:[#allocation2 + $0x8] sm:$0xff] %vm296_vm0, %v261_v45  ;;  %v280_v57 = vld [vmem:[%s4655_s22 + $0xa0] sm:$0xff]  ;;  %v270_v58 = vld [vmem:[%s4655_s22 + $0x50] sm:$0xff]  ;;  %v269_v59 = vld [vmem:[%s4655_s22 + $0x48] sm:$0xff] }
  0x24   : > { %314 = vst.msk [vmem:[#allocation2 + $0x88] sm:$0xff] %vm296_vm0, %v277_v50  ;;  %v4785_v60 = vld [vmem:[%s4655_s22 + $0x42] sm:$0xff]  ;;  %v4788_v61 = vld [vmem:[%s4655_s22 + $0x3a] sm:$0xff]  ;;  %v4792_v62 = vld [vmem:[%s4655_s22 + $0x32] sm:$0xff] }
  0x25   : > { %304 = vst.msk [vmem:[#allocation2 + $0x38] sm:$0xff] %vm296_vm0, %v267_v51  ;;  %v283_v2 = vld [vmem:[%s4655_s22 + $0xb8] sm:$0xff]  ;;  %v273_v3 = vld [vmem:[%s4655_s22 + $0x68] sm:$0xff]  ;;  %v272_v6 = vld [vmem:[%s4655_s22 + $0x60] sm:$0xff] }
  0x26   : > { %303 = vst.msk [vmem:[#allocation2 + $0x30] sm:$0xff] %vm296_vm0, %v266_v52  ;;  %v4807_v4 = vld [vmem:[%s4655_s22 + $0x5a] sm:$0xff]  ;;  %v4810_v5 = vld [vmem:[%s4655_s22 + $0x52] sm:$0xff]  ;;  %v4814_v7 = vld [vmem:[%s4655_s22 + $0x4a] sm:$0xff] }
  0x27   : > { %317 = vst.msk [vmem:[#allocation2 + $0xa0] sm:$0xff] %vm296_vm0, %v280_v57  ;;  %v278_v24 = vld [vmem:[%s4655_s22 + $0x90] sm:$0xff]  ;;  %v4882_v32 = vld [vmem:[%s4655_s22 + $0x9a] sm:$0xff]  ;;  %v4933_v52 = vld [vmem:[%s4655_s22 + $0xc2] sm:$0xff] }
  0x28   : > { %307 = vst.msk [vmem:[#allocation2 + $0x50] sm:$0xff] %vm296_vm0, %v270_v58  ;;  %v295_v38 = vld [vmem:[%s4655_s22 + $0x118] sm:$0xff]  ;;  %v4910_v43 = vld [vmem:[%s4655_s22 + $0xaa] sm:$0xff] }
  0x29   : > { %429 = vrot.lane.b32.xlu2 %v4209_v9, %s4597_s23  ;;  %427 = vrot.lane.b32.xlu1 %v4208_v10, %s4597_s23  ;;  %306 = vst.msk [vmem:[#allocation2 + $0x48] sm:$0xff] %vm296_vm0, %v269_v59  ;;  %v4927_v50 = vld [vmem:[%s4655_s22 + $0xd2] sm:$0xff]  ;;  %v4930_v51 = vld [vmem:[%s4655_s22 + $0xca] sm:$0xff] }
  0x2a   : > { %425 = vrot.lane.b32.xlu0 %v4207_v11, %s4597_s23  ;;  %320 = vst.msk [vmem:[#allocation2 + $0xb8] sm:$0xff] %vm296_vm0, %v283_v2  ;;  %v286_v11 = vld [vmem:[%s4655_s22 + $0xd0] sm:$0xff]  ;;  %v291_v59 = vld [vmem:[%s4655_s22 + $0xf8] sm:$0xff] }
  0x2b   : > { %310 = vst.msk [vmem:[#allocation2 + $0x68] sm:$0xff] %vm296_vm0, %v273_v3  ;;  %v4955_v2 = vld [vmem:[%s4655_s22 + $0xda] sm:$0xff] }
  0x2c   : > { %309 = vst.msk [vmem:[#allocation2 + $0x60] sm:$0xff] %vm296_vm0, %v272_v6 }
  0x2d   : > { %323 = vst.msk [vmem:[#allocation2 + $0xd0] sm:$0xff] %vm296_vm0, %v286_v11  ;;  %v4971_v11 = vld [vmem:[%s4655_s22 + $0x102] sm:$0xff] }
  0x2e   : > { %315 = vst.msk [vmem:[#allocation2 + $0x90] sm:$0xff] %vm296_vm0, %v278_v24  ;;  %v4997_v24 = vld [vmem:[%s4655_s22 + $0x10a] sm:$0xff] }
  0x2f   : > { %332 = vst.msk [vmem:[#allocation2 + $0x118] sm:$0xff] %vm296_vm0, %v295_v38 }
  0x30   : > { %328 = vst.msk [vmem:[#allocation2 + $0xf8] sm:$0xff] %vm296_vm0, %v291_v59 }
  0x31   : > { %435 = vrot.lane.b32.xlu2 %v4212_v12, %s4597_s23  ;;  %433 = vrot.lane.b32.xlu1 %v4211_v13, %s4597_s23  ;;  %v276_v12 = vld [vmem:[%s4655_s22 + $0x80] sm:$0xff]  ;;  %v4831_v13 = vld [vmem:[%s4655_s22 + $0x72] sm:$0xff] }
  0x32   : > { %431 = vrot.lane.b32.xlu0 %v4210_v14, %s4597_s23  ;;  %v4834_v14 = vld [vmem:[%s4655_s22 + $0x6a] sm:$0xff]  ;;  %313 = vst.msk [vmem:[#allocation2 + $0x80] sm:$0xff] %vm296_vm0, %v276_v12  ;;  %v4974_v12 = vld [vmem:[%s4655_s22 + $0xfa] sm:$0xff] }
  0x39   : > { %441 = vrot.lane.b32.xlu2 %v4215_v15, %s4597_s23  ;;  %439 = vrot.lane.b32.xlu1 %v4214_v16, %s4597_s23  ;;  %v275_v15 = vld [vmem:[%s4655_s22 + $0x78] sm:$0xff]  ;;  %v4838_v16 = vld [vmem:[%s4655_s22 + $0x62] sm:$0xff] }
  0x3a   : > { %437 = vrot.lane.b32.xlu0 %v4213_v17, %s4597_s23  ;;  %312 = vst.msk [vmem:[#allocation2 + $0x78] sm:$0xff] %vm296_vm0, %v275_v15  ;;  %v4977_v15 = vld [vmem:[%s4655_s22 + $0xf2] sm:$0xff] }
  0x41   : > { %447 = vrot.lane.b32.xlu2 %v4218_v18, %s4597_s23  ;;  %445 = vrot.lane.b32.xlu1 %v4217_v19, %s4597_s23 }
  0x42   : > { %443 = vrot.lane.b32.xlu0 %v4216_v20, %s4597_s23  ;;  %v289_v20 = vld [vmem:[%s4655_s22 + $0xe8] sm:$0xff] }
  0x43   : > { %326 = vst.msk [vmem:[#allocation2 + $0xe8] sm:$0xff] %vm296_vm0, %v289_v20  ;;  %v4991_v20 = vld [vmem:[%s4655_s22 + $0x11a] sm:$0xff] }
  0x49   : > { %453 = vrot.lane.b32.xlu2 %v4221_v21, %s4597_s23  ;;  %451 = vrot.lane.b32.xlu1 %v4220_v22, %s4597_s23  ;;  %v279_v21 = vld [vmem:[%s4655_s22 + $0x98] sm:$0xff]  ;;  %v4855_v22 = vld [vmem:[%s4655_s22 + $0x8a] sm:$0xff] }
  0x4a   : > { %449 = vrot.lane.b32.xlu0 %v4219_v23, %s4597_s23  ;;  %v4858_v23 = vld [vmem:[%s4655_s22 + $0x82] sm:$0xff]  ;;  %316 = vst.msk [vmem:[#allocation2 + $0x98] sm:$0xff] %vm296_vm0, %v279_v21  ;;  %v4994_v21 = vld [vmem:[%s4655_s22 + $0x112] sm:$0xff] }
  0x51   : > { %459 = vrot.lane.b32.xlu2 %v4224_v25, %s4597_s23  ;;  %457 = vrot.lane.b32.xlu1 %v4223_v26, %s4597_s23  ;;  %v4862_v25 = vld [vmem:[%s4655_s22 + $0x7a] sm:$0xff] }
  0x52   : > { %455 = vrot.lane.b32.xlu0 %v4222_v27, %s4597_s23 }
  0x59   : > { %465 = vrot.lane.b32.xlu2 %v4227_v29, %s4597_s23  ;;  %463 = vrot.lane.b32.xlu1 %v4226_v30, %s4597_s23  ;;  %v292_v29 = vld [vmem:[%s4655_s22 + $0x100] sm:$0xff]  ;;  %v282_v30 = vld [vmem:[%s4655_s22 + $0xb0] sm:$0xff] }
  0x5a   : > { %461 = vrot.lane.b32.xlu0 %v4225_v31, %s4597_s23  ;;  %v4879_v31 = vld [vmem:[%s4655_s22 + $0xa2] sm:$0xff]  ;;  %329 = vst.msk [vmem:[#allocation2 + $0x100] sm:$0xff] %vm296_vm0, %v292_v29 }
  0x5b   : > { %319 = vst.msk [vmem:[#allocation2 + $0xb0] sm:$0xff] %vm296_vm0, %v282_v30 }
  0x61   : > { %471 = vrot.lane.b32.xlu2 %v4230_v33, %s4597_s23  ;;  %469 = vrot.lane.b32.xlu1 %v4229_v34, %s4597_s23  ;;  %v281_v33 = vld [vmem:[%s4655_s22 + $0xa8] sm:$0xff]  ;;  %v4886_v34 = vld [vmem:[%s4655_s22 + $0x92] sm:$0xff] }
  0x62   : > { %467 = vrot.lane.b32.xlu0 %v4228_v35, %s4597_s23  ;;  %318 = vst.msk [vmem:[#allocation2 + $0xa8] sm:$0xff] %vm296_vm0, %v281_v33 }
  0x69   : > { %477 = vrot.lane.b32.xlu2 %v4233_v39, %s4597_s23  ;;  %475 = vrot.lane.b32.xlu1 %v4232_v40, %s4597_s23  ;;  %v285_v39 = vld [vmem:[%s4655_s22 + $0xc8] sm:$0xff]  ;;  %v4903_v40 = vld [vmem:[%s4655_s22 + $0xba] sm:$0xff] }
  0x6a   : > { %473 = vrot.lane.b32.xlu0 %v4231_v41, %s4597_s23  ;;  %v4906_v41 = vld [vmem:[%s4655_s22 + $0xb2] sm:$0xff]  ;;  %322 = vst.msk [vmem:[#allocation2 + $0xc8] sm:$0xff] %vm296_vm0, %v285_v39 }
  0x6b   : > { %v416_v42 = vpop.permute.xlu2 %415 }
  0x6c   : > { %520 = vst.msk [vmem:[#allocation2 + $0x20] sm:$0xff] %vm515_vm1, %v416_v42  ;;  %v284_v42 = vld [vmem:[%s4655_s22 + $0xc0] sm:$0xff] }
  0x6d   : > { %321 = vst.msk [vmem:[#allocation2 + $0xc0] sm:$0xff] %vm296_vm0, %v284_v42 }
  0x71   : > { %630 = vrot.lane.b32.xlu2 %v4747_v46, %s4598_s24  ;;  %628 = vrot.lane.b32.xlu1 %v4235_v47, %s4598_s24 }
  0x72   : > { %626 = vrot.lane.b32.xlu0 %v4234_v48, %s4598_s24  ;;  %v288_v48 = vld [vmem:[%s4655_s22 + $0xe0] sm:$0xff] }
  0x73   : > { %v418_v49 = vpop.permute.xlu2 %417  ;;  %325 = vst.msk [vmem:[#allocation2 + $0xe0] sm:$0xff] %vm296_vm0, %v288_v48  ;;  %v4304_v48 = vld [vmem:[%s4655_s22 + $0x122] sm:$0xff] }
  0x74   : > { %521 = vst.msk [vmem:[#allocation2 + $0x28] sm:$0xff] %vm515_vm1, %v418_v49  ;;  %v287_v49 = vld [vmem:[%s4655_s22 + $0xd8] sm:$0xff] }
  0x75   : > { %324 = vst.msk [vmem:[#allocation2 + $0xd8] sm:$0xff] %vm296_vm0, %v287_v49 }
  0x79   : > { %636 = vrot.lane.b32.xlu2 %v4763_v53, %s4598_s24  ;;  %634 = vrot.lane.b32.xlu1 %v4766_v54, %s4598_s24 }
  0x7a   : > { %632 = vrot.lane.b32.xlu0 %v4770_v55, %s4598_s24 }
  0x7b   : > { %v424_v56 = vpop.permute.xlu2 %423 }
  0x7c   : > { %524 = vst.msk [vmem:[#allocation2 + $0x40] sm:$0xff] %vm515_vm1, %v424_v56 }
  0x81   : > { %642 = vrot.lane.b32.xlu2 %v4785_v60, %s4598_s24  ;;  %640 = vrot.lane.b32.xlu1 %v4788_v61, %s4598_s24 }
  0x82   : > { %638 = vrot.lane.b32.xlu0 %v4792_v62, %s4598_s24 }
  0x83   : > { %v430_v63 = vpop.permute.xlu2 %429  ;;  %v412_v0 = vpop.permute.xlu1 %411 }
  0x84   : > { %527 = vst.msk [vmem:[#allocation2 + $0x58] sm:$0xff] %vm515_vm1, %v430_v63  ;;  %v408_v1 = vpop.permute.xlu0 %407  ;;  %v290_v63 = vld [vmem:[%s4655_s22 + $0xf0] sm:$0xff] }
  0x85   : > { %518 = vst.msk [vmem:[#allocation2 + $0x10] sm:$0xff] %vm515_vm1, %v412_v0  ;;  %v4949_v0 = vld [vmem:[%s4655_s22 + $0xea] sm:$0xff] }
  0x86   : > { %516 = vst.msk [vmem:[#allocation2] sm:$0xff] %vm515_vm1, %v408_v1  ;;  %v4952_v1 = vld [vmem:[%s4655_s22 + $0xe2] sm:$0xff] }
  0x87   : > { %327 = vst.msk [vmem:[#allocation2 + $0xf0] sm:$0xff] %vm296_vm0, %v290_v63 }
  0x89   : > { %648 = vrot.lane.b32.xlu2 %v4807_v4, %s4598_s24  ;;  %646 = vrot.lane.b32.xlu1 %v4810_v5, %s4598_s24 }
  0x8a   : > { %644 = vrot.lane.b32.xlu0 %v4814_v7, %s4598_s24 }
  0x8b   : > { %v436_v8 = vpop.permute.xlu2 %435  ;;  %v414_v9 = vpop.permute.xlu1 %413 }
  0x8c   : > { %530 = vst.msk [vmem:[#allocation2 + $0x70] sm:$0xff] %vm515_vm1, %v436_v8  ;;  %v410_v10 = vpop.permute.xlu0 %409 }
  0x8d   : > { %519 = vst.msk [vmem:[#allocation2 + $0x18] sm:$0xff] %vm515_vm1, %v414_v9  ;;  %v294_v9 = vld [vmem:[%s4655_s22 + $0x110] sm:$0xff] }
  0x8e   : > { %517 = vst.msk [vmem:[#allocation2 + $0x8] sm:$0xff] %vm515_vm1, %v410_v10  ;;  %v293_v10 = vld [vmem:[%s4655_s22 + $0x108] sm:$0xff] }
  0x8f   : > { %331 = vst.msk [vmem:[#allocation2 + $0x110] sm:$0xff] %vm296_vm0, %v294_v9  ;;  %v4314_v9 = vld [vmem:[%s4655_s22 + $0x53] sm:$0xff] }
  0x90   : > { %330 = vst.msk [vmem:[#allocation2 + $0x108] sm:$0xff] %vm296_vm0, %v293_v10  ;;  %v4313_v10 = vld [vmem:[%s4655_s22 + $0x4b] sm:$0xff] }
  0x91   : > { %654 = vrot.lane.b32.xlu2 %v4831_v13, %s4598_s24  ;;  %652 = vrot.lane.b32.xlu1 %v4834_v14, %s4598_s24 }
  0x92   : > { %650 = vrot.lane.b32.xlu0 %v4838_v16, %s4598_s24 }
  0x93   : > { %v442_v17 = vpop.permute.xlu2 %441  ;;  %v422_v18 = vpop.permute.xlu1 %421 }
  0x94   : > { %533 = vst.msk [vmem:[#allocation2 + $0x88] sm:$0xff] %vm515_vm1, %v442_v17  ;;  %v420_v19 = vpop.permute.xlu0 %419 }
  0x95   : > { %523 = vst.msk [vmem:[#allocation2 + $0x38] sm:$0xff] %vm515_vm1, %v422_v18 }
  0x96   : > { %522 = vst.msk [vmem:[#allocation2 + $0x30] sm:$0xff] %vm515_vm1, %v420_v19 }
  0x99   : > { %660 = vrot.lane.b32.xlu2 %v4855_v22, %s4598_s24  ;;  %658 = vrot.lane.b32.xlu1 %v4858_v23, %s4598_s24 }
  0x9a   : > { %656 = vrot.lane.b32.xlu0 %v4862_v25, %s4598_s24 }
  0x9b   : > { %v448_v26 = vpop.permute.xlu2 %447  ;;  %v428_v27 = vpop.permute.xlu1 %427 }
  0x9c   : > { %536 = vst.msk [vmem:[#allocation2 + $0xa0] sm:$0xff] %vm515_vm1, %v448_v26  ;;  %v426_v28 = vpop.permute.xlu0 %425 }
  0x9d   : > { %526 = vst.msk [vmem:[#allocation2 + $0x50] sm:$0xff] %vm515_vm1, %v428_v27 }
  0x9e   : > { %525 = vst.msk [vmem:[#allocation2 + $0x48] sm:$0xff] %vm515_vm1, %v426_v28 }
  0xa1   : > { %666 = vrot.lane.b32.xlu2 %v4879_v31, %s4598_s24  ;;  %664 = vrot.lane.b32.xlu1 %v4882_v32, %s4598_s24 }
  0xa2   : > { %662 = vrot.lane.b32.xlu0 %v4886_v34, %s4598_s24 }
  0xa3   : > { %v454_v35 = vpop.permute.xlu2 %453  ;;  %v434_v36 = vpop.permute.xlu1 %433 }
  0xa4   : > { %539 = vst.msk [vmem:[#allocation2 + $0xb8] sm:$0xff] %vm515_vm1, %v454_v35  ;;  %v432_v37 = vpop.permute.xlu0 %431 }
  0xa5   : > { %529 = vst.msk [vmem:[#allocation2 + $0x68] sm:$0xff] %vm515_vm1, %v434_v36 }
  0xa6   : > { %528 = vst.msk [vmem:[#allocation2 + $0x60] sm:$0xff] %vm515_vm1, %v432_v37 }
  0xa9   : > { %672 = vrot.lane.b32.xlu2 %v4903_v40, %s4598_s24  ;;  %670 = vrot.lane.b32.xlu1 %v4906_v41, %s4598_s24 }
  0xaa   : > { %668 = vrot.lane.b32.xlu0 %v4910_v43, %s4598_s24 }
  0xab   : > { %v460_v44 = vpop.permute.xlu2 %459  ;;  %v440_v45 = vpop.permute.xlu1 %439 }
  0xac   : > { %542 = vst.msk [vmem:[#allocation2 + $0xd0] sm:$0xff] %vm515_vm1, %v460_v44  ;;  %v438_v47 = vpop.permute.xlu0 %437 }
  0xad   : > { %532 = vst.msk [vmem:[#allocation2 + $0x80] sm:$0xff] %vm515_vm1, %v440_v45 }
  0xae   : > { %531 = vst.msk [vmem:[#allocation2 + $0x78] sm:$0xff] %vm515_vm1, %v438_v47  ;;  %v4305_v47 = vld [vmem:[%s4655_s22 + $0x12a] sm:$0xff] }
  0xb1   : > { %678 = vrot.lane.b32.xlu2 %v4927_v50, %s4598_s24  ;;  %676 = vrot.lane.b32.xlu1 %v4930_v51, %s4598_s24 }
  0xb2   : > { %674 = vrot.lane.b32.xlu0 %v4933_v52, %s4598_s24 }
  0xb3   : > { %v466_v56 = vpop.permute.xlu2 %465  ;;  %v446_v57 = vpop.permute.xlu1 %445 }
  0xb4   : > { %545 = vst.msk [vmem:[#allocation2 + $0xe8] sm:$0xff] %vm515_vm1, %v466_v56  ;;  %v444_v58 = vpop.permute.xlu0 %443  ;;  %v4307_v56 = vld [vmem:[%s4655_s22 + $0x1b] sm:$0xff] }
  0xb5   : > { %535 = vst.msk [vmem:[#allocation2 + $0x98] sm:$0xff] %vm515_vm1, %v446_v57  ;;  %v4306_v57 = vld [vmem:[%s4655_s22 + $0x13] sm:$0xff] }
  0xb6   : > { %534 = vst.msk [vmem:[#allocation2 + $0x90] sm:$0xff] %vm515_vm1, %v444_v58 }
  0xb9   : > { %684 = vrot.lane.b32.xlu2 %v4949_v0, %s4598_s24  ;;  %682 = vrot.lane.b32.xlu1 %v4952_v1, %s4598_s24 }
  0xba   : > { %680 = vrot.lane.b32.xlu0 %v4955_v2, %s4598_s24 }
  0xbb   : > { %v472_v3 = vpop.permute.xlu2 %471  ;;  %v452_v6 = vpop.permute.xlu1 %451 }
  0xbc   : > { %548 = vst.msk [vmem:[#allocation2 + $0x100] sm:$0xff] %vm515_vm1, %v472_v3  ;;  %v450_v8 = vpop.permute.xlu0 %449 }
  0xbd   : > { %538 = vst.msk [vmem:[#allocation2 + $0xb0] sm:$0xff] %vm515_vm1, %v452_v6 }
  0xbe   : > { %537 = vst.msk [vmem:[#allocation2 + $0xa8] sm:$0xff] %vm515_vm1, %v450_v8 }
  0xc1   : > { %690 = vrot.lane.b32.xlu2 %v4971_v11, %s4598_s24  ;;  %688 = vrot.lane.b32.xlu1 %v4974_v12, %s4598_s24 }
  0xc2   : > { %686 = vrot.lane.b32.xlu0 %v4977_v15, %s4598_s24 }
  0xc3   : > { %v478_v17 = vpop.permute.xlu2 %477  ;;  %v458_v18 = vpop.permute.xlu1 %457 }
  0xc4   : > { %551 = vst.msk [vmem:[#allocation2 + $0x118] sm:$0xff] %vm515_vm1, %v478_v17  ;;  %v456_v19 = vpop.permute.xlu0 %455 }
  0xc5   : > { %541 = vst.msk [vmem:[#allocation2 + $0xc8] sm:$0xff] %vm515_vm1, %v458_v18  ;;  %v4317_v18 = vld [vmem:[%s4655_s22 + $0x6b] sm:$0xff] }
  0xc6   : > { %540 = vst.msk [vmem:[#allocation2 + $0xc0] sm:$0xff] %vm515_vm1, %v456_v19  ;;  %v4316_v19 = vld [vmem:[%s4655_s22 + $0x63] sm:$0xff] }
  0xc9   : > { %696 = vrot.lane.b32.xlu2 %v4991_v20, %s4598_s24  ;;  %694 = vrot.lane.b32.xlu1 %v4994_v21, %s4598_s24 }
  0xca   : > { %692 = vrot.lane.b32.xlu0 %v4997_v24, %s4598_s24  ;;  %s250_s24 = scalar_lea.vmem %s7228_s3, %s4196_s21 }
  0xcb   : > { %v631_v26 = vpop.permute.xlu2 %630  ;;  %v464_v27 = vpop.permute.xlu1 %463 }
  0xcc   : > { %737 = vst.msk [vmem:[#allocation2 + $0x10] sm:$0xff] %vm734_vm2, %v631_v26  ;;  %v462_v28 = vpop.permute.xlu0 %461 }
  0xcd   : > { %544 = vst.msk [vmem:[#allocation2 + $0xe0] sm:$0xff] %vm515_vm1, %v464_v27  ;;  %v4320_v27 = vld [vmem:[%s4655_s22 + $0x83] sm:$0xff] }
  0xce   : > { %543 = vst.msk [vmem:[#allocation2 + $0xd8] sm:$0xff] %vm515_vm1, %v462_v28  ;;  %v4319_v28 = vld [vmem:[%s4655_s22 + $0x7b] sm:$0xff] }
  0xd1   : > { %849 = vrot.lane.b32.xlu2 %v4766_v54, %s4599_s25  ;;  %847 = vrot.lane.b32.xlu1 %v4770_v55, %s4599_s25 }
  0xd2   : > { %845 = vrot.lane.b32.xlu0 %v4747_v46, %s4599_s25 }
  0xd3   : > { %v637_v29 = vpop.permute.xlu2 %636  ;;  %v470_v30 = vpop.permute.xlu1 %469 }
  0xd4   : > { %740 = vst.msk [vmem:[#allocation2 + $0x28] sm:$0xff] %vm734_vm2, %v637_v29  ;;  %v468_v33 = vpop.permute.xlu0 %467  ;;  %v4318_v29 = vld [vmem:[%s4655_s22 + $0x73] sm:$0xff] }
  0xd5   : > { %547 = vst.msk [vmem:[#allocation2 + $0xf8] sm:$0xff] %vm515_vm1, %v470_v30 }
  0xd6   : > { %546 = vst.msk [vmem:[#allocation2 + $0xf0] sm:$0xff] %vm515_vm1, %v468_v33 }
  0xd9   : > { %855 = vrot.lane.b32.xlu2 %v4788_v61, %s4599_s25  ;;  %853 = vrot.lane.b32.xlu1 %v4792_v62, %s4599_s25 }
  0xda   : > { %851 = vrot.lane.b32.xlu0 %v4763_v53, %s4599_s25 }
  0xdb   : > { %v643_v54 = vpop.permute.xlu2 %642  ;;  %v476_v46 = vpop.permute.xlu1 %475 }
  0xdc   : > { %743 = vst.msk [vmem:[#allocation2 + $0x40] sm:$0xff] %vm734_vm2, %v643_v54  ;;  %v474_v55 = vpop.permute.xlu0 %473 }
  0xdd   : > { %550 = vst.msk [vmem:[#allocation2 + $0x110] sm:$0xff] %vm515_vm1, %v476_v46  ;;  %v4323_v46 = vld [vmem:[%s4655_s22 + $0x9b] sm:$0xff] }
  0xde   : > { %549 = vst.msk [vmem:[#allocation2 + $0x108] sm:$0xff] %vm515_vm1, %v474_v55  ;;  %v4322_v55 = vld [vmem:[%s4655_s22 + $0x93] sm:$0xff] }
  0xe1   : > { %861 = vrot.lane.b32.xlu2 %v4810_v5, %s4599_s25  ;;  %859 = vrot.lane.b32.xlu1 %v4814_v7, %s4599_s25 }
  0xe2   : > { %857 = vrot.lane.b32.xlu0 %v4785_v60, %s4599_s25 }
  0xe3   : > { %v649_v61 = vpop.permute.xlu2 %648  ;;  %v629_v53 = vpop.permute.xlu1 %628 }
  0xe4   : > { %746 = vst.msk [vmem:[#allocation2 + $0x58] sm:$0xff] %vm734_vm2, %v649_v61  ;;  %v627_v62 = vpop.permute.xlu0 %626  ;;  %v4321_v61 = vld [vmem:[%s4655_s22 + $0x8b] sm:$0xff] }
  0xe5   : > { %736 = vst.msk [vmem:[#allocation2 + $0x8] sm:$0xff] %vm734_vm2, %v629_v53 }
  0xe6   : > { %735 = vst.msk [vmem:[#allocation2] sm:$0xff] %vm734_vm2, %v627_v62 }
  0xe9   : > { %867 = vrot.lane.b32.xlu2 %v4834_v14, %s4599_s25  ;;  %865 = vrot.lane.b32.xlu1 %v4838_v16, %s4599_s25 }
  0xea   : > { %863 = vrot.lane.b32.xlu0 %v4807_v4, %s4599_s25 }
  0xeb   : > { %v655_v5 = vpop.permute.xlu2 %654  ;;  %v635_v60 = vpop.permute.xlu1 %634 }
  0xec   : > { %749 = vst.msk [vmem:[#allocation2 + $0x70] sm:$0xff] %vm734_vm2, %v655_v5  ;;  %v633_v7 = vpop.permute.xlu0 %632 }
  0xed   : > { %739 = vst.msk [vmem:[#allocation2 + $0x20] sm:$0xff] %vm734_vm2, %v635_v60  ;;  %v4326_v60 = vld [vmem:[%s4655_s22 + $0xb3] sm:$0xff] }
  0xee   : > { %738 = vst.msk [vmem:[#allocation2 + $0x18] sm:$0xff] %vm734_vm2, %v633_v7  ;;  %v4325_v7 = vld [vmem:[%s4655_s22 + $0xab] sm:$0xff] }
  0xf1   : > { %873 = vrot.lane.b32.xlu2 %v4858_v23, %s4599_s25  ;;  %871 = vrot.lane.b32.xlu1 %v4862_v25, %s4599_s25 }
  0xf2   : > { %869 = vrot.lane.b32.xlu0 %v4831_v13, %s4599_s25 }
  0xf3   : > { %v661_v14 = vpop.permute.xlu2 %660  ;;  %v641_v4 = vpop.permute.xlu1 %640 }
  0xf4   : > { %752 = vst.msk [vmem:[#allocation2 + $0x88] sm:$0xff] %vm734_vm2, %v661_v14  ;;  %v639_v16 = vpop.permute.xlu0 %638  ;;  %v4324_v14 = vld [vmem:[%s4655_s22 + $0xa3] sm:$0xff] }
  0xf5   : > { %742 = vst.msk [vmem:[#allocation2 + $0x38] sm:$0xff] %vm734_vm2, %v641_v4 }
  0xf6   : > { %741 = vst.msk [vmem:[#allocation2 + $0x30] sm:$0xff] %vm734_vm2, %v639_v16 }
  0xf9   : > { %879 = vrot.lane.b32.xlu2 %v4882_v32, %s4599_s25  ;;  %877 = vrot.lane.b32.xlu1 %v4886_v34, %s4599_s25 }
  0xfa   : > { %875 = vrot.lane.b32.xlu0 %v4855_v22, %s4599_s25 }
  0xfb   : > { %v667_v23 = vpop.permute.xlu2 %666  ;;  %v647_v13 = vpop.permute.xlu1 %646 }
  0xfc   : > { %755 = vst.msk [vmem:[#allocation2 + $0xa0] sm:$0xff] %vm734_vm2, %v667_v23  ;;  %v645_v25 = vpop.permute.xlu0 %644 }
  0xfd   : > { %745 = vst.msk [vmem:[#allocation2 + $0x50] sm:$0xff] %vm734_vm2, %v647_v13  ;;  %v4329_v13 = vld [vmem:[%s4655_s22 + $0xcb] sm:$0xff] }
  0xfe   : > { %744 = vst.msk [vmem:[#allocation2 + $0x48] sm:$0xff] %vm734_vm2, %v645_v25  ;;  %v4328_v25 = vld [vmem:[%s4655_s22 + $0xc3] sm:$0xff] }
 0x101   : > { %885 = vrot.lane.b32.xlu2 %v4906_v41, %s4599_s25  ;;  %883 = vrot.lane.b32.xlu1 %v4910_v43, %s4599_s25 }
 0x102   : > { %881 = vrot.lane.b32.xlu0 %v4879_v31, %s4599_s25 }
 0x103   : > { %v673_v32 = vpop.permute.xlu2 %672  ;;  %v653_v22 = vpop.permute.xlu1 %652 }
 0x104   : > { %758 = vst.msk [vmem:[#allocation2 + $0xb8] sm:$0xff] %vm734_vm2, %v673_v32  ;;  %v651_v34 = vpop.permute.xlu0 %650  ;;  %v4327_v32 = vld [vmem:[%s4655_s22 + $0xbb] sm:$0xff] }
 0x105   : > { %748 = vst.msk [vmem:[#allocation2 + $0x68] sm:$0xff] %vm734_vm2, %v653_v22 }
 0x106   : > { %747 = vst.msk [vmem:[#allocation2 + $0x60] sm:$0xff] %vm734_vm2, %v651_v34 }
 0x109   : > { %891 = vrot.lane.b32.xlu2 %v4930_v51, %s4599_s25  ;;  %889 = vrot.lane.b32.xlu1 %v4933_v52, %s4599_s25  ;;  %v4308_v52 = vld [vmem:[%s4655_s22 + $0x23] sm:$0xff] }
 0x10a   : > { %887 = vrot.lane.b32.xlu0 %v4903_v40, %s4599_s25 }
 0x10b   : > { %v679_v35 = vpop.permute.xlu2 %678  ;;  %v659_v31 = vpop.permute.xlu1 %658 }
 0x10c   : > { %761 = vst.msk [vmem:[#allocation2 + $0xd0] sm:$0xff] %vm734_vm2, %v679_v35  ;;  %v657_v36 = vpop.permute.xlu0 %656 }
 0x10d   : > { %751 = vst.msk [vmem:[#allocation2 + $0x80] sm:$0xff] %vm734_vm2, %v659_v31  ;;  %v4332_v31 = vld [vmem:[%s4655_s22 + $0xe3] sm:$0xff] }
 0x10e   : > { %750 = vst.msk [vmem:[#allocation2 + $0x78] sm:$0xff] %vm734_vm2, %v657_v36  ;;  %v4331_v36 = vld [vmem:[%s4655_s22 + $0xdb] sm:$0xff] }
 0x111   : > { %897 = vrot.lane.b32.xlu2 %v4952_v1, %s4599_s25  ;;  %895 = vrot.lane.b32.xlu1 %v4955_v2, %s4599_s25  ;;  %v4310_v1 = vld [vmem:[%s4655_s22 + $0x33] sm:$0xff]  ;;  %v4309_v2 = vld [vmem:[%s4655_s22 + $0x2b] sm:$0xff] }
 0x112   : > { %893 = vrot.lane.b32.xlu0 %v4927_v50, %s4599_s25 }
 0x113   : > { %v685_v37 = vpop.permute.xlu2 %684  ;;  %v665_v38 = vpop.permute.xlu1 %664 }
 0x114   : > { %764 = vst.msk [vmem:[#allocation2 + $0xe8] sm:$0xff] %vm734_vm2, %v685_v37  ;;  %v663_v39 = vpop.permute.xlu0 %662  ;;  %v4330_v37 = vld [vmem:[%s4655_s22 + $0xd3] sm:$0xff] }
 0x115   : > { %754 = vst.msk [vmem:[#allocation2 + $0x98] sm:$0xff] %vm734_vm2, %v665_v38 }
 0x116   : > { %753 = vst.msk [vmem:[#allocation2 + $0x90] sm:$0xff] %vm734_vm2, %v663_v39 }
 0x119   : > { %903 = vrot.lane.b32.xlu2 %v4974_v12, %s4599_s25  ;;  %901 = vrot.lane.b32.xlu1 %v4977_v15, %s4599_s25 }
 0x11a   : > { %899 = vrot.lane.b32.xlu0 %v4949_v0, %s4599_s25  ;;  %v4311_v0 = vld [vmem:[%s4655_s22 + $0x3b] sm:$0xff] }
 0x11b   : > { %v691_v40 = vpop.permute.xlu2 %690  ;;  %v671_v41 = vpop.permute.xlu1 %670 }
 0x11c   : > { %767 = vst.msk [vmem:[#allocation2 + $0x100] sm:$0xff] %vm734_vm2, %v691_v40  ;;  %v669_v42 = vpop.permute.xlu0 %668 }
 0x11d   : > { %757 = vst.msk [vmem:[#allocation2 + $0xb0] sm:$0xff] %vm734_vm2, %v671_v41  ;;  %v4335_v41 = vld [vmem:[%s4655_s22 + $0xfb] sm:$0xff] }
 0x11e   : > { %756 = vst.msk [vmem:[#allocation2 + $0xa8] sm:$0xff] %vm734_vm2, %v669_v42  ;;  %v4334_v42 = vld [vmem:[%s4655_s22 + $0xf3] sm:$0xff] }
 0x121   : > { %909 = vrot.lane.b32.xlu2 %v4994_v21, %s4599_s25  ;;  %907 = vrot.lane.b32.xlu1 %v4997_v24, %s4599_s25 }
 0x122   : > { %905 = vrot.lane.b32.xlu0 %v4971_v11, %s4599_s25  ;;  %v4312_v11 = vld [vmem:[%s4655_s22 + $0x43] sm:$0xff] }
 0x123   : > { %v697_v43 = vpop.permute.xlu2 %696  ;;  %v677_v44 = vpop.permute.xlu1 %676 }
 0x124   : > { %770 = vst.msk [vmem:[#allocation2 + $0x118] sm:$0xff] %vm734_vm2, %v697_v43  ;;  %v675_v45 = vpop.permute.xlu0 %674  ;;  %v4333_v43 = vld [vmem:[%s4655_s22 + $0xeb] sm:$0xff] }
 0x125   : > { %760 = vst.msk [vmem:[#allocation2 + $0xc8] sm:$0xff] %vm734_vm2, %v677_v44 }
 0x126   : > { %759 = vst.msk [vmem:[#allocation2 + $0xc0] sm:$0xff] %vm734_vm2, %v675_v45 }
 0x129   : > { %915 = vrot.lane.b32.xlu2 %v4305_v47, %s4599_s25  ;;  %913 = vrot.lane.b32.xlu1 %v4304_v48, %s4599_s25  ;;  %v4338_v48 = vld [vmem:[%s4655_s22 + $0x113] sm:$0xff] }
 0x12a   : > { %911 = vrot.lane.b32.xlu0 %v4991_v20, %s4599_s25  ;;  %v4315_v20 = vld [vmem:[%s4655_s22 + $0x5b] sm:$0xff] }
 0x12b   : > { %v850_v49 = vpop.permute.xlu2 %849  ;;  %v683_v50 = vpop.permute.xlu1 %682 }
 0x12c   : > { %956 = vst.msk [vmem:[#allocation2 + $0x10] sm:$0xff] %vm953_vm3, %v850_v49  ;;  %v681_v51 = vpop.permute.xlu0 %680  ;;  %v4337_v49 = vld [vmem:[%s4655_s22 + $0x10b] sm:$0xff] }
 0x12d   : > { %763 = vst.msk [vmem:[#allocation2 + $0xe0] sm:$0xff] %vm734_vm2, %v683_v50  ;;  %v4336_v50 = vld [vmem:[%s4655_s22 + $0x103] sm:$0xff] }
 0x12e   : > { %762 = vst.msk [vmem:[#allocation2 + $0xd8] sm:$0xff] %vm734_vm2, %v681_v51 }
 0x131   : > { %1068 = vrot.lane.b32.xlu2 %v4308_v52, %s4600_s26  ;;  %1066 = vrot.lane.b32.xlu1 %v4307_v56, %s4600_s26 }
 0x132   : > { %1064 = vrot.lane.b32.xlu0 %v4306_v57, %s4600_s26  ;;  %v4341_v57 = vld [vmem:[%s4655_s22 + $0x12b] sm:$0xff] }
 0x133   : > { %v856_v58 = vpop.permute.xlu2 %855  ;;  %v689_v59 = vpop.permute.xlu1 %688 }
 0x134   : > { %959 = vst.msk [vmem:[#allocation2 + $0x28] sm:$0xff] %vm953_vm3, %v856_v58  ;;  %v687_v63 = vpop.permute.xlu0 %686  ;;  %v4340_v58 = vld [vmem:[%s4655_s22 + $0x123] sm:$0xff] }
 0x135   : > { %766 = vst.msk [vmem:[#allocation2 + $0xf8] sm:$0xff] %vm734_vm2, %v689_v59  ;;  %v4339_v59 = vld [vmem:[%s4655_s22 + $0x11b] sm:$0xff] }
 0x136   : > { %765 = vst.msk [vmem:[#allocation2 + $0xf0] sm:$0xff] %vm734_vm2, %v687_v63 }
 0x139   : > { %1074 = vrot.lane.b32.xlu2 %v4311_v0, %s4600_s26  ;;  %1072 = vrot.lane.b32.xlu1 %v4310_v1, %s4600_s26 }
 0x13a   : > { %1070 = vrot.lane.b32.xlu0 %v4309_v2, %s4600_s26  ;;  %v5225_v2 = vld [vmem:[%s4655_s22 + $0x24] sm:$0xff] }
 0x13b   : > { %v862_v3 = vpop.permute.xlu2 %861  ;;  %v695_v6 = vpop.permute.xlu1 %694 }
 0x13c   : > { %962 = vst.msk [vmem:[#allocation2 + $0x40] sm:$0xff] %vm953_vm3, %v862_v3  ;;  %v693_v8 = vpop.permute.xlu0 %692  ;;  %v4343_v3 = vld [vmem:[%s4655_s22 + $0x1c] sm:$0xff] }
 0x13d   : > { %769 = vst.msk [vmem:[#allocation2 + $0x110] sm:$0xff] %vm734_vm2, %v695_v6  ;;  %v4342_v6 = vld [vmem:[%s4655_s22 + $0x14] sm:$0xff] }
 0x13e   : > { %768 = vst.msk [vmem:[#allocation2 + $0x108] sm:$0xff] %vm734_vm2, %v693_v8 }
 0x141   : > { %1080 = vrot.lane.b32.xlu2 %v4314_v9, %s4600_s26  ;;  %1078 = vrot.lane.b32.xlu1 %v4313_v10, %s4600_s26 }
 0x142   : > { %1076 = vrot.lane.b32.xlu0 %v4312_v11, %s4600_s26  ;;  %v5237_v11 = vld [vmem:[%s4655_s22 + $0x3c] sm:$0xff] }
 0x143   : > { %v868_v12 = vpop.permute.xlu2 %867  ;;  %v848_v15 = vpop.permute.xlu1 %847 }
 0x144   : > { %965 = vst.msk [vmem:[#allocation2 + $0x58] sm:$0xff] %vm953_vm3, %v868_v12  ;;  %v846_v17 = vpop.permute.xlu0 %845  ;;  %v5240_v12 = vld [vmem:[%s4655_s22 + $0x34] sm:$0xff] }
 0x145   : > { %955 = vst.msk [vmem:[#allocation2 + $0x8] sm:$0xff] %vm953_vm3, %v848_v15  ;;  %v5243_v15 = vld [vmem:[%s4655_s22 + $0x2c] sm:$0xff] }
 0x146   : > { %954 = vst.msk [vmem:[#allocation2] sm:$0xff] %vm953_vm3, %v846_v17 }
 0x149   : > { %1086 = vrot.lane.b32.xlu2 %v4317_v18, %s4600_s26  ;;  %1084 = vrot.lane.b32.xlu1 %v4316_v19, %s4600_s26 }
 0x14a   : > { %1082 = vrot.lane.b32.xlu0 %v4315_v20, %s4600_s26  ;;  %v5255_v20 = vld [vmem:[%s4655_s22 + $0x54] sm:$0xff] }
 0x14b   : > { %v874_v21 = vpop.permute.xlu2 %873  ;;  %v854_v24 = vpop.permute.xlu1 %853 }
 0x14c   : > { %968 = vst.msk [vmem:[#allocation2 + $0x70] sm:$0xff] %vm953_vm3, %v874_v21  ;;  %v852_v26 = vpop.permute.xlu0 %851  ;;  %v5258_v21 = vld [vmem:[%s4655_s22 + $0x4c] sm:$0xff] }
 0x14d   : > { %958 = vst.msk [vmem:[#allocation2 + $0x20] sm:$0xff] %vm953_vm3, %v854_v24  ;;  %v5261_v24 = vld [vmem:[%s4655_s22 + $0x44] sm:$0xff] }
 0x14e   : > { %957 = vst.msk [vmem:[#allocation2 + $0x18] sm:$0xff] %vm953_vm3, %v852_v26 }
 0x151   : > { %1092 = vrot.lane.b32.xlu2 %v4320_v27, %s4600_s26  ;;  %1090 = vrot.lane.b32.xlu1 %v4319_v28, %s4600_s26 }
 0x152   : > { %1088 = vrot.lane.b32.xlu0 %v4318_v29, %s4600_s26  ;;  %v5273_v29 = vld [vmem:[%s4655_s22 + $0x6c] sm:$0xff] }
 0x153   : > { %v880_v30 = vpop.permute.xlu2 %879  ;;  %v860_v33 = vpop.permute.xlu1 %859 }
 0x154   : > { %971 = vst.msk [vmem:[#allocation2 + $0x88] sm:$0xff] %vm953_vm3, %v880_v30  ;;  %v858_v54 = vpop.permute.xlu0 %857  ;;  %v5276_v30 = vld [vmem:[%s4655_s22 + $0x64] sm:$0xff] }
 0x155   : > { %961 = vst.msk [vmem:[#allocation2 + $0x38] sm:$0xff] %vm953_vm3, %v860_v33  ;;  %v5279_v33 = vld [vmem:[%s4655_s22 + $0x5c] sm:$0xff] }
 0x156   : > { %960 = vst.msk [vmem:[#allocation2 + $0x30] sm:$0xff] %vm953_vm3, %v858_v54 }
 0x159   : > { %1098 = vrot.lane.b32.xlu2 %v4323_v46, %s4600_s26  ;;  %1096 = vrot.lane.b32.xlu1 %v4322_v55, %s4600_s26 }
 0x15a   : > { %1094 = vrot.lane.b32.xlu0 %v4321_v61, %s4600_s26  ;;  %v5291_v61 = vld [vmem:[%s4655_s22 + $0x84] sm:$0xff] }
 0x15b   : > { %v886_v53 = vpop.permute.xlu2 %885  ;;  %v866_v62 = vpop.permute.xlu1 %865 }
 0x15c   : > { %974 = vst.msk [vmem:[#allocation2 + $0xa0] sm:$0xff] %vm953_vm3, %v886_v53  ;;  %v864_v5 = vpop.permute.xlu0 %863  ;;  %v5294_v53 = vld [vmem:[%s4655_s22 + $0x7c] sm:$0xff] }
 0x15d   : > { %964 = vst.msk [vmem:[#allocation2 + $0x50] sm:$0xff] %vm953_vm3, %v866_v62  ;;  %v5297_v62 = vld [vmem:[%s4655_s22 + $0x74] sm:$0xff] }
 0x15e   : > { %963 = vst.msk [vmem:[#allocation2 + $0x48] sm:$0xff] %vm953_vm3, %v864_v5 }
 0x161   : > { %1104 = vrot.lane.b32.xlu2 %v4326_v60, %s4600_s26  ;;  %1102 = vrot.lane.b32.xlu1 %v4325_v7, %s4600_s26 }
 0x162   : > { %1100 = vrot.lane.b32.xlu0 %v4324_v14, %s4600_s26  ;;  %v5309_v14 = vld [vmem:[%s4655_s22 + $0x9c] sm:$0xff] }
 0x163   : > { %v892_v4 = vpop.permute.xlu2 %891  ;;  %v872_v16 = vpop.permute.xlu1 %871 }
 0x164   : > { %977 = vst.msk [vmem:[#allocation2 + $0xb8] sm:$0xff] %vm953_vm3, %v892_v4  ;;  %v870_v23 = vpop.permute.xlu0 %869  ;;  %v5312_v4 = vld [vmem:[%s4655_s22 + $0x94] sm:$0xff] }
 0x165   : > { %967 = vst.msk [vmem:[#allocation2 + $0x68] sm:$0xff] %vm953_vm3, %v872_v16  ;;  %v5315_v16 = vld [vmem:[%s4655_s22 + $0x8c] sm:$0xff] }
 0x166   : > { %966 = vst.msk [vmem:[#allocation2 + $0x60] sm:$0xff] %vm953_vm3, %v870_v23 }
 0x169   : > { %1110 = vrot.lane.b32.xlu2 %v4329_v13, %s4600_s26  ;;  %1108 = vrot.lane.b32.xlu1 %v4328_v25, %s4600_s26 }
 0x16a   : > { %1106 = vrot.lane.b32.xlu0 %v4327_v32, %s4600_s26  ;;  %v5327_v32 = vld [vmem:[%s4655_s22 + $0xb4] sm:$0xff] }
 0x16b   : > { %v898_v22 = vpop.permute.xlu2 %897  ;;  %v878_v34 = vpop.permute.xlu1 %877 }
 0x16c   : > { %980 = vst.msk [vmem:[#allocation2 + $0xd0] sm:$0xff] %vm953_vm3, %v898_v22  ;;  %v876_v35 = vpop.permute.xlu0 %875  ;;  %v5330_v22 = vld [vmem:[%s4655_s22 + $0xac] sm:$0xff] }
 0x16d   : > { %970 = vst.msk [vmem:[#allocation2 + $0x80] sm:$0xff] %vm953_vm3, %v878_v34  ;;  %v5333_v34 = vld [vmem:[%s4655_s22 + $0xa4] sm:$0xff] }
 0x16e   : > { %969 = vst.msk [vmem:[#allocation2 + $0x78] sm:$0xff] %vm953_vm3, %v876_v35 }
 0x171   : > { %1116 = vrot.lane.b32.xlu2 %v4332_v31, %s4600_s26  ;;  %1114 = vrot.lane.b32.xlu1 %v4331_v36, %s4600_s26 }
 0x172   : > { %1112 = vrot.lane.b32.xlu0 %v4330_v37, %s4600_s26  ;;  %v5345_v37 = vld [vmem:[%s4655_s22 + $0xcc] sm:$0xff] }
 0x173   : > { %v904_v38 = vpop.permute.xlu2 %903  ;;  %v884_v39 = vpop.permute.xlu1 %883 }
 0x174   : > { %983 = vst.msk [vmem:[#allocation2 + $0xe8] sm:$0xff] %vm953_vm3, %v904_v38  ;;  %v882_v40 = vpop.permute.xlu0 %881  ;;  %v5348_v38 = vld [vmem:[%s4655_s22 + $0xc4] sm:$0xff] }
 0x175   : > { %973 = vst.msk [vmem:[#allocation2 + $0x98] sm:$0xff] %vm953_vm3, %v884_v39  ;;  %v5351_v39 = vld [vmem:[%s4655_s22 + $0xbc] sm:$0xff] }
 0x176   : > { %972 = vst.msk [vmem:[#allocation2 + $0x90] sm:$0xff] %vm953_vm3, %v882_v40 }
 0x179   : > { %1122 = vrot.lane.b32.xlu2 %v4335_v41, %s4600_s26  ;;  %1120 = vrot.lane.b32.xlu1 %v4334_v42, %s4600_s26 }
 0x17a   : > { %1118 = vrot.lane.b32.xlu0 %v4333_v43, %s4600_s26  ;;  %v5363_v43 = vld [vmem:[%s4655_s22 + $0xe4] sm:$0xff] }
 0x17b   : > { %v910_v44 = vpop.permute.xlu2 %909  ;;  %v890_v45 = vpop.permute.xlu1 %889 }
 0x17c   : > { %986 = vst.msk [vmem:[#allocation2 + $0x100] sm:$0xff] %vm953_vm3, %v910_v44  ;;  %v888_v47 = vpop.permute.xlu0 %887  ;;  %v5366_v44 = vld [vmem:[%s4655_s22 + $0xdc] sm:$0xff] }
 0x17d   : > { %976 = vst.msk [vmem:[#allocation2 + $0xb0] sm:$0xff] %vm953_vm3, %v890_v45  ;;  %v5369_v45 = vld [vmem:[%s4655_s22 + $0xd4] sm:$0xff] }
 0x17e   : > { %975 = vst.msk [vmem:[#allocation2 + $0xa8] sm:$0xff] %vm953_vm3, %v888_v47 }
 0x181   : > { %1128 = vrot.lane.b32.xlu2 %v4338_v48, %s4600_s26  ;;  %1126 = vrot.lane.b32.xlu1 %v4337_v49, %s4600_s26 }
 0x182   : > { %1124 = vrot.lane.b32.xlu0 %v4336_v50, %s4600_s26  ;;  %v5381_v50 = vld [vmem:[%s4655_s22 + $0xfc] sm:$0xff] }
 0x183   : > { %v916_v51 = vpop.permute.xlu2 %915  ;;  %v896_v52 = vpop.permute.xlu1 %895 }
 0x184   : > { %989 = vst.msk [vmem:[#allocation2 + $0x118] sm:$0xff] %vm953_vm3, %v916_v51  ;;  %v894_v56 = vpop.permute.xlu0 %893  ;;  %v4370_v51 = vld [vmem:[%s4655_s22 + $0xf4] sm:$0xff] }
 0x185   : > { %979 = vst.msk [vmem:[#allocation2 + $0xc8] sm:$0xff] %vm953_vm3, %v896_v52  ;;  %v5385_v52 = vld [vmem:[%s4655_s22 + $0xec] sm:$0xff] }
 0x186   : > { %978 = vst.msk [vmem:[#allocation2 + $0xc0] sm:$0xff] %vm953_vm3, %v894_v56 }
 0x189   : > { %1134 = vrot.lane.b32.xlu2 %v4341_v57, %s4600_s26  ;;  %1132 = vrot.lane.b32.xlu1 %v4340_v58, %s4600_s26 }
 0x18a   : > { %1130 = vrot.lane.b32.xlu0 %v4339_v59, %s4600_s26  ;;  %v5396_v59 = vld [vmem:[%s4655_s22 + $0x114] sm:$0xff] }
 0x18b   : > { %v1069_v63 = vpop.permute.xlu2 %1068  ;;  %v902_v0 = vpop.permute.xlu1 %901 }
 0x18c   : > { %1175 = vst.msk [vmem:[#allocation2 + $0x10] sm:$0xff] %vm1172_vm4, %v1069_v63  ;;  %v900_v1 = vpop.permute.xlu0 %899  ;;  %v5399_v63 = vld [vmem:[%s4655_s22 + $0x10c] sm:$0xff] }
 0x18d   : > { %982 = vst.msk [vmem:[#allocation2 + $0xe0] sm:$0xff] %vm953_vm3, %v902_v0  ;;  %v5402_v0 = vld [vmem:[%s4655_s22 + $0x104] sm:$0xff] }
 0x18e   : > { %981 = vst.msk [vmem:[#allocation2 + $0xd8] sm:$0xff] %vm953_vm3, %v900_v1 }
 0x191   : > { %1287 = vrot.lane.b32.xlu2 %v5225_v2, %s4601_s27  ;;  %1285 = vrot.lane.b32.xlu1 %v4343_v3, %s4601_s27 }
 0x192   : > { %1283 = vrot.lane.b32.xlu0 %v4342_v6, %s4601_s27 }
 0x193   : > { %v1075_v8 = vpop.permute.xlu2 %1074  ;;  %v908_v9 = vpop.permute.xlu1 %907 }
 0x194   : > { %1178 = vst.msk [vmem:[#allocation2 + $0x28] sm:$0xff] %vm1172_vm4, %v1075_v8  ;;  %v906_v10 = vpop.permute.xlu0 %905  ;;  %v4377_v8 = vld [vmem:[%s4655_s22 + $0x12c] sm:$0xff] }
 0x195   : > { %985 = vst.msk [vmem:[#allocation2 + $0xf8] sm:$0xff] %vm953_vm3, %v908_v9  ;;  %v5415_v9 = vld [vmem:[%s4655_s22 + $0x124] sm:$0xff] }
 0x196   : > { %984 = vst.msk [vmem:[#allocation2 + $0xf0] sm:$0xff] %vm953_vm3, %v906_v10  ;;  %v5418_v10 = vld [vmem:[%s4655_s22 + $0x11c] sm:$0xff] }
 0x199   : > { %1293 = vrot.lane.b32.xlu2 %v5237_v11, %s4601_s27  ;;  %1291 = vrot.lane.b32.xlu1 %v5240_v12, %s4601_s27 }
 0x19a   : > { %1289 = vrot.lane.b32.xlu0 %v5243_v15, %s4601_s27 }
 0x19b   : > { %v1081_v17 = vpop.permute.xlu2 %1080  ;;  %v914_v18 = vpop.permute.xlu1 %913 }
 0x19c   : > { %1181 = vst.msk [vmem:[#allocation2 + $0x40] sm:$0xff] %vm1172_vm4, %v1081_v17  ;;  %v912_v19 = vpop.permute.xlu0 %911 }
 0x19d   : > { %988 = vst.msk [vmem:[#allocation2 + $0x110] sm:$0xff] %vm953_vm3, %v914_v18 }
 0x19e   : > { %987 = vst.msk [vmem:[#allocation2 + $0x108] sm:$0xff] %vm953_vm3, %v912_v19 }
 0x1a1   : > { %1299 = vrot.lane.b32.xlu2 %v5255_v20, %s4601_s27  ;;  %1297 = vrot.lane.b32.xlu1 %v5258_v21, %s4601_s27 }
 0x1a2   : > { %1295 = vrot.lane.b32.xlu0 %v5261_v24, %s4601_s27 }
 0x1a3   : > { %v1087_v26 = vpop.permute.xlu2 %1086  ;;  %v1067_v27 = vpop.permute.xlu1 %1066 }
 0x1a4   : > { %1184 = vst.msk [vmem:[#allocation2 + $0x58] sm:$0xff] %vm1172_vm4, %v1087_v26  ;;  %v1065_v28 = vpop.permute.xlu0 %1064 }
 0x1a5   : > { %1174 = vst.msk [vmem:[#allocation2 + $0x8] sm:$0xff] %vm1172_vm4, %v1067_v27 }
 0x1a6   : > { %1173 = vst.msk [vmem:[#allocation2] sm:$0xff] %vm1172_vm4, %v1065_v28 }
 0x1a9   : > { %1305 = vrot.lane.b32.xlu2 %v5273_v29, %s4601_s27  ;;  %1303 = vrot.lane.b32.xlu1 %v5276_v30, %s4601_s27 }
 0x1aa   : > { %1301 = vrot.lane.b32.xlu0 %v5279_v33, %s4601_s27 }
 0x1ab   : > { %v1093_v54 = vpop.permute.xlu2 %1092  ;;  %v1073_v46 = vpop.permute.xlu1 %1072 }
 0x1ac   : > { %1187 = vst.msk [vmem:[#allocation2 + $0x70] sm:$0xff] %vm1172_vm4, %v1093_v54  ;;  %v1071_v55 = vpop.permute.xlu0 %1070  ;;  %v4414_v54 = vld [vmem:[%s4655_s22 + $0x25] sm:$0xff] }
 0x1ad   : > { %1177 = vst.msk [vmem:[#allocation2 + $0x20] sm:$0xff] %vm1172_vm4, %v1073_v46  ;;  %v4451_v46 = vld [vmem:[%s4655_s22 + $0x2e] sm:$0xff] }
 0x1ae   : > { %1176 = vst.msk [vmem:[#allocation2 + $0x18] sm:$0xff] %vm1172_vm4, %v1071_v55  ;;  %v4415_v55 = vld [vmem:[%s4655_s22 + $0x2d] sm:$0xff] }
 0x1b1   : > { %1311 = vrot.lane.b32.xlu2 %v5291_v61, %s4601_s27  ;;  %1309 = vrot.lane.b32.xlu1 %v5294_v53, %s4601_s27 }
 0x1b2   : > { %1307 = vrot.lane.b32.xlu0 %v5297_v62, %s4601_s27 }
 0x1b3   : > { %v1099_v5 = vpop.permute.xlu2 %1098  ;;  %v1079_v60 = vpop.permute.xlu1 %1078 }
 0x1b4   : > { %1190 = vst.msk [vmem:[#allocation2 + $0x88] sm:$0xff] %vm1172_vm4, %v1099_v5  ;;  %v1077_v7 = vpop.permute.xlu0 %1076  ;;  %v4450_v5 = vld [vmem:[%s4655_s22 + $0x26] sm:$0xff] }
 0x1b5   : > { %1180 = vst.msk [vmem:[#allocation2 + $0x38] sm:$0xff] %vm1172_vm4, %v1079_v60 }
 0x1b6   : > { %1179 = vst.msk [vmem:[#allocation2 + $0x30] sm:$0xff] %vm1172_vm4, %v1077_v7  ;;  %v4416_v7 = vld [vmem:[%s4655_s22 + $0x35] sm:$0xff] }
 0x1b9   : > { %1317 = vrot.lane.b32.xlu2 %v5309_v14, %s4601_s27  ;;  %1315 = vrot.lane.b32.xlu1 %v5312_v4, %s4601_s27 }
 0x1ba   : > { %1313 = vrot.lane.b32.xlu0 %v5315_v16, %s4601_s27 }
 0x1bb   : > { %v1105_v23 = vpop.permute.xlu2 %1104  ;;  %v1085_v13 = vpop.permute.xlu1 %1084 }
 0x1bc   : > { %1193 = vst.msk [vmem:[#allocation2 + $0xa0] sm:$0xff] %vm1172_vm4, %v1105_v23  ;;  %v1083_v25 = vpop.permute.xlu0 %1082 }
 0x1bd   : > { %1183 = vst.msk [vmem:[#allocation2 + $0x50] sm:$0xff] %vm1172_vm4, %v1085_v13 }
 0x1be   : > { %1182 = vst.msk [vmem:[#allocation2 + $0x48] sm:$0xff] %vm1172_vm4, %v1083_v25 }
 0x1c1   : > { %1323 = vrot.lane.b32.xlu2 %v5327_v32, %s4601_s27  ;;  %1321 = vrot.lane.b32.xlu1 %v5330_v22, %s4601_s27 }
 0x1c2   : > { %1319 = vrot.lane.b32.xlu0 %v5333_v34, %s4601_s27 }
 0x1c3   : > { %v1111_v35 = vpop.permute.xlu2 %1110  ;;  %v1091_v31 = vpop.permute.xlu1 %1090 }
 0x1c4   : > { %1196 = vst.msk [vmem:[#allocation2 + $0xb8] sm:$0xff] %vm1172_vm4, %v1111_v35  ;;  %v1089_v36 = vpop.permute.xlu0 %1088  ;;  %v4459_v35 = vld [vmem:[%s4655_s22 + $0x6e] sm:$0xff] }
 0x1c5   : > { %1186 = vst.msk [vmem:[#allocation2 + $0x68] sm:$0xff] %vm1172_vm4, %v1091_v31  ;;  %v4423_v31 = vld [vmem:[%s4655_s22 + $0x6d] sm:$0xff] }
 0x1c6   : > { %1185 = vst.msk [vmem:[#allocation2 + $0x60] sm:$0xff] %vm1172_vm4, %v1089_v36  ;;  %v4452_v36 = vld [vmem:[%s4655_s22 + $0x36] sm:$0xff] }
 0x1c9   : > { %1329 = vrot.lane.b32.xlu2 %v5345_v37, %s4601_s27  ;;  %1327 = vrot.lane.b32.xlu1 %v5348_v38, %s4601_s27 }
 0x1ca   : > { %1325 = vrot.lane.b32.xlu0 %v5351_v39, %s4601_s27 }
 0x1cb   : > { %v1117_v40 = vpop.permute.xlu2 %1116  ;;  %v1097_v41 = vpop.permute.xlu1 %1096 }
 0x1cc   : > { %1199 = vst.msk [vmem:[#allocation2 + $0xd0] sm:$0xff] %vm1172_vm4, %v1117_v40  ;;  %v1095_v42 = vpop.permute.xlu0 %1094 }
 0x1cd   : > { %1189 = vst.msk [vmem:[#allocation2 + $0x80] sm:$0xff] %vm1172_vm4, %v1097_v41  ;;  %v4453_v41 = vld [vmem:[%s4655_s22 + $0x3e] sm:$0xff] }
 0x1ce   : > { %1188 = vst.msk [vmem:[#allocation2 + $0x78] sm:$0xff] %vm1172_vm4, %v1095_v42  ;;  %v4417_v42 = vld [vmem:[%s4655_s22 + $0x3d] sm:$0xff] }
 0x1d1   : > { %1335 = vrot.lane.b32.xlu2 %v5363_v43, %s4601_s27  ;;  %1333 = vrot.lane.b32.xlu1 %v5366_v44, %s4601_s27 }
 0x1d2   : > { %1331 = vrot.lane.b32.xlu0 %v5369_v45, %s4601_s27 }
 0x1d3   : > { %v1123_v47 = vpop.permute.xlu2 %1122  ;;  %v1103_v48 = vpop.permute.xlu1 %1102 }
 0x1d4   : > { %1202 = vst.msk [vmem:[#allocation2 + $0xe8] sm:$0xff] %vm1172_vm4, %v1123_v47  ;;  %v1101_v49 = vpop.permute.xlu0 %1100 }
 0x1d5   : > { %1192 = vst.msk [vmem:[#allocation2 + $0x98] sm:$0xff] %vm1172_vm4, %v1103_v48 }
 0x1d6   : > { %1191 = vst.msk [vmem:[#allocation2 + $0x90] sm:$0xff] %vm1172_vm4, %v1101_v49 }
 0x1d9   : > { %1341 = vrot.lane.b32.xlu2 %v5381_v50, %s4601_s27  ;;  %1339 = vrot.lane.b32.xlu1 %v4370_v51, %s4601_s27  ;;  %v4460_v51 = vld [vmem:[%s4655_s22 + $0x76] sm:$0xff] }
 0x1da   : > { %1337 = vrot.lane.b32.xlu0 %v5385_v52, %s4601_s27 }
 0x1db   : > { %v1129_v56 = vpop.permute.xlu2 %1128  ;;  %v1109_v57 = vpop.permute.xlu1 %1108 }
 0x1dc   : > { %1205 = vst.msk [vmem:[#allocation2 + $0x100] sm:$0xff] %vm1172_vm4, %v1129_v56  ;;  %v1107_v58 = vpop.permute.xlu0 %1106  ;;  %v4424_v56 = vld [vmem:[%s4655_s22 + $0x75] sm:$0xff] }
 0x1dd   : > { %1195 = vst.msk [vmem:[#allocation2 + $0xb0] sm:$0xff] %vm1172_vm4, %v1109_v57 }
 0x1de   : > { %1194 = vst.msk [vmem:[#allocation2 + $0xa8] sm:$0xff] %vm1172_vm4, %v1107_v58 }
 0x1e1   : > { %1347 = vrot.lane.b32.xlu2 %v5396_v59, %s4601_s27  ;;  %1345 = vrot.lane.b32.xlu1 %v5399_v63, %s4601_s27 }
 0x1e2   : > { %1343 = vrot.lane.b32.xlu0 %v5402_v0, %s4601_s27 }
 0x1e3   : > { %v1135_v1 = vpop.permute.xlu2 %1134  ;;  %v1115_v3 = vpop.permute.xlu1 %1114 }
 0x1e4   : > { %1208 = vst.msk [vmem:[#allocation2 + $0x118] sm:$0xff] %vm1172_vm4, %v1135_v1  ;;  %v1113_v6 = vpop.permute.xlu0 %1112  ;;  %v4418_v1 = vld [vmem:[%s4655_s22 + $0x45] sm:$0xff] }
 0x1e5   : > { %1198 = vst.msk [vmem:[#allocation2 + $0xc8] sm:$0xff] %vm1172_vm4, %v1115_v3  ;;  %v4468_v3 = vld [vmem:[%s4655_s22 + $0xb6] sm:$0xff] }
 0x1e6   : > { %1197 = vst.msk [vmem:[#allocation2 + $0xc0] sm:$0xff] %vm1172_vm4, %v1113_v6  ;;  %v4432_v6 = vld [vmem:[%s4655_s22 + $0xb5] sm:$0xff] }
 0x1e9   : > { %1353 = vrot.lane.b32.xlu2 %v4377_v8, %s4601_s27  ;;  %1351 = vrot.lane.b32.xlu1 %v5415_v9, %s4601_s27 }
 0x1ea   : > { %1349 = vrot.lane.b32.xlu0 %v5418_v10, %s4601_s27  ;;  %s257_s27 = scalar_lea.vmem %s7229_s4, %s4196_s21 }
 0x1eb   : > { %v1288_v17 = vpop.permute.xlu2 %1287  ;;  %v1121_v18 = vpop.permute.xlu1 %1120 }
 0x1ec   : > { %1394 = vst.msk [vmem:[#allocation2 + $0x10] sm:$0xff] %vm1391_vm5, %v1288_v17  ;;  %v1119_v19 = vpop.permute.xlu0 %1118 }
 0x1ed   : > { %1201 = vst.msk [vmem:[#allocation2 + $0xe0] sm:$0xff] %vm1172_vm4, %v1121_v18  ;;  %v4425_v18 = vld [vmem:[%s4655_s22 + $0x7d] sm:$0xff] }
 0x1ee   : > { %1200 = vst.msk [vmem:[#allocation2 + $0xd8] sm:$0xff] %vm1172_vm4, %v1119_v19  ;;  %v4454_v19 = vld [vmem:[%s4655_s22 + $0x46] sm:$0xff] }
 0x1f1   : > { %1506 = vrot.lane.b32.xlu2 %v5240_v12, %s4602_s28  ;;  %1504 = vrot.lane.b32.xlu1 %v5243_v15, %s4602_s28 }
 0x1f2   : > { %1502 = vrot.lane.b32.xlu0 %v5225_v2, %s4602_s28 }
 0x1f3   : > { %v1294_v26 = vpop.permute.xlu2 %1293  ;;  %v1127_v27 = vpop.permute.xlu1 %1126 }
 0x1f4   : > { %1397 = vst.msk [vmem:[#allocation2 + $0x28] sm:$0xff] %vm1391_vm5, %v1294_v26  ;;  %v1125_v28 = vpop.permute.xlu0 %1124 }
 0x1f5   : > { %1204 = vst.msk [vmem:[#allocation2 + $0xf8] sm:$0xff] %vm1172_vm4, %v1127_v27 }
 0x1f6   : > { %1203 = vst.msk [vmem:[#allocation2 + $0xf0] sm:$0xff] %vm1172_vm4, %v1125_v28 }
 0x1f9   : > { %1721 = vrot.lane.b32.xlu2 %v4414_v54, %s4603_s29  ;;  %1510 = vrot.lane.b32.xlu1 %v5261_v24, %s4602_s28  ;;  %v4433_v54 = vld [vmem:[%s4655_s22 + $0xbd] sm:$0xff] }
 0x1fa   : > { %1508 = vrot.lane.b32.xlu0 %v5237_v11, %s4602_s28 }
 0x1fb   : > { %v1300_v2 = vpop.permute.xlu2 %1299  ;;  %v1133_v12 = vpop.permute.xlu1 %1132 }
 0x1fc   : > { %1400 = vst.msk [vmem:[#allocation2 + $0x40] sm:$0xff] %vm1391_vm5, %v1300_v2  ;;  %v1131_v15 = vpop.permute.xlu0 %1130  ;;  %v4461_v2 = vld [vmem:[%s4655_s22 + $0x7e] sm:$0xff] }
 0x1fd   : > { %1207 = vst.msk [vmem:[#allocation2 + $0x110] sm:$0xff] %vm1172_vm4, %v1133_v12 }
 0x1fe   : > { %1206 = vst.msk [vmem:[#allocation2 + $0x108] sm:$0xff] %vm1172_vm4, %v1131_v15 }
 0x201   : > { %1942 = vrot.lane.b32.xlu2 %v4451_v46, %s4604_s30  ;;  %1723 = vrot.lane.b32.xlu1 %v4415_v55, %s4603_s29  ;;  %v4419_v46 = vld [vmem:[%s4655_s22 + $0x4d] sm:$0xff]  ;;  %v4469_v55 = vld [vmem:[%s4655_s22 + $0xbe] sm:$0xff] }
 0x202   : > { %1940 = vrot.lane.b32.xlu0 %v4450_v5, %s4604_s30 }
 0x203   : > { %v1306_v11 = vpop.permute.xlu2 %1305  ;;  %v1286_v24 = vpop.permute.xlu1 %1285 }
 0x204   : > { %1403 = vst.msk [vmem:[#allocation2 + $0x58] sm:$0xff] %vm1391_vm5, %v1306_v11  ;;  %v1284_v60 = vpop.permute.xlu0 %1283 }
 0x205   : > { %1393 = vst.msk [vmem:[#allocation2 + $0x8] sm:$0xff] %vm1391_vm5, %v1286_v24  ;;  %v4462_v24 = vld [vmem:[%s4655_s22 + $0x86] sm:$0xff] }
 0x206   : > { %1392 = vst.msk [vmem:[#allocation2] sm:$0xff] %vm1391_vm5, %v1284_v60  ;;  %v4426_v60 = vld [vmem:[%s4655_s22 + $0x85] sm:$0xff] }
 0x209   : > { %1520 = vrot.lane.b32.xlu2 %v5273_v29, %s4602_s28  ;;  %1725 = vrot.lane.b32.xlu1 %v4416_v7, %s4603_s29  ;;  %v4455_v7 = vld [vmem:[%s4655_s22 + $0x4e] sm:$0xff] }
 0x20a   : > { %1512 = vrot.lane.b32.xlu0 %v5258_v21, %s4602_s28 }
 0x20b   : > { %v1312_v23 = vpop.permute.xlu2 %1311  ;;  %v1292_v13 = vpop.permute.xlu1 %1291 }
 0x20c   : > { %1406 = vst.msk [vmem:[#allocation2 + $0x70] sm:$0xff] %vm1391_vm5, %v1312_v23  ;;  %v1290_v25 = vpop.permute.xlu0 %1289 }
 0x20d   : > { %1396 = vst.msk [vmem:[#allocation2 + $0x20] sm:$0xff] %vm1391_vm5, %v1292_v13 }
 0x20e   : > { %1395 = vst.msk [vmem:[#allocation2 + $0x18] sm:$0xff] %vm1391_vm5, %v1290_v25  ;;  %v4434_v25 = vld [vmem:[%s4655_s22 + $0xc5] sm:$0xff] }
 0x211   : > { %1958 = vrot.lane.b32.xlu2 %v4459_v35, %s4604_s30  ;;  %1739 = vrot.lane.b32.xlu1 %v4423_v31, %s4603_s29 }
 0x212   : > { %1944 = vrot.lane.b32.xlu0 %v4452_v36, %s4604_s30 }
 0x213   : > { %v1318_v21 = vpop.permute.xlu2 %1317  ;;  %v1298_v29 = vpop.permute.xlu1 %1297 }
 0x214   : > { %1409 = vst.msk [vmem:[#allocation2 + $0x88] sm:$0xff] %vm1391_vm5, %v1318_v21  ;;  %v1296_v40 = vpop.permute.xlu0 %1295  ;;  %v4420_v21 = vld [vmem:[%s4655_s22 + $0x55] sm:$0xff] }
 0x215   : > { %1399 = vst.msk [vmem:[#allocation2 + $0x38] sm:$0xff] %vm1391_vm5, %v1298_v29  ;;  %v4470_v29 = vld [vmem:[%s4655_s22 + $0xc6] sm:$0xff] }
 0x216   : > { %1398 = vst.msk [vmem:[#allocation2 + $0x30] sm:$0xff] %vm1391_vm5, %v1296_v40  ;;  %v2124_v40 = vld [vmem:[%s7226_s1 + $0x18] sm:$0x7] }
 0x217   : > { %4486 = vmatpush.msk.msra.mxu0 %vm2234_vm7, %v2124_v40  ;;  %4525 = vmatpush.msk.msra.mxu1 %vm2234_vm7, %v2124_v40 }
 0x218   : > { %4526 = vmatpush.msk.msra.mxu2 %vm2234_vm7, %v2124_v40  ;;  %4527 = vmatpush.msk.msra.mxu3 %vm2234_vm7, %v2124_v40  ;;  %v4443_v40 = vld [vmem:[%s4655_s22 + $0x10d] sm:$0xff] }
 0x219   : > { %1946 = vrot.lane.b32.xlu2 %v4453_v41, %s4604_s30  ;;  %1522 = vrot.lane.b32.xlu1 %v5297_v62, %s4602_s28 }
 0x21a   : > { %1727 = vrot.lane.b32.xlu0 %v4417_v42, %s4603_s29 }
 0x21b   : > { %v1324_v47 = vpop.permute.xlu2 %1323  ;;  %v1304_v48 = vpop.permute.xlu1 %1303 }
 0x21c   : > { %1412 = vst.msk [vmem:[#allocation2 + $0xa0] sm:$0xff] %vm1391_vm5, %v1324_v47  ;;  %v1302_v49 = vpop.permute.xlu0 %1301  ;;  %v2121_v47 = vld [vmem:[%s7226_s1] sm:$0xff] }
 0x21d   : > { %1402 = vst.msk [vmem:[#allocation2 + $0x50] sm:$0xff] %vm1391_vm5, %v1304_v48 }
 0x21e   : > { %1401 = vst.msk [vmem:[#allocation2 + $0x48] sm:$0xff] %vm1391_vm5, %v1302_v49  ;;  %v4441_v49 = vld [vmem:[%s4655_s22 + $0xfd] sm:$0xff] }
 0x221   : > { %1538 = vrot.lane.b32.xlu2 %v5327_v32, %s4602_s28  ;;  %1960 = vrot.lane.b32.xlu1 %v4460_v51, %s4604_s30 }
 0x222   : > { %1741 = vrot.lane.b32.xlu0 %v4424_v56, %s4603_s29 }
 0x223   : > { %v1330_v62 = vpop.permute.xlu2 %1329  ;;  %v1310_v57 = vpop.permute.xlu1 %1309 }
 0x224   : > { %1415 = vst.msk [vmem:[#allocation2 + $0xb8] sm:$0xff] %vm1391_vm5, %v1330_v62  ;;  %v1308_v58 = vpop.permute.xlu0 %1307 }
 0x225   : > { %1405 = vst.msk [vmem:[#allocation2 + $0x68] sm:$0xff] %vm1391_vm5, %v1310_v57  ;;  %v4463_v57 = vld [vmem:[%s4655_s22 + $0x8e] sm:$0xff] }
 0x226   : > { %1404 = vst.msk [vmem:[#allocation2 + $0x60] sm:$0xff] %vm1391_vm5, %v1308_v58  ;;  %v4427_v58 = vld [vmem:[%s4655_s22 + $0x8d] sm:$0xff] }
 0x229   : > { %1729 = vrot.lane.b32.xlu2 %v4418_v1, %s4603_s29  ;;  %1976 = vrot.lane.b32.xlu1 %v4468_v3, %s4604_s30  ;;  %v4477_v1 = vld [vmem:[%s4655_s22 + $0xfe] sm:$0xff] }
 0x22a   : > { %1757 = vrot.lane.b32.xlu0 %v4432_v6, %s4603_s29 }
 0x22b   : > { %v1336_v32 = vpop.permute.xlu2 %1335  ;;  %v1316_v8 = vpop.permute.xlu1 %1315 }
 0x22c   : > { %1418 = vst.msk [vmem:[#allocation2 + $0xd0] sm:$0xff] %vm1391_vm5, %v1336_v32  ;;  %v1314_v17 = vpop.permute.xlu0 %1313  ;;  %v4435_v32 = vld [vmem:[%s4655_s22 + $0xcd] sm:$0xff] }
 0x22d   : > { %1408 = vst.msk [vmem:[#allocation2 + $0x80] sm:$0xff] %vm1391_vm5, %v1316_v8 }
 0x22e   : > { %1407 = vst.msk [vmem:[#allocation2 + $0x78] sm:$0xff] %vm1391_vm5, %v1314_v17 }
 0x231   : > { %1743 = vrot.lane.b32.xlu2 %v4425_v18, %s4603_s29  ;;  %1948 = vrot.lane.b32.xlu1 %v4454_v19, %s4604_s30  ;;  %v4421_v19 = vld [vmem:[%s4655_s22 + $0x5d] sm:$0xff] }
 0x232   : > { %1524 = vrot.lane.b32.xlu0 %v5294_v53, %s4602_s28 }
 0x233   : > { %v1342_v26 = vpop.permute.xlu2 %1341  ;;  %v1322_v27 = vpop.permute.xlu1 %1321 }
 0x234   : > { %1421 = vst.msk [vmem:[#allocation2 + $0xe8] sm:$0xff] %vm1391_vm5, %v1342_v26  ;;  %v1320_v28 = vpop.permute.xlu0 %1319  ;;  %v4471_v26 = vld [vmem:[%s4655_s22 + $0xce] sm:$0xff] }
 0x235   : > { %1411 = vst.msk [vmem:[#allocation2 + $0x98] sm:$0xff] %vm1391_vm5, %v1322_v27 }
 0x236   : > { %1410 = vst.msk [vmem:[#allocation2 + $0x90] sm:$0xff] %vm1391_vm5, %v1320_v28 }
 0x239   : > { %1759 = vrot.lane.b32.xlu2 %v4433_v54, %s4603_s29  ;;  %1540 = vrot.lane.b32.xlu1 %v5351_v39, %s4602_s28  ;;  %v4457_v54 = vld [vmem:[%s4655_s22 + $0x5e] sm:$0xff] }
 0x23a   : > { %1962 = vrot.lane.b32.xlu0 %v4461_v2, %s4604_s30  ;;  %v4442_v2 = vld [vmem:[%s4655_s22 + $0x105] sm:$0xff] }
 0x23b   : > { %v1348_v53 = vpop.permute.xlu2 %1347  ;;  %v1328_v12 = vpop.permute.xlu1 %1327 }
 0x23c   : > { %1424 = vst.msk [vmem:[#allocation2 + $0x100] sm:$0xff] %vm1391_vm5, %v1348_v53  ;;  %v1326_v15 = vpop.permute.xlu0 %1325 }
 0x23d   : > { %1414 = vst.msk [vmem:[#allocation2 + $0xb0] sm:$0xff] %vm1391_vm5, %v1328_v12 }
 0x23e   : > { %1413 = vst.msk [vmem:[#allocation2 + $0xa8] sm:$0xff] %vm1391_vm5, %v1326_v15 }
 0x241   : > { %1526 = vrot.lane.b32.xlu2 %v5291_v61, %s4602_s28  ;;  %1731 = vrot.lane.b32.xlu1 %v4419_v46, %s4603_s29  ;;  %v4464_v46 = vld [vmem:[%s4655_s22 + $0x96] sm:$0xff] }
 0x242   : > { %1978 = vrot.lane.b32.xlu0 %v4469_v55, %s4604_s30  ;;  %v4428_v55 = vld [vmem:[%s4655_s22 + $0x95] sm:$0xff] }
 0x243   : > { %v1354_v39 = vpop.permute.xlu2 %1353  ;;  %v1334_v5 = vpop.permute.xlu1 %1333 }
 0x244   : > { %1427 = vst.msk [vmem:[#allocation2 + $0x118] sm:$0xff] %vm1391_vm5, %v1354_v39  ;;  %v1332_v11 = vpop.permute.xlu0 %1331 }
 0x245   : > { %1417 = vst.msk [vmem:[#allocation2 + $0xc8] sm:$0xff] %vm1391_vm5, %v1334_v5 }
 0x246   : > { %1416 = vst.msk [vmem:[#allocation2 + $0xc0] sm:$0xff] %vm1391_vm5, %v1332_v11 }
 0x249   : > { %1964 = vrot.lane.b32.xlu2 %v4462_v24, %s4604_s30  ;;  %1745 = vrot.lane.b32.xlu1 %v4426_v60, %s4603_s29 }
 0x24a   : > { %1950 = vrot.lane.b32.xlu0 %v4455_v7, %s4604_s30  ;;  %v4436_v7 = vld [vmem:[%s4655_s22 + $0xd5] sm:$0xff] }
 0x24b   : > { %v1507_v61 = vpop.permute.xlu2 %1506  ;;  %v1340_v23 = vpop.permute.xlu1 %1339 }
 0x24c   : > { %1613 = vst.msk [vmem:[#allocation2 + $0x10] sm:$0xff] %vm1610_vm6, %v1507_v61  ;;  %v1338_v13 = vpop.permute.xlu0 %1337 }
 0x24d   : > { %1420 = vst.msk [vmem:[#allocation2 + $0xe0] sm:$0xff] %vm1391_vm5, %v1340_v23 }
 0x24e   : > { %1419 = vst.msk [vmem:[#allocation2 + $0xd8] sm:$0xff] %vm1391_vm5, %v1338_v13 }
 0x251   : > { %1514 = vrot.lane.b32.xlu2 %v5255_v20, %s4602_s28  ;;  %1761 = vrot.lane.b32.xlu1 %v4434_v25, %s4603_s29  ;;  %v2123_v20 = vld [vmem:[%s7226_s1 + $0x10] sm:$0xff] }
 0x252   : > { %1542 = vrot.lane.b32.xlu0 %v5348_v38, %s4602_s28  ;;  %v2122_v38 = vld [vmem:[%s7226_s1 + $0x8] sm:$0xff]  ;;  %2251 = vmatpush.msra.mxu0 %v2123_v20 }
 0x253   : > { %v1722_v35 = vpop.permute.xlu2 %1721  ;;  %v1346_v31 = vpop.permute.xlu1 %1345  ;;  %4528 = vmatpush.msra.mxu1 %v2123_v20  ;;  %4529 = vmatpush.msra.mxu2 %v2123_v20 }
 0x254   : > { %1423 = vst.msk [vmem:[#allocation2 + $0xf8] sm:$0xff] %vm1391_vm5, %v1346_v31  ;;  %v1344_v36 = vpop.permute.xlu0 %1343  ;;  %2252 = vmatpush.msra.mxu0 %v2122_v38  ;;  %4530 = vmatpush.msra.mxu3 %v2123_v20  ;;  %v4472_v31 = vld [vmem:[%s4655_s22 + $0xd6] sm:$0xff] }
 0x255   : > { %1422 = vst.msk [vmem:[#allocation2 + $0xf0] sm:$0xff] %vm1391_vm5, %v1344_v36  ;;  %4531 = vmatpush.msra.mxu1 %v2122_v38  ;;  %4532 = vmatpush.msra.mxu2 %v2122_v38 }
 0x256   : > { %2253 = vmatpush.msra.mxu0 %v2121_v47  ;;  %4533 = vmatpush.msra.mxu3 %v2122_v38 }
 0x257   : > { %4534 = vmatpush.msra.mxu1 %v2121_v47  ;;  %4535 = vmatpush.msra.mxu2 %v2121_v47 }
 0x258   : > { %4536 = vmatpush.msra.mxu3 %v2121_v47  ;;  %v4465_v47 = vld [vmem:[%s4655_s22 + $0x9e] sm:$0xff] }
 0x259   : > { %1733 = vrot.lane.b32.xlu2 %v4420_v21, %s4603_s29  ;;  %1980 = vrot.lane.b32.xlu1 %v4470_v29, %s4604_s30  ;;  %v4458_v29 = vld [vmem:[%s4655_s22 + $0x66] sm:$0xff] }
 0x25a   : > { %1556 = vrot.lane.b32.xlu0 %v5381_v50, %s4602_s28  ;;  %v4456_v50 = vld [vmem:[%s4655_s22 + $0x56] sm:$0xff] }
 0x25b   : > { %v1943_v41 = vpop.permute.xlu2 %1942  ;;  %v1352_v42 = vpop.permute.xlu1 %1351 }
 0x25c   : > { %1426 = vst.msk [vmem:[#allocation2 + $0x110] sm:$0xff] %vm1391_vm5, %v1352_v42  ;;  %v1350_v48 = vpop.permute.xlu0 %1349  ;;  %v4429_v42 = vld [vmem:[%s4655_s22 + $0x9d] sm:$0xff] }
 0x25d   : > { %1425 = vst.msk [vmem:[#allocation2 + $0x108] sm:$0xff] %vm1391_vm5, %v1350_v48  ;;  %v4479_v48 = vld [vmem:[%s4655_s22 + $0x10e] sm:$0xff] }
 0x261   : > { %1952 = vrot.lane.b32.xlu2 %v4456_v50, %s4604_s30  ;;  %1528 = vrot.lane.b32.xlu1 %v5315_v16, %s4602_s28 }
 0x262   : > { %1775 = vrot.lane.b32.xlu0 %v4441_v49, %s4603_s29 }
 0x263   : > { %v1521_v51 = vpop.permute.xlu2 %1520  ;;  %v1505_v56 = vpop.permute.xlu1 %1504 }
 0x264   : > { %1620 = vst.msk [vmem:[#allocation2 + $0x48] sm:$0xff] %vm1610_vm6, %v1521_v51  ;;  %v1503_v62 = vpop.permute.xlu0 %1502 }
 0x265   : > { %1612 = vst.msk [vmem:[#allocation2 + $0x8] sm:$0xff] %vm1610_vm6, %v1505_v56  ;;  %v4437_v56 = vld [vmem:[%s4655_s22 + $0xdd] sm:$0xff] }
 0x266   : > { %1611 = vst.msk [vmem:[#allocation2] sm:$0xff] %vm1610_vm6, %v1503_v62 }
 0x267   : > { %1830 = vst.msk [vmem:[#allocation2] sm:$0xff] %vm1829_vm8, %v1722_v35  ;;  %v4422_v35 = vld [vmem:[%s4655_s22 + $0x65] sm:$0xff] }
 0x269   : > { %1966 = vrot.lane.b32.xlu2 %v4463_v57, %s4604_s30  ;;  %1747 = vrot.lane.b32.xlu1 %v4427_v58, %s4603_s29 }
 0x26a   : > { %1994 = vrot.lane.b32.xlu0 %v4477_v1, %s4604_s30 }
 0x26b   : > { %v1959_v16 = vpop.permute.xlu2 %1958  ;;  %v1511_v3 = vpop.permute.xlu1 %1510 }
 0x26c   : > { %1615 = vst.msk [vmem:[#allocation2 + $0x20] sm:$0xff] %vm1610_vm6, %v1511_v3  ;;  %v1509_v6 = vpop.permute.xlu0 %1508 }
 0x26d   : > { %1614 = vst.msk [vmem:[#allocation2 + $0x18] sm:$0xff] %vm1610_vm6, %v1509_v6 }
 0x271   : > { %1516 = vrot.lane.b32.xlu2 %v5279_v33, %s4602_s28  ;;  %1763 = vrot.lane.b32.xlu1 %v4435_v32, %s4603_s29 }
 0x272   : > { %1544 = vrot.lane.b32.xlu0 %v5345_v37, %s4602_s28 }
 0x273   : > { %v1947_v8 = vpop.permute.xlu2 %1946  ;;  %v1724_v17 = vpop.permute.xlu1 %1723 }
 0x274   : > { %1831 = vst.msk [vmem:[#allocation2 + $0x8] sm:$0xff] %vm1829_vm8, %v1724_v17  ;;  %v1941_v18 = vpop.permute.xlu0 %1940  ;;  %v4466_v17 = vld [vmem:[%s4655_s22 + $0xa6] sm:$0xff] }
 0x275   : > { %2050 = vst.msk [vmem:[#allocation2 + $0x8] sm:$0xff] %vm2048_vm9, %v1943_v41 }
 0x276   : > { %2049 = vst.msk [vmem:[#allocation2] sm:$0xff] %vm2048_vm9, %v1941_v18  ;;  %v4480_v18 = vld [vmem:[%s4655_s22 + $0x116] sm:$0xff] }
 0x279   : > { %1735 = vrot.lane.b32.xlu2 %v4421_v19, %s4603_s29  ;;  %1982 = vrot.lane.b32.xlu1 %v4471_v26, %s4604_s30 }
 0x27a   : > { %1558 = vrot.lane.b32.xlu0 %v5402_v0, %s4602_s28 }
 0x27b   : > { %v1539_v33 = vpop.permute.xlu2 %1538  ;;  %v1726_v37 = vpop.permute.xlu1 %1725 }
 0x27c   : > { %1629 = vst.msk [vmem:[#allocation2 + $0x90] sm:$0xff] %vm1610_vm6, %v1539_v33  ;;  %v1513_v27 = vpop.permute.xlu0 %1512  ;;  %v2086_v15 = vld [vmem:[#allocation2 + $0x8] sm:$0xff] }
 0x27d   : > { %1832 = vst.msk [vmem:[#allocation2 + $0x10] sm:$0xff] %vm1829_vm8, %v1726_v37  ;;  %v2085_v28 = vld [vmem:[#allocation2] sm:$0xff] }
 0x27e   : > { %1616 = vst.msk [vmem:[#allocation2 + $0x28] sm:$0xff] %vm1610_vm6, %v1513_v27  ;;  %4487 = vmatmul.msk.f32.vlgmr.msra.gmra.mxu0 %vm2125_vm10, %v2085_v28 }
 0x281   : > { %1954 = vrot.lane.b32.xlu2 %v4457_v54, %s4604_s30  ;;  %1530 = vrot.lane.b32.xlu1 %v5312_v4, %s4602_s28  ;;  %v4478_v4 = vld [vmem:[%s4655_s22 + $0x106] sm:$0xff] }
 0x282   : > { %1777 = vrot.lane.b32.xlu0 %v4442_v2, %s4603_s29 }
 0x283   : > { %v1730_v0 = vpop.permute.xlu2 %1729  ;;  %v1740_v53 = vpop.permute.xlu1 %1739 }
 0x284   : > { %1834 = vst.msk [vmem:[#allocation2 + $0x20] sm:$0xff] %vm1829_vm8, %v1730_v0  ;;  %v1945_v12 = vpop.permute.xlu0 %1944 }
 0x285   : > { %1839 = vst.msk [vmem:[#allocation2 + $0x48] sm:$0xff] %vm1829_vm8, %v1740_v53  ;;  %v4438_v53 = vld [vmem:[%s4655_s22 + $0xe5] sm:$0xff] }
 0x286   : > { %2058 = vst.msk [vmem:[#allocation2 + $0x48] sm:$0xff] %vm2048_vm9, %v1959_v16  ;;  %4488 = vmatmul.msk.f32.gmra.mxu0 %vm2125_vm10, %v2086_v15  ;;  %v4444_v16 = vld [vmem:[%s4655_s22 + $0x115] sm:$0xff] }
 0x287   : > { %2051 = vst.msk [vmem:[#allocation2 + $0x10] sm:$0xff] %vm2048_vm9, %v1945_v12 }
 0x289   : > { %1968 = vrot.lane.b32.xlu2 %v4464_v46, %s4604_s30  ;;  %1749 = vrot.lane.b32.xlu1 %v4428_v55, %s4603_s29 }
 0x28a   : > { %1996 = vrot.lane.b32.xlu0 %v4478_v4, %s4604_s30 }
 0x28b   : > { %v1744_v39 = vpop.permute.xlu2 %1743  ;;  %v1523_v5 = vpop.permute.xlu1 %1522 }
 0x28c   : > { %1621 = vst.msk [vmem:[#allocation2 + $0x50] sm:$0xff] %vm1610_vm6, %v1523_v5  ;;  %v1728_v11 = vpop.permute.xlu0 %1727 }
 0x28d   : > { %1833 = vst.msk [vmem:[#allocation2 + $0x18] sm:$0xff] %vm1829_vm8, %v1728_v11  ;;  %v2094_v24 = vld [vmem:[#allocation2 + $0x48] sm:$0xff] }
 0x28e   : > { %2052 = vst.msk [vmem:[#allocation2 + $0x18] sm:$0xff] %vm2048_vm9, %v1947_v8  ;;  %v2087_v60 = vld [vmem:[#allocation2 + $0x10] sm:$0xff]  ;;  %4496 = vmatmul.msk.f32.vlgmr.msra.gmra.mxu1 %vm2125_vm10, %v2094_v24  ;;  %v4430_v8 = vld [vmem:[%s4655_s22 + $0xa5] sm:$0xff] }
 0x28f   : > { %4489 = vmatmul.msk.f32.gmra.mxu0 %vm2125_vm10, %v2087_v60 }
 0x291   : > { %1518 = vrot.lane.b32.xlu2 %v5276_v30, %s4602_s28  ;;  %1765 = vrot.lane.b32.xlu1 %v4436_v7, %s4603_s29 }
 0x292   : > { %1546 = vrot.lane.b32.xlu0 %v5369_v45, %s4602_s28 }
 0x293   : > { %v1760_v61 = vpop.permute.xlu2 %1759  ;;  %v1961_v23 = vpop.permute.xlu1 %1960 }
 0x294   : > { %v1742_v13 = vpop.permute.xlu0 %1741 }
 0x295   : > { %1840 = vst.msk [vmem:[#allocation2 + $0x50] sm:$0xff] %vm1829_vm8, %v1742_v13  ;;  %v2088_v25 = vld [vmem:[#allocation2 + $0x18] sm:$0xff] }
 0x296   : > { %2059 = vst.msk [vmem:[#allocation2 + $0x50] sm:$0xff] %vm2048_vm9, %v1961_v23 }
 0x297   : > { %4490 = vmatmul.msk.f32.gmra.mxu0 %vm2125_vm10, %v2088_v25  ;;  %v4445_v25 = vld [vmem:[%s4655_s22 + $0x11d] sm:$0xff] }
 0x299   : > { %1737 = vrot.lane.b32.xlu2 %v4422_v35, %s4603_s29  ;;  %1984 = vrot.lane.b32.xlu1 %v4472_v31, %s4604_s30 }
 0x29a   : > { %1560 = vrot.lane.b32.xlu0 %v5399_v63, %s4602_s28 }
 0x29b   : > { %v1527_v30 = vpop.permute.xlu2 %1526  ;;  %v1977_v45 = vpop.permute.xlu1 %1976 }
 0x29c   : > { %1623 = vst.msk [vmem:[#allocation2 + $0x60] sm:$0xff] %vm1610_vm6, %v1527_v30  ;;  %v1758_v36 = vpop.permute.xlu0 %1757 }
 0x29d   : > { %1848 = vst.msk [vmem:[#allocation2 + $0x90] sm:$0xff] %vm1829_vm8, %v1758_v36  ;;  %v2095_v21 = vld [vmem:[#allocation2 + $0x50] sm:$0xff]  ;;  %v4474_v36 = vld [vmem:[%s4655_s22 + $0xe6] sm:$0xff] }
 0x29e   : > { %2067 = vst.msk [vmem:[#allocation2 + $0x90] sm:$0xff] %vm2048_vm9, %v1977_v45  ;;  %4497 = vmatmul.msk.f32.gmra.mxu1 %vm2125_vm10, %v2095_v21 }
 0x2a1   : > { %1956 = vrot.lane.b32.xlu2 %v4458_v29, %s4604_s30  ;;  %1532 = vrot.lane.b32.xlu1 %v5309_v14, %s4602_s28 }
 0x2a2   : > { %1779 = vrot.lane.b32.xlu0 %v4443_v40, %s4603_s29 }
 0x2a3   : > { %v1965_v63 = vpop.permute.xlu2 %1964  ;;  %v1949_v20 = vpop.permute.xlu1 %1948 }
 0x2a4   : > { %2053 = vst.msk [vmem:[#allocation2 + $0x20] sm:$0xff] %vm2048_vm9, %v1949_v20  ;;  %v1525_v38 = vpop.permute.xlu0 %1524 }
 0x2a5   : > { %1622 = vst.msk [vmem:[#allocation2 + $0x58] sm:$0xff] %vm1610_vm6, %v1525_v38  ;;  %v2103_v41 = vld [vmem:[#allocation2 + $0x90] sm:$0xff] }
 0x2a6   : > { %1841 = vst.msk [vmem:[#allocation2 + $0x58] sm:$0xff] %vm1829_vm8, %v1744_v39  ;;  %4505 = vmatmul.msk.f32.vlgmr.msra.gmra.mxu2 %vm2125_vm10, %v2103_v41  ;;  %v4605_v39 = vmov 0  }
 0x2a9   : > { %1751 = vrot.lane.b32.xlu1 %v4429_v42, %s4603_s29  ;;  %1970 = vrot.lane.b32.xlu2 %v4465_v47, %s4604_s30 }
 0x2aa   : > { %1998 = vrot.lane.b32.xlu0 %v4479_v48, %s4604_s30 }
 0x2ab   : > { %v1515_v14 = vpop.permute.xlu2 %1514  ;;  %v1541_v50 = vpop.permute.xlu1 %1540  ;;  %v2089_v49 = vld [vmem:[#allocation2 + $0x20] sm:$0xff] }
 0x2ac   : > { %1617 = vst.msk [vmem:[#allocation2 + $0x30] sm:$0xff] %vm1610_vm6, %v1515_v14  ;;  %v1963_v51 = vpop.permute.xlu0 %1962  ;;  %4491 = vmatmul.msk.f32.gmra.mxu0 %vm2125_vm10, %v2089_v49 }
 0x2ad   : > { %1630 = vst.msk [vmem:[#allocation2 + $0x98] sm:$0xff] %vm1610_vm6, %v1541_v50 }
 0x2ae   : > { %1849 = vst.msk [vmem:[#allocation2 + $0x98] sm:$0xff] %vm1829_vm8, %v1760_v61 }
 0x2af   : > { %2060 = vst.msk [vmem:[#allocation2 + $0x58] sm:$0xff] %vm2048_vm9, %v1963_v51 }
 0x2b1   : > { %1767 = vrot.lane.b32.xlu1 %v4437_v56, %s4603_s29  ;;  %1562 = vrot.lane.b32.xlu2 %v5396_v59, %s4602_s28  ;;  %v4473_v59 = vld [vmem:[%s4655_s22 + $0xde] sm:$0xff] }
 0x2b2   : > { %1548 = vrot.lane.b32.xlu0 %v5366_v44, %s4602_s28 }
 0x2b3   : > { %v1734_v62 = vpop.permute.xlu2 %1733  ;;  %v1732_v57 = vpop.permute.xlu1 %1731 }
 0x2b4   : > { %1836 = vst.msk [vmem:[#allocation2 + $0x30] sm:$0xff] %vm1829_vm8, %v1734_v62  ;;  %v1979_v58 = vpop.permute.xlu0 %1978 }
 0x2b5   : > { %1835 = vst.msk [vmem:[#allocation2 + $0x28] sm:$0xff] %vm1829_vm8, %v1732_v57  ;;  %v4431_v57 = vld [vmem:[%s4655_s22 + $0xad] sm:$0xff] }
 0x2b6   : > { %2068 = vst.msk [vmem:[#allocation2 + $0x98] sm:$0xff] %vm2048_vm9, %v1979_v58  ;;  %v2096_v1 = vld [vmem:[#allocation2 + $0x58] sm:$0xff]  ;;  %v4467_v58 = vld [vmem:[%s4655_s22 + $0xae] sm:$0xff] }
 0x2b7   : > { %4498 = vmatmul.msk.f32.gmra.mxu1 %vm2125_vm10, %v2096_v1 }
 0x2b9   : > { %1781 = vrot.lane.b32.xlu1 %v4444_v16, %s4603_s29  ;;  %1534 = vrot.lane.b32.xlu2 %v5333_v34, %s4602_s28  ;;  %v2363_v34 = vlaneseq }
 0x2ba   : > { %1986 = vrot.lane.b32.xlu0 %v4473_v59, %s4604_s30 }
 0x2bb   : > { %v1953_v44 = vpop.permute.xlu2 %1952  ;;  %v1746_v3 = vpop.permute.xlu1 %1745  ;;  %v5689_v19 = vshrl.u32 %v2363_v34, 7 }
 0x2bc   : > { %2055 = vst.msk [vmem:[#allocation2 + $0x30] sm:$0xff] %vm2048_vm9, %v1953_v44  ;;  %v1951_v6 = vpop.permute.xlu0 %1950 }
 0x2bd   : > { %1842 = vst.msk [vmem:[#allocation2 + $0x60] sm:$0xff] %vm1829_vm8, %v1746_v3  ;;  %v2104_v32 = vld [vmem:[#allocation2 + $0x98] sm:$0xff]  ;;  %v2403_v37 = vand.u32 65535, %v5689_v19  ;;  %v2404_v54 = vshrl.u32 %v5689_v19, 16  ;;  %v5708_v24 = vadd.s32 8, %v5689_v19  ;;  %v5725_v50 = vadd.s32 16, %v5689_v19 }
 0x2be   : > { %2061 = vst.msk [vmem:[#allocation2 + $0x60] sm:$0xff] %vm2048_vm9, %v1965_v63  ;;  %4506 = vmatmul.msk.f32.gmra.mxu2 %vm2125_vm10, %v2104_v32  ;;  %v5729_v56 = vadd.s32 72, %v5689_v19  ;;  %v4481_v3 = vld [vmem:[%s4655_s22 + $0x11e] sm:$0xff] }
 0x2bf   : > { %2054 = vst.msk [vmem:[#allocation2 + $0x28] sm:$0xff] %vm2048_vm9, %v1951_v6  ;;  %v2407_v2 = vmul.u32 58254, %v2403_v37  ;;  %v2406_v12 = vmul.u32 14564, %v2403_v37  ;;  %v2408_v15 = vmul.u32 14564, %v2404_v54  ;;  %v2409_v55 = vmul.u32 58254, %v2404_v54 }
 0x2c0   : > { %v2432_v13 = vand.u32 65535, %v5708_v24  ;;  %v2433_v30 = vshrl.u32 %v5708_v24, 16  ;;  %v2461_v62 = vand.u32 65535, %v5725_v50  ;;  %v2462_v44 = vshrl.u32 %v5725_v50, 16 }
 0x2c1   : > { %1753 = vrot.lane.b32.xlu1 %v4430_v8, %s4603_s29  ;;  %1972 = vrot.lane.b32.xlu2 %v4466_v17, %s4604_s30  ;;  %v2410_v46 = vshll.u32 %v2407_v2, 16  ;;  %v2412_v4 = vshll.u32 %v2408_v15, 16  ;;  %v2411_v35 = vshrl.u32 %v2407_v2, 16  ;;  %v2413_v63 = vshrl.u32 %v2408_v15, 16 }
 0x2c2   : > { %2000 = vrot.lane.b32.xlu0 %v4480_v18, %s4604_s30  ;;  %v2436_v45 = vmul.u32 58254, %v2432_v13  ;;  %v2435_v21 = vmul.u32 14564, %v2432_v13  ;;  %v2437_v29 = vmul.u32 14564, %v2433_v30  ;;  %v2438_v38 = vmul.u32 58254, %v2433_v30 }
 0x2c3   : > { %v5692_v26 = vpop.permute.xlu2 %1966  ;;  %v1762_v33 = vpop.permute.xlu1 %1761  ;;  %vm2414_vm11 = vc.u32 %v2406_v12, %v2410_v46  ;;  %v2416_v11 = vadd.s32 %v2410_v46, %v2406_v12  ;;  %v2091_v23 = vld [vmem:[#allocation2 + $0x30] sm:$0xff]  ;;  %v2465_v32 = vmul.u32 58254, %v2461_v62  ;;  %v2664_v8 = vand.u32 65535, %v5729_v56 }
 0x2c4   : > { %v1543_v27 = vpop.permute.xlu0 %1542  ;;  %v2415_v5 = vsel %vm2414_vm11, 1, %v4605_v39  ;;  %v2439_v40 = vshll.u32 %v2436_v45, 16  ;;  %v2441_v41 = vshll.u32 %v2437_v29, 16  ;;  %v2440_v16 = vshrl.u32 %v2436_v45, 16 }
 0x2c5   : > { %1631 = vst.msk [vmem:[#allocation2 + $0xa0] sm:$0xff] %vm1610_vm6, %v1543_v27  ;;  %v2097_v28 = vld [vmem:[#allocation2 + $0x60] sm:$0xff]  ;;  %v2417_v61 = vadd.s32 %v2415_v5, %v2409_v55  ;;  %vm2418_vm12 = vc.u32 %v2416_v11, %v2412_v4  ;;  %v2442_v17 = vshrl.u32 %v2437_v29, 16  ;;  %v2464_v18 = vmul.u32 14564, %v2461_v62 }
 0x2c6   : > { %1850 = vst.msk [vmem:[#allocation2 + $0xa0] sm:$0xff] %vm1829_vm8, %v1762_v33  ;;  %v2090_v0 = vld [vmem:[#allocation2 + $0x28] sm:$0xff]  ;;  %4499 = vmatmul.msk.f32.gmra.mxu1 %vm2125_vm10, %v2097_v28  ;;  %vm2443_vm13 = vc.u32 %v2435_v21, %v2439_v40  ;;  %v2445_v14 = vadd.s32 %v2439_v40, %v2435_v21  ;;  %v2466_v34 = vmul.u32 14564, %v2462_v44  ;;  %v2468_v37 = vshll.u32 %v2465_v32, 16 }
 0x2c7   : > { %4492 = vmatmul.msk.f32.gmra.mxu0 %vm2125_vm10, %v2090_v0  ;;  %v2444_v48 = vsel %vm2443_vm13, 1, %v4605_v39  ;;  %v2467_v28 = vmul.u32 58254, %v2462_v44  ;;  %v2665_v54 = vshrl.u32 %v5729_v56, 16  ;;  %v5745_v2 = vmul.u32 58254, %v2664_v8 }
 0x2c8   : > { %v2446_v51 = vadd.s32 %v2444_v48, %v2438_v38  ;;  %vm2447_vm14 = vc.u32 %v2445_v14, %v2441_v41  ;;  %v2470_v15 = vshll.u32 %v2466_v34, 16  ;;  %vm2472_vm15 = vc.u32 %v2464_v18, %v2468_v37 }
 0x2c9   : > { %1769 = vrot.lane.b32.xlu1 %v4438_v53, %s4603_s29  ;;  %1564 = vrot.lane.b32.xlu2 %v5418_v10, %s4602_s28  ;;  %v2448_v59 = vsel %vm2447_vm14, 1, %v4605_v39  ;;  %v2474_v46 = vadd.s32 %v2468_v37, %v2464_v18  ;;  %v2473_v4 = vsel %vm2472_vm15, 1, %v4605_v39  ;;  %v2667_v11 = vmul.u32 14564, %v2664_v8 }
 0x2ca   : > { %1550 = vrot.lane.b32.xlu0 %v5363_v43, %s4602_s28  ;;  %v2419_v43 = vsel %vm2418_vm12, 1, %v4605_v39  ;;  %v2450_v6 = vadd.s32 %v2448_v59, %v2446_v51  ;;  %v2475_v5 = vadd.s32 %v2473_v4, %v2467_v28  ;;  %v5785_v8 = vadd.s32 80, %v5689_v19 }
 0x2cb   : > { %v1517_v60 = vpop.permute.xlu2 %1516  ;;  %v1981_v7 = vpop.permute.xlu1 %1980  ;;  %v2421_v31 = vadd.s32 %v2419_v43, %v2417_v61  ;;  %vm2476_vm0 = vc.u32 %v2474_v46, %v2470_v15  ;;  %v2469_v61 = vshrl.u32 %v2465_v32, 16 }
 0x2cc   : > { %1618 = vst.msk [vmem:[#allocation2 + $0x38] sm:$0xff] %vm1610_vm6, %v1517_v60  ;;  %v1557_v10 = vpop.permute.xlu0 %1556  ;;  %v2451_v33 = vadd.s32 %v2450_v6, %v2440_v16  ;;  %v4439_v60 = vld [vmem:[%s4655_s22 + $0xed] sm:$0xff]  ;;  %v2693_v28 = vand.u32 65535, %v5785_v8 }
 0x2cd   : > { %2069 = vst.msk [vmem:[#allocation2 + $0xa0] sm:$0xff] %vm2048_vm9, %v1981_v7  ;;  %v2422_v20 = vadd.s32 %v2421_v31, %v2411_v35  ;;  %v5757_v35 = vadd.s32 24, %v5689_v19  ;;  %v2670_v31 = vmul.u32 58254, %v2665_v54  ;;  %v4475_v6 = vld [vmem:[%s4655_s22 + $0xee] sm:$0xff] }
 0x2ce   : > { %1638 = vst.msk [vmem:[#allocation2 + $0xd8] sm:$0xff] %vm1610_vm6, %v1557_v10  ;;  %v2452_v12 = vadd.s32 %v2451_v33, %v2442_v17  ;;  %v2477_v10 = vsel %vm2476_vm0, 1, %v4605_v39 }
 0x2cf   : > { %4493 = vmatmul.msk.f32.gmra.mxu0 %vm2125_vm10, %v2091_v23  ;;  %v2423_v1 = vadd.s32 %v2422_v20, %v2413_v63  ;;  %v2669_v23 = vmul.u32 14564, %v2665_v54  ;;  %v2479_v43 = vadd.s32 %v2477_v10, %v2475_v5  ;;  %v2491_v40 = vshrl.u32 %v5757_v35, 16  ;;  %v4440_v10 = vld [vmem:[%s4655_s22 + $0xf5] sm:$0xff] }
 0x2d0   : > { %v2453_v13 = vshrl.u32 %v2452_v12, 4 }
 0x2d1   : > { %1783 = vrot.lane.b32.xlu1 %v4445_v25, %s4603_s29  ;;  %1536 = vrot.lane.b32.xlu2 %v5330_v22, %s4602_s28  ;;  %v2424_v27 = vshrl.u32 %v2423_v1, 4  ;;  %v2671_v25 = vshll.u32 %v5745_v2, 16  ;;  %v2673_v30 = vshll.u32 %v2669_v23, 16  ;;  %v2480_v45 = vadd.s32 %v2479_v43, %v2469_v61  ;;  %v4482_v1 = vld [vmem:[%s4655_s22 + $0x126] sm:$0xff] }
 0x2d2   : > { %1988 = vrot.lane.b32.xlu0 %v4474_v36, %s4604_s30  ;;  %v2490_v36 = vand.u32 65535, %v5757_v35  ;;  %v2454_v41 = vmul.u32 18, %v2453_v13  ;;  %v2674_v16 = vshrl.u32 %v2669_v23, 16  ;;  %v2496_v44 = vmul.u32 58254, %v2491_v40  ;;  %v4411_v13 = vld [vmem:[%s4655_s22 + $0x12c] sm:$0xff] }
 0x2d3   : > { %v1736_v42 = vpop.permute.xlu2 %1735  ;;  %v1529_v47 = vpop.permute.xlu1 %1528  ;;  %v2425_v7 = vmul.u32 18, %v2424_v27  ;;  %vm2675_vm1 = vc.u32 %v2667_v11, %v2671_v25  ;;  %v2677_v29 = vadd.s32 %v2671_v25, %v2667_v11 }
 0x2d4   : > { %1837 = vst.msk [vmem:[#allocation2 + $0x38] sm:$0xff] %vm1829_vm8, %v1736_v42  ;;  %v1776_v22 = vpop.permute.xlu0 %1775  ;;  %v2105_v49 = vld [vmem:[#allocation2 + $0xa0] sm:$0xff]  ;;  %v2676_v21 = vsel %vm2675_vm1, 1, %v4605_v39  ;;  %v2672_v42 = vshrl.u32 %v5745_v2, 16  ;;  %v2493_v48 = vmul.u32 14564, %v2490_v36  ;;  %v2494_v14 = vmul.u32 58254, %v2490_v36 }
 0x2d5   : > { %1624 = vst.msk [vmem:[#allocation2 + $0x68] sm:$0xff] %vm1610_vm6, %v1529_v47  ;;  %4507 = vmatmul.msk.f32.gmra.mxu2 %vm2125_vm10, %v2105_v49  ;;  %vm2679_vm2 = vc.u32 %v2677_v29, %v2673_v30  ;;  %v4446_v49 = vld [vmem:[%s4655_s22 + $0x125] sm:$0xff]  ;;  %v5788_v17 = vsub.s32 %v5708_v24, %v2454_v41  ;;  %v2694_v24 = vshrl.u32 %v5785_v8, 16  ;;  %vm3768_vm1 = vcmask 64512   ;;  %v4412_v41 = vld [vmem:[%s4655_s22 + $0x134] sm:$0xff] }
 0x2d6   : > { %1857 = vst.msk [vmem:[#allocation2 + $0xd8] sm:$0xff] %vm1829_vm8, %v1776_v22  ;;  %v2680_v62 = vsel %vm2679_vm2, 1, %v4605_v39  ;;  %v2498_v37 = vshrl.u32 %v2494_v14, 16 }
 0x2d7   : > { %vm3445_vm12 = vcmp.ne.s32.totalorder %v5788_v17, 0  ;;  %v5809_v61 = vmul.u32 14564, %v2694_v24  ;;  %vm3481_vm13 = vcmp.lt.s32.totalorder %v5788_v17, 0  ;;  %v5819_v30 = vadd.s32 18, %v5788_v17 }
 0x2d8   : > { %vm5825_vm15 = vmand %vm3481_vm13, %vm3445_vm12 }
 0x2d9   : > { %1755 = vrot.lane.b32.xlu1 %v4431_v57, %s4603_s29  ;;  %1974 = vrot.lane.b32.xlu2 %v4467_v58, %s4604_s30  ;;  %v2495_v57 = vmul.u32 14564, %v2491_v40 }
 0x2da   : > { %2002 = vrot.lane.b32.xlu0 %v4481_v3, %s4604_s30  ;;  %v2497_v3 = vshll.u32 %v2494_v14, 16 }
 0x2db   : > { %v1955_v0 = vpop.permute.xlu2 %1954  ;;  %v1748_v53 = vpop.permute.xlu1 %1747  ;;  %v2499_v32 = vshll.u32 %v2495_v57, 16  ;;  %v2500_v15 = vshrl.u32 %v2495_v57, 16 }
 0x2dc   : > { %2056 = vst.msk [vmem:[#allocation2 + $0x38] sm:$0xff] %vm2048_vm9, %v1955_v0  ;;  %v1995_v55 = vpop.permute.xlu0 %1994  ;;  %vm2501_vm5 = vc.u32 %v2493_v48, %v2497_v3 }
 0x2dd   : > { %1843 = vst.msk [vmem:[#allocation2 + $0x68] sm:$0xff] %vm1829_vm8, %v1748_v53  ;;  %v2502_v27 = vsel %vm2501_vm5, 1, %v4605_v39 }
 0x2de   : > { %2062 = vst.msk [vmem:[#allocation2 + $0x68] sm:$0xff] %vm2048_vm9, %v5692_v26  ;;  %v2471_v26 = vshrl.u32 %v2466_v34, 16  ;;  %v2503_v34 = vadd.s32 %v2497_v3, %v2493_v48  ;;  %v2504_v2 = vadd.s32 %v2502_v27, %v2496_v44 }
 0x2df   : > { %2076 = vst.msk [vmem:[#allocation2 + $0xd8] sm:$0xff] %vm2048_vm9, %v1995_v55 }
 0x2e0   : > { %v2481_v51 = vadd.s32 %v2480_v45, %v2471_v26  ;;  %vm2505_vm7 = vc.u32 %v2503_v34, %v2499_v32  ;;  %v2699_v26 = vmul.u32 58254, %v2694_v24  ;;  %v2702_v45 = vshll.u32 %v5809_v61, 16 }
 0x2e1   : > { %1771 = vrot.lane.b32.xlu1 %v4439_v60, %s4603_s29  ;;  %1566 = vrot.lane.b32.xlu2 %v5415_v9, %s4602_s28  ;;  %v5770_v9 = vsub.s32 %v5689_v19, %v2425_v7  ;;  %v2506_v46 = vsel %vm2505_vm7, 1, %v4605_v39  ;;  %v2696_v60 = vmul.u32 14564, %v2693_v28  ;;  %v2697_v7 = vmul.u32 58254, %v2693_v28 }
 0x2e2   : > { %1552 = vrot.lane.b32.xlu0 %v5385_v52, %s4602_s28  ;;  %v2678_v52 = vadd.s32 %v2676_v21, %v2670_v31  ;;  %v2482_v33 = vshrl.u32 %v2481_v51, 4  ;;  %v2508_v11 = vadd.s32 %v2506_v46, %v2504_v2 }
 0x2e3   : > { %v5767_v63 = vpop.permute.xlu2 %1968  ;;  %v1764_v20 = vpop.permute.xlu1 %1763  ;;  %v2092_v38 = vld [vmem:[#allocation2 + $0x38] sm:$0xff]  ;;  %vm3444_vm3 = vcmp.ne.s32.totalorder %v5770_v9, 0  ;;  %vm3480_vm4 = vcmp.lt.s32.totalorder %v5770_v9, 0  ;;  %v3552_v12 = vadd.s32 18, %v5770_v9  ;;  %v2700_v25 = vshll.u32 %v2697_v7, 16 }
 0x2e4   : > { %v1545_v47 = vpop.permute.xlu0 %1544  ;;  %4494 = vmatmul.msk.f32.gmra.mxu0 %vm2125_vm10, %v2092_v38  ;;  %v2682_v59 = vadd.s32 %v2680_v62, %v2678_v52  ;;  %vm5803_vm11 = vmand %vm3480_vm4, %vm3444_vm3  ;;  %v2483_v23 = vmul.u32 18, %v2482_v33  ;;  %v2509_v43 = vadd.s32 %v2508_v11, %v2498_v37  ;;  %v5832_v38 = vadd.s32 144, %v5689_v19 }
 0x2e5   : > { %1632 = vst.msk [vmem:[#allocation2 + $0xa8] sm:$0xff] %vm1610_vm6, %v1545_v47  ;;  %v2098_v22 = vld [vmem:[#allocation2 + $0x68] sm:$0xff]  ;;  %v3588_v31 = vsel %vm5803_vm11, %v3552_v12, %v5770_v9  ;;  %vm2704_vm14 = vc.u32 %v2696_v60, %v2700_v25  ;;  %v2706_v29 = vadd.s32 %v2700_v25, %v2696_v60  ;;  %v4572_v9 = vld [vmem:[%s4655_s22 + $0xf4] sm:$0xff]  ;;  %v2701_v47 = vshrl.u32 %v2697_v7, 16 }
 0x2e6   : > { %1851 = vst.msk [vmem:[#allocation2 + $0xa8] sm:$0xff] %vm1829_vm8, %v1764_v20  ;;  %v2112_v58 = vld [vmem:[#allocation2 + $0xd8] sm:$0xff]  ;;  %4500 = vmatmul.msk.f32.gmra.mxu1 %vm2125_vm10, %v2098_v22  ;;  %v2683_v18 = vadd.s32 %v2682_v59, %v2672_v42  ;;  %v2510_v21 = vadd.s32 %v2509_v43, %v2500_v15  ;;  %v2705_v20 = vsel %vm2704_vm14, 1, %v4605_v39  ;;  %vm5836_vm0 = vcmp.lt.s32.totalorder %v3588_v31, 16 }
 0x2e7   : > { %4514 = vmatmul.msk.f32.vlgmr.msra.gmra.mxu3 %vm2125_vm10, %v2112_v58  ;;  %v5841_v42 = vsub.s32 %v5725_v50, %v2483_v23  ;;  %v2707_v14 = vadd.s32 %v2705_v20, %v2699_v26  ;;  %vm2708_vm2 = vc.u32 %v2706_v29, %v2702_v45  ;;  %v2925_v22 = vand.u32 65535, %v5832_v38 }
 0x2e8   : > { %v2684_v54 = vadd.s32 %v2683_v18, %v2674_v16  ;;  %v3589_v50 = vsel %vm5825_vm15, %v5819_v30, %v5788_v17  ;;  %v2511_v58 = vshrl.u32 %v2510_v21, 4  ;;  %v4447_v16 = vld [vmem:[%s4655_s22 + $0x12d] sm:$0xff]  ;;  %v2703_v59 = vshrl.u32 %v5809_v61, 16  ;;  %v4476_v18 = vld [vmem:[%s4655_s22 + $0xf6] sm:$0xff] }
 0x2e9   : > { %1785 = vrot.lane.b32.xlu1 %v4446_v49, %s4603_s29  ;;  %2004 = vrot.lane.b32.xlu2 %v4482_v1, %s4604_s30  ;;  %v5845_v49 = vadd.s32 32, %v5689_v19  ;;  %v2709_v1 = vsel %vm2708_vm2, 1, %v4605_v39  ;;  %v2926_v3 = vshrl.u32 %v5832_v38, 16  ;;  %vm3446_vm3 = vcmp.ne.s32.totalorder %v5841_v42, 0  ;;  %v4484_v21 = vld [vmem:[%s4655_s22 + $0x136] sm:$0xff] }
 0x2ea   : > { %1990 = vrot.lane.b32.xlu0 %v4475_v6, %s4604_s30  ;;  %v2685_v5 = vshrl.u32 %v2684_v54, 4  ;;  %v2711_v44 = vadd.s32 %v2709_v1, %v2707_v14  ;;  %v5862_v6 = vmul.u32 58254, %v2925_v22  ;;  %vm3482_vm4 = vcmp.lt.s32.totalorder %v5841_v42, 0 }
 0x2eb   : > { %v1519_v0 = vpop.permute.xlu2 %1518  ;;  %v1983_v53 = vpop.permute.xlu1 %1982  ;;  %v2519_v32 = vand.u32 65535, %v5845_v49  ;;  %v2520_v17 = vshrl.u32 %v5845_v49, 16  ;;  %v2928_v33 = vmul.u32 14564, %v2925_v22  ;;  %v5871_v37 = vmul.u32 14564, %v2926_v3  ;;  %vm5895_vm12 = vmand %vm3482_vm4, %vm3446_vm3 }
 0x2ec   : > { %1619 = vst.msk [vmem:[#allocation2 + $0x40] sm:$0xff] %vm1610_vm6, %v1519_v0  ;;  %v1559_v55 = vpop.permute.xlu0 %1558  ;;  %v2686_v36 = vmul.u32 18, %v2685_v5  ;;  %v2712_v34 = vadd.s32 %v2711_v44, %v2701_v47  ;;  %v2932_v27 = vshll.u32 %v5862_v6, 16  ;;  %v5875_v28 = vadd.s32 18, %v5841_v42 }
 0x2ed   : > { %2070 = vst.msk [vmem:[#allocation2 + $0xa8] sm:$0xff] %vm2048_vm9, %v1983_v53  ;;  %v2512_v54 = vmul.u32 18, %v2511_v58  ;;  %v2931_v24 = vmul.u32 58254, %v2926_v3  ;;  %v2934_v0 = vshll.u32 %v5871_v37, 16  ;;  %v2522_v15 = vmul.u32 14564, %v2519_v32 }
 0x2ee   : > { %1639 = vst.msk [vmem:[#allocation2 + $0xe0] sm:$0xff] %vm1610_vm6, %v1559_v55  ;;  %v5853_v57 = vsub.s32 %v5729_v56, %v2686_v36  ;;  %v4483_v56 = vld [vmem:[%s4655_s22 + $0x12e] sm:$0xff]  ;;  %v2713_v2 = vadd.s32 %v2712_v34, %v2703_v59  ;;  %vm2936_vm11 = vc.u32 %v2928_v33, %v2932_v27  ;;  %v2938_v12 = vadd.s32 %v2932_v27, %v2928_v33 }
 0x2ef   : > { %v2937_v53 = vsel %vm2936_vm11, 1, %v4605_v39  ;;  %v5889_v46 = vmul.u32 58254, %v2519_v32  ;;  %v5902_v61 = vmul.u32 14564, %v2520_v17  ;;  %vm5918_vm15 = vcmp.lt.s32.totalorder %v3589_v50, 16  ;;  %v4448_v36 = vld [vmem:[%s4655_s22 + $0x135] sm:$0xff] }
 0x2f0   : > { %vm3453_vm5 = vcmp.ne.s32.totalorder %v5853_v57, 0  ;;  %vm3489_vm7 = vcmp.lt.s32.totalorder %v5853_v57, 0  ;;  %v5900_v11 = vadd.s32 18, %v5853_v57  ;;  %v2714_v60 = vshrl.u32 %v2713_v2, 4  ;;  %v4449_v2 = vld [vmem:[%s4655_s22 + $0x13d] sm:$0xff] }
 0x2f1   : > { %1773 = vrot.lane.b32.xlu1 %v4440_v10, %s4603_s29  ;;  %1568 = vrot.lane.b32.xlu2 %v4411_v13, %s4602_s28  ;;  %v2939_v7 = vadd.s32 %v2937_v53, %v2931_v24  ;;  %vm5911_vm13 = vmand %vm3489_vm7, %vm3453_vm5  ;;  %vm2940_vm14 = vc.u32 %v2938_v12, %v2934_v0  ;;  %v2526_v25 = vshll.u32 %v5889_v46, 16  ;;  %v5923_v30 = vsub.s32 %v5757_v35, %v2512_v54 }
 0x2f2   : > { %1554 = vrot.lane.b32.xlu0 %v4572_v9, %s4602_s28  ;;  %v2715_v26 = vmul.u32 18, %v2714_v60  ;;  %v2933_v45 = vshrl.u32 %v5862_v6, 16  ;;  %v2941_v29 = vsel %vm2940_vm14, 1, %v4605_v39  ;;  %v2525_v40 = vmul.u32 58254, %v2520_v17  ;;  %v4413_v60 = vld [vmem:[%s4655_s22 + $0x13c] sm:$0xff] }
 0x2f3   : > { %v1738_v52 = vpop.permute.xlu2 %1737  ;;  %v1531_v48 = vpop.permute.xlu1 %1530  ;;  %v2528_v20 = vshll.u32 %v5902_v61, 16  ;;  %v3590_v35 = vsel %vm5895_vm12, %v5875_v28, %v5841_v42  ;;  %v3597_v47 = vsel %vm5911_vm13, %v5900_v11, %v5853_v57  ;;  %v2532_v22 = vadd.s32 %v2526_v25, %v2522_v15 }
 0x2f4   : > { %1838 = vst.msk [vmem:[#allocation2 + $0x40] sm:$0xff] %vm1829_vm8, %v1738_v52  ;;  %v1778_v51 = vpop.permute.xlu0 %1777  ;;  %v2106_v62 = vld [vmem:[#allocation2 + $0xa8] sm:$0xff]  ;;  %v2943_v52 = vadd.s32 %v2941_v29, %v2939_v7  ;;  %vm3447_vm2 = vcmp.ne.s32.totalorder %v5923_v30, 0  ;;  %vm3483_vm3 = vcmp.lt.s32.totalorder %v5923_v30, 0  ;;  %v2527_v6 = vshrl.u32 %v5889_v46, 16 }
 0x2f5   : > { %1625 = vst.msk [vmem:[#allocation2 + $0x70] sm:$0xff] %vm1610_vm6, %v1531_v48  ;;  %4508 = vmatmul.msk.f32.gmra.mxu2 %vm2125_vm10, %v2106_v62  ;;  %v2935_v48 = vshrl.u32 %v5871_v37, 16  ;;  %vm2534_vm4 = vc.u32 %v2532_v22, %v2528_v20  ;;  %v2529_v7 = vshrl.u32 %v5902_v61, 16  ;;  %vm5993_vm11 = vmand %vm3483_vm3, %vm3447_vm2  ;;  %v6010_v29 = vadd.s32 152, %v5689_v19 }
 0x2f6   : > { %1858 = vst.msk [vmem:[#allocation2 + $0xe0] sm:$0xff] %vm1829_vm8, %v1778_v51  ;;  %v5952_v51 = vsub.s32 %v5785_v8, %v2715_v26  ;;  %v2944_v62 = vadd.s32 %v2943_v52, %v2933_v45  ;;  %v5960_v8 = vadd.s32 18, %v5923_v30  ;;  %vm3633_vm2 = vcmp.lt.s32.totalorder %v3597_v47, 16 }
 0x2f7   : > { %v2954_v47 = vand.u32 65535, %v6010_v29 }
 0x2f8   : > { %v2945_v33 = vadd.s32 %v2944_v62, %v2935_v48  ;;  %vm3454_vm5 = vcmp.ne.s32.totalorder %v5952_v51, 0  ;;  %vm3490_vm7 = vcmp.lt.s32.totalorder %v5952_v51, 0  ;;  %v3562_v31 = vadd.s32 18, %v5952_v51 }
 0x2f9   : > { %1787 = vrot.lane.b32.xlu1 %v4447_v16, %s4603_s29  ;;  %2006 = vrot.lane.b32.xlu2 %v4483_v56, %s4604_s30  ;;  %v2535_v56 = vsel %vm2534_vm4, 1, %v4605_v39  ;;  %vm6004_vm14 = vmand %vm3490_vm7, %vm3454_vm5  ;;  %v3591_v42 = vsel %vm5993_vm11, %v5960_v8, %v5923_v30 }
 0x2fa   : > { %1992 = vrot.lane.b32.xlu0 %v4476_v18, %s4604_s30  ;;  %v2946_v26 = vshrl.u32 %v2945_v33, 4  ;;  %v3598_v28 = vsel %vm6004_vm14, %v3562_v31, %v5952_v51  ;;  %v6041_v51 = vadd.s32 40, %v5689_v19  ;;  %vm6054_vm13 = vcmp.lt.s32.totalorder %v3591_v42, 16 }
 0x2fb   : > { %v2255_v55 = vpop.f32.mrf.mxu0  ;;  %v1957_v4 = vpop.permute.xlu2 %1956  ;;  %vm6058_vm3 = vcmp.lt.s32.totalorder %v3598_v28, 16 }
 0x2fc   : > { %v3732_v10 = vsel %vm5836_vm0, %v2255_v55, 0.0  ;;  %2057 = vst.msk [vmem:[#allocation2 + $0x40] sm:$0xff] %vm2048_vm9, %v1957_v4  ;;  %v1750_v23 = vpop.permute.xlu1 %1749  ;;  %v1997_v13 = vpop.permute.xlu0 %1996  ;;  %vm2530_vm0 = vc.u32 %v2522_v15, %v2526_v25  ;;  %v4485_v15 = vld [vmem:[%s4655_s22 + $0x13e] sm:$0xff]  ;;  %v2947_v57 = vmul.u32 18, %v2946_v26  ;;  %v2548_v33 = vand.u32 65535, %v6041_v51 }
 0x2fd   : > { %3769 = vst.msk [vmem:[%s5886_s20] sm:$0xff] %vm3768_vm1, %v3732_v10  ;;  %v3885_v9 = vmul.f32 %v3732_v10, %v3732_v10  ;;  %v2531_v14 = vsel %vm2530_vm0, 1, %v4605_v39  ;;  %v3806_v16 = vsel %vm3768_vm1, %v3732_v10, 0.0  ;;  %vm3626_vm0 = vcmp.lt.s32.totalorder %v3590_v35, 16 }
 0x2fe   : > { %1844 = vst.msk [vmem:[#allocation2 + $0x70] sm:$0xff] %vm1829_vm8, %v1750_v23  ;;  %v2533_v50 = vadd.s32 %v2531_v14, %v2525_v40  ;;  %v2551_v31 = vmul.u32 14564, %v2548_v33 }
 0x2ff   : > { %2063 = vst.msk [vmem:[#allocation2 + $0x70] sm:$0xff] %vm2048_vm9, %v5767_v63  ;;  %v5946_v63 = vadd.s32 88, %v5689_v19  ;;  %v3921_v32 = vsel %vm3768_vm1, %v3885_v9, 0.0 }
 0x300   : > { %2077 = vst.msk [vmem:[#allocation2 + $0xe0] sm:$0xff] %vm2048_vm9, %v1997_v13  ;;  %v2537_v37 = vadd.s32 %v2535_v56, %v2533_v50  ;;  %v2957_v56 = vmul.u32 14564, %v2954_v47 }
 0x301   : > { %1789 = vrot.lane.b32.xlu1 %v4448_v36, %s4603_s29  ;;  %2008 = vrot.lane.b32.xlu2 %v4484_v21, %s4604_s30  ;;  %v2722_v58 = vand.u32 65535, %v5946_v63  ;;  %v2723_v1 = vshrl.u32 %v5946_v63, 16 }
 0x302   : > { %1570 = vrot.lane.b32.xlu0 %v4412_v41, %s4602_s28  ;;  %v2538_v10 = vadd.s32 %v2537_v37, %v2527_v6 }
 0x303   : > { %v2258_v59 = vpop.f32.mrf.mxu0  ;;  %v2093_v44 = vld [vmem:[#allocation2 + $0x40] sm:$0xff]  ;;  %v5962_v3 = vpop.permute.xlu2 %1970  ;;  %v2725_v24 = vmul.u32 14564, %v2722_v58  ;;  %v5974_v0 = vmul.u32 58254, %v2722_v58  ;;  %v5980_v46 = vmul.u32 14564, %v2723_v1  ;;  %v2728_v36 = vmul.u32 58254, %v2723_v1 }
 0x304   : > { %v3733_v17 = vsel %vm5918_vm15, %v2258_v59, 0.0  ;;  %v1766_v18 = vpop.permute.xlu1 %1765  ;;  %v1547_v34 = vpop.permute.xlu0 %1546  ;;  %4495 = vmatmul.msk.f32.gmra.mxu0 %vm2125_vm10, %v2093_v44  ;;  %v2539_v41 = vadd.s32 %v2538_v10, %v2529_v7  ;;  %v2955_v1 = vshrl.u32 %v6010_v29, 16  ;;  %v6051_v59 = vsub.s32 %v5832_v38, %v2947_v57 }
 0x305   : > { %3770 = vst.msk [vmem:[%s5886_s20 + $0x8] sm:$0xff] %vm3768_vm1, %v3733_v17  ;;  %v3807_v27 = vsel %vm3768_vm1, %v3733_v17, 0.0  ;;  %v3886_v54 = vmul.f32 %v3733_v17, %v3733_v17  ;;  %v2729_v23 = vshll.u32 %v5974_v0, 16  ;;  %v2731_v45 = vshll.u32 %v5980_v46, 16 }
 0x306   : > { %v3808_v53 = vadd.f32 %v3807_v27, %v3806_v16  ;;  %1633 = vst.msk [vmem:[#allocation2 + $0xb0] sm:$0xff] %vm1610_vm6, %v1547_v34  ;;  %v2099_v12 = vld [vmem:[#allocation2 + $0x70] sm:$0xff]  ;;  %v2730_v22 = vshrl.u32 %v5974_v0, 16  ;;  %v2540_v50 = vshrl.u32 %v2539_v41, 4  ;;  %v2732_v44 = vshrl.u32 %v5980_v46, 16 }
 0x307   : > { %v3922_v55 = vsel %vm3768_vm1, %v3886_v54, 0.0  ;;  %1852 = vst.msk [vmem:[#allocation2 + $0xb0] sm:$0xff] %vm1829_vm8, %v1766_v18  ;;  %v2113_v4 = vld [vmem:[#allocation2 + $0xe0] sm:$0xff]  ;;  %4501 = vmatmul.msk.f32.gmra.mxu1 %vm2125_vm10, %v2099_v12  ;;  %vm2733_vm15 = vc.u32 %v2725_v24, %v2729_v23  ;;  %v2735_v21 = vadd.s32 %v2729_v23, %v2725_v24  ;;  %v6062_v34 = vmul.u32 14564, %v2955_v1 }
 0x308   : > { %v3923_v13 = vadd.f32 %v3922_v55, %v3921_v32  ;;  %4515 = vmatmul.msk.f32.gmra.mxu3 %vm2125_vm10, %v2113_v4  ;;  %v2734_v40 = vsel %vm2733_vm15, 1, %v4605_v39  ;;  %v2958_v32 = vmul.u32 58254, %v2954_v47  ;;  %v2541_v38 = vmul.u32 18, %v2540_v50 }
 0x309   : > { %1791 = vrot.lane.b32.xlu1 %v4449_v2, %s4603_s29  ;;  %2010 = vrot.lane.b32.xlu2 %v4485_v15, %s4604_s30  ;;  %vm2737_vm12 = vc.u32 %v2735_v21, %v2731_v45  ;;  %v2736_v35 = vadd.s32 %v2734_v40, %v2728_v36  ;;  %v2960_v54 = vmul.u32 58254, %v2955_v1  ;;  %vm3462_vm4 = vcmp.ne.s32.totalorder %v6051_v59, 0 }
 0x30a   : > { %1572 = vrot.lane.b32.xlu0 %v4413_v60, %s4602_s28  ;;  %v2738_v58 = vsel %vm2737_vm12, 1, %v4605_v39  ;;  %v2961_v2 = vshll.u32 %v2958_v32, 16  ;;  %v2962_v12 = vshrl.u32 %v2958_v32, 16  ;;  %v2963_v15 = vshll.u32 %v6062_v34, 16 }
 0x30b   : > { %v2282_v20 = vpop.f32.mrf.mxu1  ;;  %v1563_v9 = vpop.permute.xlu2 %1562  ;;  %v2740_v6 = vadd.s32 %v2738_v58, %v2736_v35  ;;  %v2549_v46 = vshrl.u32 %v6041_v51, 16  ;;  %v6069_v55 = vmul.u32 58254, %v2548_v33  ;;  %v6084_v21 = vsub.s32 %v5845_v49, %v2541_v38 }
 0x30c   : > { %v2261_v52 = vpop.f32.mrf.mxu0  ;;  %v1985_v48 = vpop.permute.xlu1 %1984  ;;  %1641 = vst.msk [vmem:[#allocation2 + $0xf0] sm:$0xff] %vm1610_vm6, %v1563_v9  ;;  %v6033_v43 = vsel %vm3633_vm2, %v2282_v20, 0.0  ;;  %vm2965_vm5 = vc.u32 %v2957_v56, %v2961_v2  ;;  %v2967_v10 = vadd.s32 %v2961_v2, %v2957_v56  ;;  %v2964_v42 = vshrl.u32 %v6062_v34, 16 }
 0x30d   : > { %v3734_v5 = vsel %vm3626_vm0, %v2261_v52, 0.0  ;;  %2071 = vst.msk [vmem:[#allocation2 + $0xb0] sm:$0xff] %vm2048_vm9, %v1985_v48  ;;  %v1561_v11 = vpop.permute.xlu0 %1560  ;;  %v2741_v27 = vadd.s32 %v2740_v6, %v2730_v22  ;;  %v2966_v25 = vsel %vm2965_vm5, 1, %v4605_v39  ;;  %v2553_v20 = vmul.u32 14564, %v2549_v46 }
 0x30e   : > { %3771 = vst.msk [vmem:[%s5886_s20 + $0x10] sm:$0xff] %vm3768_vm1, %v3734_v5  ;;  %v3809_v30 = vsel %vm3768_vm1, %v3734_v5, 0.0  ;;  %v3887_v14 = vmul.f32 %v3734_v5, %v3734_v5  ;;  %v2968_v61 = vadd.s32 %v2966_v25, %v2960_v54  ;;  %vm2969_vm7 = vc.u32 %v2967_v10, %v2963_v15 }
 0x30f   : > { %v3810_v62 = vadd.f32 %v3809_v30, %v3808_v53  ;;  %1640 = vst.msk [vmem:[#allocation2 + $0xe8] sm:$0xff] %vm1610_vm6, %v1561_v11  ;;  %v2742_v7 = vadd.s32 %v2741_v27, %v2732_v44  ;;  %v2970_v40 = vsel %vm2969_vm7, 1, %v4605_v39  ;;  %v2555_v48 = vshll.u32 %v6069_v55, 16 }
 0x310   : > { %v3924_v16 = vsel %vm3768_vm1, %v3887_v14, 0.0  ;;  %3778 = vst.msk [vmem:[%s5886_s20 + $0x48] sm:$0xff] %vm3768_vm1, %v6033_v43  ;;  %v2972_v52 = vadd.s32 %v2970_v40, %v2968_v61  ;;  %v2554_v28 = vmul.u32 58254, %v2549_v46  ;;  %v2557_v57 = vshll.u32 %v2553_v20, 16 }
 0x311   : > { %v3925_v8 = vadd.f32 %v3924_v16, %v3923_v13  ;;  %v2743_v45 = vshrl.u32 %v2742_v7, 4  ;;  %v6092_v5 = vadd.s32 96, %v5689_v19  ;;  %vm3498_vm11 = vcmp.lt.s32.totalorder %v6051_v59, 0 }
 0x312   : > { %v2973_v35 = vadd.s32 %v2972_v52, %v2962_v12  ;;  %vm2559_vm14 = vc.u32 %v2551_v31, %v2555_v48  ;;  %v2561_v47 = vadd.s32 %v2555_v48, %v2551_v31  ;;  %v3570_v1 = vadd.s32 18, %v6051_v59  ;;  %vm6120_vm12 = vmand %vm3498_vm11, %vm3462_vm4 }
 0x313   : > { %v1535_v37 = vpop.permute.xlu2 %1534  ;;  %v2744_v41 = vmul.u32 18, %v2743_v45  ;;  %v2560_v22 = vsel %vm2559_vm14, 1, %v4605_v39  ;;  %v2752_v50 = vshrl.u32 %v6092_v5, 16  ;;  %vm3448_vm15 = vcmp.ne.s32.totalorder %v6084_v21, 0 }
 0x314   : > { %v2264_v24 = vpop.f32.mrf.mxu0  ;;  %v1533_v0 = vpop.permute.xlu1 %1532  ;;  %v2107_v53 = vld [vmem:[#allocation2 + $0xb0] sm:$0xff]  ;;  %1627 = vst.msk [vmem:[#allocation2 + $0x80] sm:$0xff] %vm1610_vm6, %v1535_v37  ;;  %vm3484_vm0 = vcmp.lt.s32.totalorder %v6084_v21, 0  ;;  %v2974_v44 = vadd.s32 %v2973_v35, %v2964_v42  ;;  %v2562_v6 = vadd.s32 %v2560_v22, %v2554_v28  ;;  %vm2563_vm2 = vc.u32 %v2561_v47, %v2557_v57 }
 0x315   : > { %v3735_v4 = vsel %vm6054_vm13, %v2264_v24, 0.0  ;;  %1626 = vst.msk [vmem:[#allocation2 + $0x78] sm:$0xff] %vm1610_vm6, %v1533_v0  ;;  %v1780_v60 = vpop.permute.xlu0 %1779  ;;  %4509 = vmatmul.msk.f32.gmra.mxu2 %vm2125_vm10, %v2107_v53  ;;  %v6111_v16 = vsub.s32 %v5946_v63, %v2744_v41  ;;  %v3556_v63 = vadd.s32 18, %v6084_v21  ;;  %v2564_v32 = vsel %vm2563_vm2, 1, %v4605_v39  ;;  %vm6134_vm13 = vmand %vm3484_vm0, %vm3448_vm15 }
 0x316   : > { %3772 = vst.msk [vmem:[%s5886_s20 + $0x18] sm:$0xff] %vm3768_vm1, %v3735_v4  ;;  %v3811_v23 = vsel %vm3768_vm1, %v3735_v4, 0.0  ;;  %v3888_v13 = vmul.f32 %v3735_v4, %v3735_v4  ;;  %v2975_v34 = vshrl.u32 %v2974_v44, 4  ;;  %v2558_v33 = vshrl.u32 %v2553_v20, 16 }
 0x317   : > { %v6079_v26 = vadd.f32 %v3811_v23, %v3810_v62  ;;  %1859 = vst.msk [vmem:[#allocation2 + $0xe8] sm:$0xff] %vm1829_vm8, %v1780_v60  ;;  %v2751_v62 = vand.u32 65535, %v6092_v5  ;;  %v2566_v38 = vadd.s32 %v2564_v32, %v2562_v6  ;;  %v6128_v37 = vmul.u32 14564, %v2752_v50 }
 0x318   : > { %v3926_v36 = vsel %vm3768_vm1, %v3888_v13, 0.0  ;;  %vm3491_vm4 = vcmp.lt.s32.totalorder %v6111_v16, 0  ;;  %v2757_v54 = vmul.u32 58254, %v2752_v50  ;;  %v3563_v53 = vadd.s32 18, %v6111_v16 }
 0x319   : > { %v6087_v9 = vadd.f32 %v3926_v36, %v3925_v8  ;;  %v2556_v8 = vshrl.u32 %v6069_v55, 16  ;;  %v2754_v17 = vmul.u32 14564, %v2751_v62  ;;  %v2755_v18 = vmul.u32 58254, %v2751_v62 }
 0x31a   : > { %v2760_v0 = vshll.u32 %v6128_v37, 16  ;;  %v6146_v46 = vadd.s32 48, %v5689_v19  ;;  %v3592_v4 = vsel %vm6134_vm13, %v3556_v63, %v6084_v21  ;;  %v2761_v47 = vshrl.u32 %v6128_v37, 16 }
 0x31b   : > { %v2285_v11 = vpop.f32.mrf.mxu1  ;;  %v6095_v49 = vpop.permute.xlu2 %1972  ;;  %v2758_v2 = vshll.u32 %v2755_v18, 16  ;;  %v2567_v24 = vadd.s32 %v2566_v38, %v2556_v8  ;;  %v2759_v21 = vshrl.u32 %v2755_v18, 16  ;;  %vm3628_vm15 = vcmp.lt.s32.totalorder %v3592_v4, 16 }
 0x31c   : > { %v6099_v30 = vsel %vm6058_vm3, %v2285_v11, 0.0  ;;  %v1752_v14 = vpop.permute.xlu1 %1751  ;;  %vm3455_vm3 = vcmp.ne.s32.totalorder %v6111_v16, 0  ;;  %v2577_v25 = vand.u32 65535, %v6146_v46  ;;  %v2578_v31 = vshrl.u32 %v6146_v46, 16 }
 0x31d   : > { %3779 = vst.msk [vmem:[%s5886_s20 + $0x50] sm:$0xff] %vm3768_vm1, %v6099_v30  ;;  %v1999_v58 = vpop.permute.xlu0 %1998  ;;  %vm2762_vm5 = vc.u32 %v2754_v17, %v2758_v2  ;;  %v2764_v15 = vadd.s32 %v2758_v2, %v2754_v17  ;;  %vm6151_vm7 = vmand %vm3491_vm4, %vm3455_vm3  ;;  %v2568_v7 = vadd.s32 %v2567_v24, %v2558_v33  ;;  %v6196_v6 = vadd.s32 160, %v5689_v19 }
 0x31e   : > { %1845 = vst.msk [vmem:[#allocation2 + $0x78] sm:$0xff] %vm1829_vm8, %v1752_v14  ;;  %v2763_v10 = vsel %vm2762_vm5, 1, %v4605_v39  ;;  %v3599_v20 = vsel %vm6151_vm7, %v3563_v53, %v6111_v16  ;;  %v6170_v52 = vmul.u32 58254, %v2577_v25  ;;  %v6176_v57 = vmul.u32 14564, %v2578_v31 }
 0x31f   : > { %2078 = vst.msk [vmem:[#allocation2 + $0xe8] sm:$0xff] %vm2048_vm9, %v1999_v58  ;;  %v2765_v13 = vadd.s32 %v2763_v10, %v2757_v54  ;;  %vm2766_vm11 = vc.u32 %v2764_v15, %v2760_v0  ;;  %v2569_v36 = vshrl.u32 %v2568_v7, 4  ;;  %v2580_v14 = vmul.u32 14564, %v2577_v25 }
 0x320   : > { %2064 = vst.msk [vmem:[#allocation2 + $0x78] sm:$0xff] %vm2048_vm9, %v5962_v3  ;;  %v3606_v3 = vsel %vm6120_vm12, %v3570_v1, %v6051_v59  ;;  %v2976_v59 = vmul.u32 18, %v2975_v34  ;;  %v2767_v41 = vsel %vm2766_vm11, 1, %v4605_v39  ;;  %vm6183_vm0 = vcmp.lt.s32.totalorder %v3599_v20, 16 }
 0x321   : > { %vm6160_vm14 = vcmp.lt.s32.totalorder %v3606_v3, 16  ;;  %v2570_v42 = vmul.u32 18, %v2569_v36  ;;  %v2769_v28 = vadd.s32 %v2767_v41, %v2765_v13  ;;  %v2584_v58 = vshll.u32 %v6170_v52, 16 }
 0x322   : > { %v6174_v48 = vsub.s32 %v6010_v29, %v2976_v59  ;;  %v2583_v32 = vmul.u32 58254, %v2578_v31  ;;  %v2586_v17 = vshll.u32 %v6176_v57, 16  ;;  %v2983_v2 = vand.u32 65535, %v6196_v6 }
 0x323   : > { %v1565_v12 = vpop.permute.xlu2 %1564  ;;  %v2770_v29 = vadd.s32 %v2769_v28, %v2759_v21  ;;  %v6193_v44 = vsub.s32 %v6041_v51, %v2570_v42  ;;  %vm2588_vm13 = vc.u32 %v2580_v14, %v2584_v58  ;;  %v2590_v37 = vadd.s32 %v2584_v58, %v2580_v14 }
 0x324   : > { %v1768_v55 = vpop.permute.xlu1 %1767  ;;  %1642 = vst.msk [vmem:[#allocation2 + $0xf8] sm:$0xff] %vm1610_vm6, %v1565_v12  ;;  %vm3463_vm2 = vcmp.ne.s32.totalorder %v6174_v48, 0  ;;  %vm3499_vm12 = vcmp.lt.s32.totalorder %v6174_v48, 0  ;;  %v3571_v34 = vadd.s32 18, %v6174_v48  ;;  %v2589_v54 = vsel %vm2588_vm13, 1, %v4605_v39 }
 0x325   : > { %v1549_v23 = vpop.permute.xlu0 %1548  ;;  %v2771_v33 = vadd.s32 %v2770_v29, %v2761_v47  ;;  %vm3449_vm3 = vcmp.ne.s32.totalorder %v6193_v44, 0  ;;  %vm6220_vm4 = vmand %vm3499_vm12, %vm3463_vm2  ;;  %v2591_v3 = vadd.s32 %v2589_v54, %v2583_v32  ;;  %vm2592_vm5 = vc.u32 %v2590_v37, %v2586_v17 }
 0x326   : > { %1634 = vst.msk [vmem:[#allocation2 + $0xb8] sm:$0xff] %vm1610_vm6, %v1549_v23  ;;  %v2114_v45 = vld [vmem:[#allocation2 + $0xe8] sm:$0xff]  ;;  %v2984_v24 = vshrl.u32 %v6196_v6, 16  ;;  %v6226_v0 = vadd.s32 56, %v5689_v19  ;;  %vm3485_vm7 = vcmp.lt.s32.totalorder %v6193_v44, 0  ;;  %v2593_v12 = vsel %vm2592_vm5, 1, %v4605_v39 }
 0x327   : > { %1853 = vst.msk [vmem:[#allocation2 + $0xb8] sm:$0xff] %vm1829_vm8, %v1768_v55  ;;  %4516 = vmatmul.msk.f32.gmra.mxu3 %vm2125_vm10, %v2114_v45  ;;  %v2100_v40 = vld [vmem:[#allocation2 + $0x78] sm:$0xff]  ;;  %v2772_v27 = vshrl.u32 %v2771_v33, 4  ;;  %v2987_v15 = vmul.u32 58254, %v2983_v2  ;;  %v2587_v55 = vshrl.u32 %v6176_v57, 16  ;;  %v2595_v4 = vadd.s32 %v2593_v12, %v2591_v3  ;;  %vm6255_vm11 = vmand %vm3485_vm7, %vm3449_vm3 }
 0x328   : > { %4502 = vmatmul.msk.f32.gmra.mxu1 %vm2125_vm10, %v2100_v40  ;;  %v2986_v60 = vmul.u32 14564, %v2983_v2  ;;  %v6231_v59 = vmul.u32 14564, %v2984_v24  ;;  %v3607_v7 = vsel %vm6220_vm4, %v3571_v34, %v6174_v48  ;;  %v2606_v25 = vand.u32 65535, %v6226_v0 }
 0x329   : > { %v2309_v11 = vpop.f32.mrf.mxu2  ;;  %v2267_v35 = vpop.f32.mrf.mxu0  ;;  %v2773_v53 = vmul.u32 18, %v2772_v27  ;;  %v2990_v13 = vshll.u32 %v2987_v15, 16  ;;  %v6243_v61 = vadd.s32 18, %v6193_v44  ;;  %v2989_v21 = vmul.u32 58254, %v2984_v24 }
 0x32a   : > { %v6181_v22 = vsel %vm6160_vm14, %v2309_v11, 0.0  ;;  %v3736_v62 = vsel %vm3628_vm15, %v2267_v35, 0.0  ;;  %v2607_v40 = vshrl.u32 %v6226_v0, 16  ;;  %v2992_v48 = vshll.u32 %v6231_v59, 16 }
 0x32b   : > { %3787 = vst.msk [vmem:[%s5886_s20 + $0x90] sm:$0xff] %vm3768_vm1, %v6181_v22  ;;  %v3813_v1 = vsel %vm3768_vm1, %v3736_v62, 0.0  ;;  %v3889_v16 = vmul.f32 %v3736_v62, %v3736_v62  ;;  %v1537_v8 = vpop.permute.xlu2 %1536  ;;  %v6237_v10 = vsub.s32 %v6092_v5, %v2773_v53  ;;  %v2609_v28 = vmul.u32 14564, %v2606_v25 }
 0x32c   : > { %3773 = vst.msk [vmem:[%s5886_s20 + $0x20] sm:$0xff] %vm3768_vm1, %v3736_v62  ;;  %v6201_v56 = vadd.f32 %v3813_v1, %v6079_v26  ;;  %v1782_v63 = vpop.permute.xlu1 %1781  ;;  %v2585_v26 = vshrl.u32 %v6170_v52, 16  ;;  %vm6267_vm2 = vcmp.lt.s32.totalorder %v3607_v7, 16  ;;  %v2996_v47 = vadd.s32 %v2990_v13, %v2986_v60 }
 0x32d   : > { %v3928_v18 = vsel %vm3768_vm1, %v3889_v16, 0.0  ;;  %1860 = vst.msk [vmem:[#allocation2 + $0xf0] sm:$0xff] %vm1829_vm8, %v1782_v63  ;;  %v1987_v51 = vpop.permute.xlu0 %1986  ;;  %vm3456_vm14 = vcmp.ne.s32.totalorder %v6237_v10, 0  ;;  %vm3492_vm15 = vcmp.lt.s32.totalorder %v6237_v10, 0  ;;  %v3564_v11 = vadd.s32 18, %v6237_v10 }
 0x32e   : > { %v6210_v38 = vadd.f32 %v3928_v18, %v6087_v9  ;;  %2072 = vst.msk [vmem:[#allocation2 + $0xb8] sm:$0xff] %vm2048_vm9, %v1987_v51  ;;  %v2596_v36 = vadd.s32 %v2595_v4, %v2585_v26  ;;  %v2610_v14 = vmul.u32 58254, %v2606_v25  ;;  %v3593_v62 = vsel %vm6255_vm11, %v6243_v61, %v6193_v44  ;;  %vm6283_vm12 = vmand %vm3492_vm15, %vm3456_vm14 }
 0x32f   : > { %1628 = vst.msk [vmem:[#allocation2 + $0x88] sm:$0xff] %vm1610_vm6, %v1537_v8  ;;  %v2991_v58 = vshrl.u32 %v2987_v15, 16  ;;  %vm2998_vm13 = vc.u32 %v2996_v47, %v2992_v48  ;;  %v2611_v16 = vmul.u32 14564, %v2607_v40  ;;  %v2612_v8 = vmul.u32 58254, %v2607_v40 }
 0x330   : > { %v2597_v42 = vadd.s32 %v2596_v36, %v2587_v55  ;;  %v2993_v32 = vshrl.u32 %v6231_v59, 16  ;;  %v2999_v44 = vsel %vm2998_vm13, 1, %v4605_v39  ;;  %v6290_v17 = vadd.s32 104, %v5689_v19 }
 0x331   : > { %v3600_v18 = vsel %vm6283_vm12, %v3564_v11, %v6237_v10  ;;  %v2615_v33 = vshll.u32 %v2611_v16, 16  ;;  %v2614_v24 = vshrl.u32 %v2610_v14, 16  ;;  %vm6311_vm14 = vcmp.lt.s32.totalorder %v3593_v62, 16 }
 0x332   : > { %v2598_v29 = vshrl.u32 %v2597_v42, 4  ;;  %v2780_v2 = vand.u32 65535, %v6290_v17  ;;  %v2781_v12 = vshrl.u32 %v6290_v17, 16  ;;  %vm6319_vm15 = vcmp.lt.s32.totalorder %v3600_v18, 16 }
 0x333   : > { %v6239_v23 = vpop.permute.xlu2 %1974 }
 0x334   : > { %v2288_v31 = vpop.f32.mrf.mxu1  ;;  %v1754_v45 = vpop.permute.xlu1 %1753  ;;  %v2599_v63 = vmul.u32 18, %v2598_v29  ;;  %v2783_v7 = vmul.u32 14564, %v2780_v2  ;;  %v2784_v10 = vmul.u32 58254, %v2780_v2  ;;  %v2786_v11 = vmul.u32 58254, %v2781_v12 }
 0x335   : > { %v6248_v20 = vsel %vm6183_vm0, %v2288_v31, 0.0  ;;  %1846 = vst.msk [vmem:[#allocation2 + $0x80] sm:$0xff] %vm1829_vm8, %v1754_v45  ;;  %v2001_v5 = vpop.permute.xlu0 %2000  ;;  %v2108_v41 = vld [vmem:[#allocation2 + $0xb8] sm:$0xff]  ;;  %vm2994_vm0 = vc.u32 %v2986_v60, %v2990_v13  ;;  %v2616_v13 = vshrl.u32 %v2611_v16, 16  ;;  %v6309_v31 = vmul.u32 14564, %v2781_v12 }
 0x336   : > { %3780 = vst.msk [vmem:[%s5886_s20 + $0x58] sm:$0xff] %vm3768_vm1, %v6248_v20  ;;  %4510 = vmatmul.msk.f32.gmra.mxu2 %vm2125_vm10, %v2108_v41  ;;  %v2995_v35 = vsel %vm2994_vm0, 1, %v4605_v39  ;;  %v2600_v37 = vsub.s32 %v6146_v46, %v2599_v63 }
 0x337   : > { %2079 = vst.msk [vmem:[#allocation2 + $0xf0] sm:$0xff] %vm2048_vm9, %v2001_v5  ;;  %v2997_v1 = vadd.s32 %v2995_v35, %v2989_v21  ;;  %v2787_v21 = vshll.u32 %v2784_v10, 16  ;;  %v2789_v57 = vshll.u32 %v6309_v31, 16  ;;  %v2790_v2 = vshrl.u32 %v6309_v31, 16 }
 0x338   : > { %2065 = vst.msk [vmem:[#allocation2 + $0x80] sm:$0xff] %vm2048_vm9, %v6095_v49  ;;  %v2613_v49 = vshll.u32 %v2610_v14, 16  ;;  %vm3450_vm4 = vcmp.ne.s32.totalorder %v2600_v37, 0  ;;  %vm3486_vm5 = vcmp.lt.s32.totalorder %v2600_v37, 0  ;;  %v3558_v55 = vadd.s32 18, %v2600_v37 }
 0x339   : > { %v3001_v34 = vadd.s32 %v2999_v44, %v2997_v1  ;;  %vm6303_vm11 = vmand %vm3486_vm5, %vm3450_vm4  ;;  %vm2791_vm0 = vc.u32 %v2783_v7, %v2787_v21  ;;  %v2793_v50 = vadd.s32 %v2787_v21, %v2783_v7 }
 0x33a   : > { %vm2617_vm3 = vc.u32 %v2609_v28, %v2613_v49  ;;  %v2619_v54 = vadd.s32 %v2613_v49, %v2609_v28  ;;  %v3594_v41 = vsel %vm6303_vm11, %v3558_v55, %v2600_v37  ;;  %v2792_v62 = vsel %vm2791_vm0, 1, %v4605_v39 }
 0x33b   : > { %v1567_v51 = vpop.permute.xlu2 %1566  ;;  %v2618_v27 = vsel %vm2617_vm3, 1, %v4605_v39  ;;  %v3002_v3 = vadd.s32 %v3001_v34, %v2991_v58  ;;  %v2794_v34 = vadd.s32 %v2792_v62, %v2786_v11  ;;  %vm2795_vm12 = vc.u32 %v2793_v50, %v2789_v57 }
 0x33c   : > { %v1770_v26 = vpop.permute.xlu1 %1769  ;;  %1643 = vst.msk [vmem:[#allocation2 + $0x100] sm:$0xff] %vm1610_vm6, %v1567_v51  ;;  %v2620_v53 = vadd.s32 %v2618_v27, %v2612_v8  ;;  %vm2621_vm7 = vc.u32 %v2619_v54, %v2615_v33  ;;  %v6344_v8 = vadd.s32 216, %v5689_v19  ;;  %v2788_v51 = vshrl.u32 %v2784_v10, 16 }
 0x33d   : > { %v1551_v9 = vpop.permute.xlu0 %1550  ;;  %v3003_v60 = vadd.s32 %v3002_v3, %v2993_v32  ;;  %v2622_v59 = vsel %vm2621_vm7, 1, %v4605_v39  ;;  %v2796_v27 = vsel %vm2795_vm12, 1, %v4605_v39 }
 0x33e   : > { %1635 = vst.msk [vmem:[#allocation2 + $0xc0] sm:$0xff] %vm1610_vm6, %v1551_v9  ;;  %v2115_v15 = vld [vmem:[#allocation2 + $0xf0] sm:$0xff]  ;;  %v2624_v25 = vadd.s32 %v2622_v59, %v2620_v53  ;;  %v3186_v54 = vand.u32 65535, %v6344_v8  ;;  %v2798_v9 = vadd.s32 %v2796_v27, %v2794_v34  ;;  %v3187_v3 = vshrl.u32 %v6344_v8, 16 }
 0x33f   : > { %1854 = vst.msk [vmem:[#allocation2 + $0xc0] sm:$0xff] %vm1829_vm8, %v1770_v26  ;;  %4517 = vmatmul.msk.f32.gmra.mxu3 %vm2125_vm10, %v2115_v15  ;;  %v2101_v46 = vld [vmem:[#allocation2 + $0x80] sm:$0xff]  ;;  %v3004_v36 = vshrl.u32 %v3003_v60, 4 }
 0x340   : > { %4503 = vmatmul.msk.f32.gmra.mxu1 %vm2125_vm10, %v2101_v46  ;;  %v2625_v52 = vadd.s32 %v2624_v25, %v2614_v24  ;;  %v6366_v24 = vadd.s32 168, %v5689_v19  ;;  %v3190_v15 = vmul.u32 58254, %v3186_v54  ;;  %v2799_v4 = vadd.s32 %v2798_v9, %v2788_v51 }
 0x341   : > { %v2312_v45 = vpop.f32.mrf.mxu2  ;;  %v3005_v42 = vmul.u32 18, %v3004_v36  ;;  %v6374_v60 = vmul.u32 14564, %v3187_v3  ;;  %v3189_v10 = vmul.u32 14564, %v3186_v54  ;;  %v3192_v5 = vmul.u32 58254, %v3187_v3 }
 0x342   : > { %v6317_v40 = vsel %vm6267_vm2, %v2312_v45, 0.0  ;;  %v2626_v14 = vadd.s32 %v2625_v52, %v2616_v13  ;;  %vm6339_vm2 = vcmp.lt.s32.totalorder %v3594_v41, 16  ;;  %v3012_v13 = vand.u32 65535, %v6366_v24 }
 0x343   : > { %3788 = vst.msk [vmem:[%s5886_s20 + $0x98] sm:$0xff] %vm3768_vm1, %v6317_v40  ;;  %v2291_v48 = vpop.f32.mrf.mxu1  ;;  %v6328_v28 = vpop.permute.xlu2 %2004  ;;  %v3006_v32 = vsub.s32 %v6196_v6, %v3005_v42  ;;  %v2800_v61 = vadd.s32 %v2799_v4, %v2790_v2  ;;  %v3193_v36 = vshll.u32 %v3190_v15, 16  ;;  %v3195_v41 = vshll.u32 %v6374_v60, 16 }
 0x344   : > { %v2270_v35 = vpop.f32.mrf.mxu0  ;;  %v1784_v47 = vpop.permute.xlu1 %1783  ;;  %v6337_v1 = vsel %vm6319_vm15, %v2291_v48, 0.0  ;;  %v2627_v44 = vshrl.u32 %v2626_v14, 4  ;;  %v3015_v62 = vmul.u32 14564, %v3012_v13  ;;  %v3016_v50 = vmul.u32 58254, %v3012_v13 }
 0x345   : > { %v3737_v29 = vsel %vm6311_vm14, %v2270_v35, 0.0  ;;  %1861 = vst.msk [vmem:[#allocation2 + $0xf8] sm:$0xff] %vm1829_vm8, %v1784_v47  ;;  %v1989_v58 = vpop.permute.xlu0 %1988  ;;  %vm3464_vm13 = vcmp.ne.s32.totalorder %v3006_v32, 0  ;;  %vm3500_vm3 = vcmp.lt.s32.totalorder %v3006_v32, 0  ;;  %v3572_v26 = vadd.s32 18, %v3006_v32 }
 0x346   : > { %3774 = vst.msk [vmem:[%s5886_s20 + $0x28] sm:$0xff] %vm3768_vm1, %v3737_v29  ;;  %v3815_v49 = vsel %vm3768_vm1, %v3737_v29, 0.0  ;;  %v3890_v63 = vmul.f32 %v3737_v29, %v3737_v29  ;;  %vm6357_vm4 = vmand %vm3500_vm3, %vm3464_vm13  ;;  %v2801_v42 = vshrl.u32 %v2800_v61, 4  ;;  %vm3197_vm14 = vc.u32 %v3189_v10, %v3193_v36 }
 0x347   : > { %v3816_v18 = vadd.f32 %v3815_v49, %v6201_v56  ;;  %2073 = vst.msk [vmem:[#allocation2 + $0xc0] sm:$0xff] %vm2048_vm9, %v1989_v58  ;;  %v2628_v56 = vmul.u32 18, %v2627_v44  ;;  %v3199_v57 = vadd.s32 %v3193_v36, %v3189_v10  ;;  %v3013_v35 = vshrl.u32 %v6366_v24, 16 }
 0x348   : > { %v3930_v33 = vsel %vm3768_vm1, %v3890_v63, 0.0  ;;  %3781 = vst.msk [vmem:[%s5886_s20 + $0x60] sm:$0xff] %vm3768_vm1, %v6337_v1  ;;  %v2802_v47 = vmul.u32 18, %v2801_v42  ;;  %v3198_v14 = vsel %vm3197_vm14, 1, %v4605_v39  ;;  %v3194_v29 = vshrl.u32 %v3190_v15, 16 }
 0x349   : > { %v3931_v37 = vadd.f32 %v3930_v33, %v6210_v38  ;;  %v3608_v38 = vsel %vm6357_vm4, %v3572_v26, %v3006_v32  ;;  %v6371_v53 = vsub.s32 %v6226_v0, %v2628_v56  ;;  %v3200_v58 = vadd.s32 %v3198_v14, %v3192_v5 }
 0x34a   : > { %vm6383_vm5 = vcmp.lt.s32.totalorder %v3608_v38, 16  ;;  %vm3201_vm0 = vc.u32 %v3199_v57, %v3195_v41  ;;  %v6408_v16 = vmul.u32 14564, %v3013_v35  ;;  %v6411_v63 = vsub.s32 %v6290_v17, %v2802_v47 }
 0x34b   : > { %v1569_v12 = vpop.permute.xlu2 %1568  ;;  %vm3451_vm7 = vcmp.ne.s32.totalorder %v6371_v53, 0  ;;  %vm3487_vm11 = vcmp.lt.s32.totalorder %v6371_v53, 0  ;;  %v3559_v48 = vadd.s32 18, %v6371_v53  ;;  %v3202_v32 = vsel %vm3201_vm0, 1, %v4605_v39 }
 0x34c   : > { %v2273_v55 = vpop.f32.mrf.mxu0  ;;  %v1756_v46 = vpop.permute.xlu1 %1755  ;;  %1644 = vst.msk [vmem:[#allocation2 + $0x108] sm:$0xff] %vm1610_vm6, %v1569_v12  ;;  %vm6404_vm15 = vmand %vm3487_vm11, %vm3451_vm7  ;;  %v3018_v44 = vmul.u32 58254, %v3013_v35  ;;  %v3196_v34 = vshrl.u32 %v6374_v60, 16  ;;  %v3204_v33 = vadd.s32 %v3202_v32, %v3200_v58  ;;  %v3021_v26 = vshll.u32 %v6408_v16, 16 }
 0x34d   : > { %v3738_v59 = vsel %vm6339_vm2, %v2273_v55, 0.0  ;;  %1847 = vst.msk [vmem:[#allocation2 + $0x88] sm:$0xff] %vm1829_vm8, %v1756_v46  ;;  %v2003_v7 = vpop.permute.xlu0 %2002  ;;  %v3595_v17 = vsel %vm6404_vm15, %v3559_v48, %v6371_v53  ;;  %vm3457_vm2 = vcmp.ne.s32.totalorder %v6411_v63, 0  ;;  %vm3493_vm12 = vcmp.lt.s32.totalorder %v6411_v63, 0 }
 0x34e   : > { %3775 = vst.msk [vmem:[%s5886_s20 + $0x30] sm:$0xff] %vm3768_vm1, %v3738_v59  ;;  %v3817_v0 = vsel %vm3768_vm1, %v3738_v59, 0.0  ;;  %v3891_v25 = vmul.f32 %v3738_v59, %v3738_v59  ;;  %v2109_v31 = vld [vmem:[#allocation2 + $0xc0] sm:$0xff]  ;;  %v3205_v27 = vadd.s32 %v3204_v33, %v3194_v29  ;;  %v3020_v38 = vshrl.u32 %v3016_v50, 16  ;;  %vm6450_vm4 = vmand %vm3493_vm12, %vm3457_vm2 }
 0x34f   : > { %v6387_v21 = vadd.f32 %v3817_v0, %v3816_v18  ;;  %2080 = vst.msk [vmem:[#allocation2 + $0xf8] sm:$0xff] %vm2048_vm9, %v2003_v7  ;;  %4511 = vmatmul.msk.f32.gmra.mxu2 %vm2125_vm10, %v2109_v31  ;;  %v3019_v18 = vshll.u32 %v3016_v50, 16  ;;  %v6432_v15 = vadd.s32 112, %v5689_v19  ;;  %v3565_v46 = vadd.s32 18, %v6411_v63 }
 0x350   : > { %v3932_v52 = vsel %vm3768_vm1, %v3891_v25, 0.0  ;;  %2066 = vst.msk [vmem:[#allocation2 + $0x88] sm:$0xff] %vm2048_vm9, %v6239_v23  ;;  %v3206_v4 = vadd.s32 %v3205_v27, %v3196_v34  ;;  %v6441_v60 = vsel %vm3768_vm1, %v6033_v43, 0.0  ;;  %v3022_v7 = vshrl.u32 %v6408_v16, 16 }
 0x351   : > { %v6398_v11 = vadd.f32 %v3932_v52, %v3931_v37  ;;  %v6417_v37 = vadd.s32 64, %v5689_v19  ;;  %vm3023_vm13 = vc.u32 %v3015_v62, %v3019_v18  ;;  %v3025_v2 = vadd.s32 %v3019_v18, %v3015_v62 }
 0x352   : > { %v3024_v54 = vsel %vm3023_vm13, 1, %v4605_v39  ;;  %v3207_v0 = vshrl.u32 %v3206_v4, 4  ;;  %v3894_v61 = vmul.f32 %v6033_v43, %v6033_v43  ;;  %v3895_v36 = vmul.f32 %v6099_v30, %v6099_v30 }
 0x353   : > { %v2635_v9 = vand.u32 65535, %v6417_v37  ;;  %v3026_v53 = vadd.s32 %v3024_v54, %v3018_v44  ;;  %v2636_v12 = vshrl.u32 %v6417_v37, 16  ;;  %vm3027_vm3 = vc.u32 %v3025_v2, %v3021_v26 }
 0x354   : > { %v1772_v49 = vpop.permute.xlu1 %1771  ;;  %v3028_v10 = vsel %vm3027_vm3, 1, %v4605_v39  ;;  %v2809_v52 = vand.u32 65535, %v6432_v15  ;;  %v3601_v42 = vsel %vm6450_vm4, %v3565_v46, %v6411_v63  ;;  %v3208_v57 = vmul.u32 18, %v3207_v0 }
 0x355   : > { %v1553_v51 = vpop.permute.xlu0 %1552  ;;  %v2638_v13 = vmul.u32 14564, %v2635_v9  ;;  %v3030_v25 = vadd.s32 %v3028_v10, %v3026_v53  ;;  %v6456_v31 = vmul.u32 58254, %v2635_v9  ;;  %v6458_v45 = vmul.u32 14564, %v2636_v12 }
 0x356   : > { %1636 = vst.msk [vmem:[#allocation2 + $0xc8] sm:$0xff] %vm1610_vm6, %v1553_v51  ;;  %v2116_v6 = vld [vmem:[#allocation2 + $0xf8] sm:$0xff]  ;;  %v2641_v47 = vmul.u32 58254, %v2636_v12  ;;  %v2810_v62 = vshrl.u32 %v6432_v15, 16  ;;  %v6477_v50 = vmul.u32 58254, %v2809_v52  ;;  %v3209_v23 = vsub.s32 %v6344_v8, %v3208_v57 }
 0x357   : > { %1855 = vst.msk [vmem:[#allocation2 + $0xc8] sm:$0xff] %vm1829_vm8, %v1772_v49  ;;  %4518 = vmatmul.msk.f32.gmra.mxu3 %vm2125_vm10, %v2116_v6  ;;  %v2102_v56 = vld [vmem:[#allocation2 + $0x88] sm:$0xff]  ;;  %v3031_v35 = vadd.s32 %v3030_v25, %v3020_v38  ;;  %v2642_v43 = vshll.u32 %v6456_v31, 16  ;;  %v2644_v14 = vshll.u32 %v6458_v45, 16  ;;  %vm6482_vm11 = vcmp.lt.s32.totalorder %v3601_v42, 16 }
 0x358   : > { %4504 = vmatmul.msk.f32.gmra.mxu1 %vm2125_vm10, %v2102_v56  ;;  %v2315_v3 = vpop.f32.mrf.mxu2  ;;  %v2643_v49 = vshrl.u32 %v6456_v31, 16  ;;  %v2812_v32 = vmul.u32 14564, %v2809_v52  ;;  %vm3471_vm14 = vcmp.ne.s32.totalorder %v3209_v23, 0  ;;  %vm3507_vm15 = vcmp.lt.s32.totalorder %v3209_v23, 0 }
 0x359   : > { %v6436_v55 = vsel %vm6383_vm5, %v2315_v3, 0.0  ;;  %vm6464_vm5 = vcmp.lt.s32.totalorder %v3595_v17, 16  ;;  %v3032_v29 = vadd.s32 %v3031_v35, %v3022_v7  ;;  %vm2646_vm7 = vc.u32 %v2638_v13, %v2642_v43  ;;  %vm6490_vm0 = vmand %vm3507_vm15, %vm3471_vm14 }
 0x35a   : > { %3789 = vst.msk [vmem:[%s5886_s20 + $0xa0] sm:$0xff] %vm3768_vm1, %v6436_v55  ;;  %v2648_v58 = vadd.s32 %v2642_v43, %v2638_v13  ;;  %v2647_v63 = vsel %vm2646_vm7, 1, %v4605_v39  ;;  %v3579_v18 = vadd.s32 18, %v3209_v23  ;;  %v6494_v33 = vmul.u32 14564, %v2810_v62 }
 0x35b   : > { %v2649_v34 = vadd.s32 %v2647_v63, %v2641_v47  ;;  %v2816_v27 = vshll.u32 %v6477_v50, 16  ;;  %v6511_v53 = vsel %vm3768_vm1, %v3894_v61, 0.0  ;;  %v2645_v59 = vshrl.u32 %v6458_v45, 16 }
 0x35c   : > { %v1786_v5 = vpop.permute.xlu1 %1785  ;;  %vm2650_vm2 = vc.u32 %v2648_v58, %v2644_v14  ;;  %v3615_v3 = vsel %vm6490_vm0, %v3579_v18, %v3209_v23  ;;  %v2815_v0 = vmul.u32 58254, %v2810_v62  ;;  %v2818_v25 = vshll.u32 %v6494_v33, 16 }
 0x35d   : > { %v1991_v48 = vpop.permute.xlu0 %1990  ;;  %1862 = vst.msk [vmem:[#allocation2 + $0x100] sm:$0xff] %vm1829_vm8, %v1786_v5  ;;  %v2651_v38 = vsel %vm2650_vm2, 1, %v4605_v39  ;;  %v6529_v31 = vsel %vm3768_vm1, %v6099_v30, 0.0  ;;  %vm3651_vm12 = vcmp.lt.s32.totalorder %v3615_v3, 16  ;;  %vm2820_vm13 = vc.u32 %v2812_v32, %v2816_v27  ;;  %v2007_v30 = vpop.permute.xlu2 %2006 }
 0x35e   : > { %2074 = vst.msk [vmem:[#allocation2 + $0xc8] sm:$0xff] %vm2048_vm9, %v1991_v48  ;;  %v2653_v13 = vadd.s32 %v2651_v38, %v2649_v34  ;;  %v2822_v61 = vadd.s32 %v2816_v27, %v2812_v32  ;;  %v6539_v5 = vadd.s32 224, %v5689_v19  ;;  %v2821_v41 = vsel %vm2820_vm13, 1, %v4605_v39 }
 0x35f   : > { %2081 = vst.msk [vmem:[#allocation2 + $0x100] sm:$0xff] %vm2048_vm9, %v6328_v28  ;;  %v3033_v28 = vshrl.u32 %v3032_v29, 4  ;;  %v2823_v42 = vadd.s32 %v2821_v41, %v2815_v0  ;;  %v6546_v57 = vadd.s32 176, %v5689_v19  ;;  %v6555_v62 = vsel %vm3768_vm1, %v6248_v20, 0.0 }
 0x360   : > { %v2654_v45 = vadd.s32 %v2653_v13, %v2643_v49  ;;  %v3215_v47 = vand.u32 65535, %v6539_v5  ;;  %v3216_v14 = vshrl.u32 %v6539_v5, 16  ;;  %v2819_v29 = vshrl.u32 %v6494_v33, 16 }
 0x361   : > { %v2276_v44 = vpop.f32.mrf.mxu0  ;;  %v3034_v56 = vmul.u32 18, %v3033_v28  ;;  %v3041_v51 = vand.u32 65535, %v6546_v57  ;;  %v6580_v34 = vsel %vm3768_vm1, %v6337_v1, 0.0  ;;  %v3897_v33 = vmul.f32 %v6337_v1, %v6337_v1 }
 0x362   : > { %v3739_v8 = vsel %vm6464_vm5, %v2276_v44, 0.0  ;;  %v2655_v48 = vadd.s32 %v2654_v45, %v2645_v59  ;;  %vm2824_vm5 = vc.u32 %v2822_v61, %v2818_v25  ;;  %v3218_v63 = vmul.u32 14564, %v3215_v47 }
 0x363   : > { %3776 = vst.msk [vmem:[%s5886_s20 + $0x38] sm:$0xff] %vm3768_vm1, %v3739_v8  ;;  %v3819_v26 = vsel %vm3768_vm1, %v3739_v8, 0.0  ;;  %v3892_v6 = vmul.f32 %v3739_v8, %v3739_v8  ;;  %v2294_v17 = vpop.f32.mrf.mxu1  ;;  %v6518_v4 = vsub.s32 %v6366_v24, %v3034_v56  ;;  %v6532_v24 = vsel %vm3768_vm1, %v3895_v36, 0.0 }
 0x364   : > { %v6501_v54 = vadd.f32 %v3819_v26, %v6387_v21  ;;  %v6505_v2 = vsel %vm6482_vm11, %v2294_v17, 0.0  ;;  %v1774_v9 = vpop.permute.xlu1 %1773  ;;  %v2817_v36 = vshrl.u32 %v6477_v50, 16  ;;  %v2825_v43 = vsel %vm2824_vm5, 1, %v4605_v39 }
 0x365   : > { %v3934_v12 = vsel %vm3768_vm1, %v3892_v6, 0.0  ;;  %v1555_v46 = vpop.permute.xlu0 %1554  ;;  %3782 = vst.msk [vmem:[%s5886_s20 + $0x68] sm:$0xff] %vm3768_vm1, %v6505_v2  ;;  %v2110_v21 = vld [vmem:[#allocation2 + $0xc8] sm:$0xff]  ;;  %vm3465_vm3 = vcmp.ne.s32.totalorder %v6518_v4, 0  ;;  %vm3501_vm4 = vcmp.lt.s32.totalorder %v6518_v4, 0  ;;  %v2656_v23 = vshrl.u32 %v2655_v48, 4 }
 0x366   : > { %v6522_v7 = vadd.f32 %v3934_v12, %v6398_v11  ;;  %1637 = vst.msk [vmem:[#allocation2 + $0xd0] sm:$0xff] %vm1610_vm6, %v1555_v46  ;;  %4512 = vmatmul.msk.f32.gmra.mxu2 %vm2125_vm10, %v2110_v21  ;;  %v2117_v10 = vld [vmem:[#allocation2 + $0x100] sm:$0xff]  ;;  %v3896_v11 = vmul.f32 %v6248_v20, %v6248_v20  ;;  %v2827_v58 = vadd.s32 %v2825_v43, %v2823_v42  ;;  %v3573_v49 = vadd.s32 18, %v6518_v4  ;;  %vm6573_vm7 = vmand %vm3501_vm4, %vm3465_vm3 }
 0x367   : > { %1856 = vst.msk [vmem:[#allocation2 + $0xd0] sm:$0xff] %vm1829_vm8, %v1774_v9  ;;  %4519 = vmatmul.msk.f32.gmra.mxu3 %vm2125_vm10, %v2117_v10  ;;  %v3219_v32 = vmul.u32 58254, %v3215_v47  ;;  %v6563_v44 = vmul.u32 14564, %v3216_v14  ;;  %v2657_v28 = vmul.u32 18, %v2656_v23  ;;  %v3221_v27 = vmul.u32 58254, %v3216_v14 }
 0x368   : > { %v6566_v20 = vsel %vm3768_vm1, %v3896_v11, 0.0  ;;  %v2828_v8 = vadd.s32 %v2827_v58, %v2817_v36  ;;  %v3042_v9 = vshrl.u32 %v6546_v57, 16  ;;  %v3609_v3 = vsel %vm6573_vm7, %v3573_v49, %v6518_v4 }
 0x369   : > { %v3222_v26 = vshll.u32 %v3219_v32, 16  ;;  %v3224_v6 = vshll.u32 %v6563_v44, 16  ;;  %v6587_v17 = vsub.s32 %v6417_v37, %v2657_v28  ;;  %v6593_v12 = vmul.u32 58254, %v3041_v51  ;;  %v2009_v37 = vpop.permute.xlu2 %2008 }
 0x36a   : > { %v2336_v52 = vpop.f32.mrf.mxu3  ;;  %v2829_v56 = vadd.s32 %v2828_v8, %v2819_v29  ;;  %v3223_v46 = vshrl.u32 %v3219_v32, 16  ;;  %v3044_v21 = vmul.u32 14564, %v3041_v51  ;;  %v6596_v59 = vadd.s32 120, %v5689_v19 }
 0x36b   : > { %v6548_v35 = vsel %vm3651_vm12, %v2336_v52, 0.0  ;;  %vm3226_vm11 = vc.u32 %v3218_v63, %v3222_v26  ;;  %v3228_v38 = vadd.s32 %v3222_v26, %v3218_v63  ;;  %vm3452_vm14 = vcmp.ne.s32.totalorder %v6587_v17, 0 }
 0x36c   : > { %3796 = vst.msk [vmem:[%s5886_s20 + $0xd8] sm:$0xff] %vm3768_vm1, %v6548_v35  ;;  %v1788_v50 = vpop.permute.xlu1 %1787  ;;  %v2830_v1 = vshrl.u32 %v2829_v56, 4  ;;  %v3227_v10 = vsel %vm3226_vm11, 1, %v4605_v39  ;;  %v6600_v13 = vmul.u32 14564, %v3042_v9  ;;  %vm3488_vm0 = vcmp.lt.s32.totalorder %v6587_v17, 0 }
 0x36d   : > { %v1993_v16 = vpop.permute.xlu0 %1992  ;;  %1863 = vst.msk [vmem:[#allocation2 + $0x108] sm:$0xff] %vm1829_vm8, %v1788_v50  ;;  %vm3230_vm15 = vc.u32 %v3228_v38, %v3224_v6  ;;  %v3229_v25 = vadd.s32 %v3227_v10, %v3221_v27  ;;  %vm6604_vm2 = vcmp.lt.s32.totalorder %v3609_v3, 16  ;;  %v3225_v36 = vshrl.u32 %v6563_v44, 16  ;;  %vm6621_vm12 = vmand %vm3488_vm0, %vm3452_vm14 }
 0x36e   : > { %2075 = vst.msk [vmem:[#allocation2 + $0xd0] sm:$0xff] %vm2048_vm9, %v1993_v16  ;;  %v2831_v4 = vmul.u32 18, %v2830_v1  ;;  %v3231_v11 = vsel %vm3230_vm15, 1, %v4605_v39  ;;  %v3048_v41 = vshll.u32 %v6593_v12, 16  ;;  %v3050_v52 = vshll.u32 %v6600_v13, 16 }
 0x36f   : > { %2082 = vst.msk [vmem:[#allocation2 + $0x108] sm:$0xff] %vm2048_vm9, %v2007_v30  ;;  %v3560_v42 = vadd.s32 18, %v6587_v17  ;;  %v3233_v47 = vadd.s32 %v3231_v11, %v3229_v25  ;;  %v3047_v14 = vmul.u32 58254, %v3042_v9  ;;  %v2838_v29 = vand.u32 65535, %v6596_v59 }
 0x370   : > { %v2832_v43 = vsub.s32 %v6432_v15, %v2831_v4  ;;  %vm3052_vm13 = vc.u32 %v3044_v21, %v3048_v41  ;;  %v3054_v23 = vadd.s32 %v3048_v41, %v3044_v21  ;;  %v2839_v15 = vshrl.u32 %v6596_v59, 16 }
 0x371   : > { %v3234_v49 = vadd.s32 %v3233_v47, %v3223_v46  ;;  %v3053_v44 = vsel %vm3052_vm13, 1, %v4605_v39  ;;  %v6638_v18 = vadd.s32 232, %v5689_v19  ;;  %v6641_v28 = vsel %vm3768_vm1, %v3897_v33, 0.0 }
 0x372   : > { %vm3458_vm3 = vcmp.ne.s32.totalorder %v2832_v43, 0  ;;  %vm3494_vm4 = vcmp.lt.s32.totalorder %v2832_v43, 0  ;;  %v3566_v16 = vadd.s32 18, %v2832_v43  ;;  %vm3056_vm7 = vc.u32 %v3054_v23, %v3050_v52 }
 0x373   : > { %vm6632_vm5 = vmand %vm3494_vm4, %vm3458_vm3  ;;  %v3596_v8 = vsel %vm6621_vm12, %v3560_v42, %v6587_v17  ;;  %v3235_v51 = vadd.s32 %v3234_v49, %v3225_v36  ;;  %v3049_v26 = vshrl.u32 %v6593_v12, 16  ;;  %v3055_v6 = vadd.s32 %v3053_v44, %v3047_v14  ;;  %v2011_v17 = vpop.permute.xlu2 %2010 }
 0x374   : > { %v1790_v0 = vpop.permute.xlu1 %1789  ;;  %v3057_v56 = vsel %vm3056_vm7, 1, %v4605_v39  ;;  %v2841_v27 = vmul.u32 14564, %v2838_v29  ;;  %v6651_v9 = vmul.u32 58254, %v2838_v29  ;;  %v3602_v33 = vsel %vm6632_vm5, %v3566_v16, %v2832_v43 }
 0x375   : > { %v1571_v45 = vpop.permute.xlu0 %1570  ;;  %v2111_v61 = vld [vmem:[#allocation2 + $0xd0] sm:$0xff]  ;;  %v3236_v38 = vshrl.u32 %v3235_v51, 4  ;;  %v3051_v1 = vshrl.u32 %v6600_v13, 16  ;;  %v6656_v46 = vmul.u32 14564, %v2839_v15  ;;  %v2844_v10 = vmul.u32 58254, %v2839_v15 }
 0x376   : > { %1645 = vst.msk [vmem:[#allocation2 + $0x110] sm:$0xff] %vm1610_vm6, %v1571_v45  ;;  %4513 = vmatmul.msk.f32.gmra.mxu2 %vm2125_vm10, %v2111_v61  ;;  %v2118_v48 = vld [vmem:[#allocation2 + $0x108] sm:$0xff]  ;;  %v2845_v12 = vshll.u32 %v6651_v9, 16  ;;  %v3898_v4 = vmul.f32 %v6505_v2, %v6505_v2  ;;  %vm6663_vm11 = vcmp.lt.s32.totalorder %v3596_v8, 16  ;;  %vm6669_vm14 = vcmp.lt.s32.totalorder %v3602_v33, 16 }
 0x377   : > { %1864 = vst.msk [vmem:[#allocation2 + $0x110] sm:$0xff] %vm1829_vm8, %v1790_v0  ;;  %4520 = vmatmul.msk.f32.gmra.mxu3 %vm2125_vm10, %v2118_v48  ;;  %v3244_v0 = vand.u32 65535, %v6638_v18  ;;  %v3237_v13 = vmul.u32 18, %v3236_v38  ;;  %v2847_v11 = vshll.u32 %v6656_v46, 16  ;;  %v2846_v52 = vshrl.u32 %v6651_v9, 16 }
 0x378   : > { %2083 = vst.msk [vmem:[#allocation2 + $0x110] sm:$0xff] %vm2048_vm9, %v2009_v37  ;;  %v2318_v58 = vpop.f32.mrf.mxu2  ;;  %v3059_v37 = vadd.s32 %v3057_v56, %v3055_v6  ;;  %vm2849_vm15 = vc.u32 %v2841_v27, %v2845_v12  ;;  %v2851_v36 = vadd.s32 %v2845_v12, %v2841_v27  ;;  %v3245_v42 = vshrl.u32 %v6638_v18, 16 }
 0x379   : > { %v6630_v63 = vsel %vm6604_vm2, %v2318_v58, 0.0  ;;  %v3238_v41 = vsub.s32 %v6539_v5, %v3237_v13  ;;  %v2850_v48 = vsel %vm2849_vm15, 1, %v4605_v39  ;;  %v6679_v50 = vmul.u32 58254, %v3244_v0 }
 0x37a   : > { %3790 = vst.msk [vmem:[%s5886_s20 + $0xa8] sm:$0xff] %vm3768_vm1, %v6630_v63  ;;  %v3060_v30 = vadd.s32 %v3059_v37, %v3049_v26  ;;  %v2852_v14 = vadd.s32 %v2850_v48, %v2844_v10  ;;  %v2848_v8 = vshrl.u32 %v6656_v46, 16  ;;  %v6693_v26 = vmul.u32 14564, %v3245_v42 }
 0x37b   : > { %v3580_v29 = vadd.s32 18, %v3238_v41  ;;  %v3251_v38 = vshll.u32 %v6679_v50, 16  ;;  %v3946_v46 = vsel %vm3768_vm1, %v3898_v4, 0.0  ;;  %v3250_v12 = vmul.u32 58254, %v3245_v42 }
 0x37c   : > { %v1792_v3 = vpop.permute.xlu1 %1791  ;;  %v3061_v47 = vadd.s32 %v3060_v30, %v3051_v1  ;;  %v3831_v1 = vsel %vm3768_vm1, %v6505_v2, 0.0 }
 0x37d   : > { %v1573_v21 = vpop.permute.xlu0 %1572 }
 0x37e   : > { %1646 = vst.msk [vmem:[#allocation2 + $0x118] sm:$0xff] %vm1610_vm6, %v1573_v21  ;;  %vm2853_vm6 = vc.u32 %v2851_v36, %v2847_v11  ;;  %v3062_v16 = vshrl.u32 %v3061_v47, 4 }
 0x37f   : > { %1865 = vst.msk [vmem:[#allocation2 + $0x118] sm:$0xff] %vm1829_vm8, %v1792_v3  ;;  %v2119_v45 = vld [vmem:[#allocation2 + $0x110] sm:$0xff]  ;;  %vm3472_vm8 = vcmp.ne.s32.totalorder %v3238_v41, 0  ;;  %v2854_v49 = vsel %vm2853_vm6, 1, %v4605_v39 }
 0x380   : > { %2084 = vst.msk [vmem:[#allocation2 + $0x118] sm:$0xff] %vm2048_vm9, %v2011_v17  ;;  %4521 = vmatmul.msk.f32.gmra.mxu3 %vm2125_vm10, %v2119_v45  ;;  %vm3508_vm9 = vcmp.lt.s32.totalorder %v3238_v41, 0  ;;  %v2856_v51 = vadd.s32 %v2854_v49, %v2852_v14  ;;  %v3063_v9 = vmul.u32 18, %v3062_v16  ;;  %v6721_v45 = vadd.s32 184, %v5689_v19 }
 0x381   : > { %v2279_v43 = vpop.f32.mrf.mxu0  ;;  %vm6686_vm0 = vmand %vm3508_vm9, %vm3472_vm8  ;;  %v3254_v14 = vshrl.u32 %v6693_v26, 16 }
 0x382   : > { %v3740_v23 = vsel %vm6663_vm11, %v2279_v43, 0.0  ;;  %v3616_v27 = vsel %vm6686_vm0, %v3580_v29, %v3238_v41  ;;  %v3064_v17 = vsub.s32 %v6546_v57, %v3063_v9  ;;  %v2857_v37 = vadd.s32 %v2856_v51, %v2846_v52 }
 0x383   : > { %3777 = vst.msk [vmem:[%s5886_s20 + $0x40] sm:$0xff] %vm3768_vm1, %v3740_v23  ;;  %v3821_v5 = vsel %vm3768_vm1, %v3740_v23, 0.0  ;;  %v3893_v15 = vmul.f32 %v3740_v23, %v3740_v23  ;;  %vm6712_vm2 = vcmp.lt.s32.totalorder %v3616_v27, 16  ;;  %v3070_v43 = vand.u32 65535, %v6721_v45 }
 0x384   : > { %v3822_v32 = vadd.f32 %v3821_v5, %v6501_v54  ;;  %v2297_v44 = vpop.f32.mrf.mxu1  ;;  %v3247_v54 = vmul.u32 14564, %v3244_v0  ;;  %vm3466_vm12 = vcmp.ne.s32.totalorder %v3064_v17, 0  ;;  %vm3502_vm13 = vcmp.lt.s32.totalorder %v3064_v17, 0 }
 0x385   : > { %v3936_v6 = vsel %vm3768_vm1, %v3893_v15, 0.0  ;;  %v3746_v56 = vsel %vm6669_vm14, %v2297_v44, 0.0  ;;  %v2858_v2 = vadd.s32 %v2857_v37, %v2848_v8  ;;  %v3253_v0 = vshll.u32 %v6693_v26, 16 }
 0x386   : > { %v3824_v3 = vadd.f32 %v6441_v60, %v3822_v32  ;;  %v3937_v33 = vadd.f32 %v3936_v6, %v6522_v7  ;;  %3783 = vst.msk [vmem:[%s5886_s20 + $0x70] sm:$0xff] %vm3768_vm1, %v3746_v56  ;;  %vm3255_vm3 = vc.u32 %v3247_v54, %v3251_v38  ;;  %v3574_v25 = vadd.s32 18, %v3064_v17 }
 0x387   : > { %v2120_v21 = vld [vmem:[#allocation2 + $0x118] sm:$0xff]  ;;  %v2859_v13 = vshrl.u32 %v2858_v2, 4  ;;  %v3256_v11 = vsel %vm3255_vm3, 1, %v4605_v39  ;;  %v3833_v30 = vsel %vm3768_vm1, %v3746_v56, 0.0  ;;  %v3899_v41 = vmul.f32 %v3746_v56, %v3746_v56 }
 0x388   : > { %v3826_v10 = vadd.f32 %v6529_v31, %v3824_v3  ;;  %v3939_v60 = vadd.f32 %v6511_v53, %v3937_v33  ;;  %4522 = vmatmul.msk.f32.gmra.mxu3 %vm2125_vm10, %v2120_v21  ;;  %v3257_v31 = vadd.s32 %v3251_v38, %v3247_v54  ;;  %vm6732_vm10 = vmand %vm3502_vm13, %vm3466_vm12  ;;  %v3258_v48 = vadd.s32 %v3256_v11, %v3250_v12 }
 0x389   : > { %v2860_v52 = vmul.u32 18, %v2859_v13  ;;  %v3610_v47 = vsel %vm6732_vm10, %v3574_v25, %v3064_v17  ;;  %v3071_v29 = vshrl.u32 %v6721_v45, 16  ;;  %v3073_v16 = vmul.u32 14564, %v3070_v43 }
 0x38a   : > { %v3941_v57 = vadd.f32 %v6532_v24, %v3939_v60  ;;  %v3828_v4 = vadd.f32 %v6555_v62, %v3826_v10  ;;  %vm3259_vm4 = vc.u32 %v3257_v31, %v3253_v0  ;;  %v3074_v49 = vmul.u32 58254, %v3070_v43 }
 0x38b   : > { %v2339_v53 = vpop.f32.mrf.mxu3  ;;  %v3260_v23 = vsel %vm3259_vm4, 1, %v4605_v39  ;;  %v3075_v8 = vmul.u32 14564, %v3071_v29  ;;  %vm6755_vm5 = vcmp.lt.s32.totalorder %v3610_v47, 16  ;;  %v3076_v26 = vmul.u32 58254, %v3071_v29 }
 0x38c   : > { %v3830_v61 = vadd.f32 %v6580_v34, %v3828_v4  ;;  %v3943_v36 = vadd.f32 %v6566_v20, %v3941_v57  ;;  %v6728_v24 = vsel %vm6712_vm2, %v2339_v53, 0.0  ;;  %v3252_v34 = vshrl.u32 %v6679_v50, 16 }
 0x38d   : > { %3797 = vst.msk [vmem:[%s5886_s20 + $0xe0] sm:$0xff] %vm3768_vm1, %v6728_v24  ;;  %v6750_v50 = vsub.s32 %v6596_v59, %v2860_v52  ;;  %v3262_v58 = vadd.s32 %v3260_v23, %v3258_v48  ;;  %v3077_v6 = vshll.u32 %v3074_v49, 16  ;;  %v6760_v56 = vadd.s32 128, %v5689_v19 }
 0x38e   : > { %v3832_v42 = vadd.f32 %v3831_v1, %v3830_v61  ;;  %v3945_v20 = vadd.f32 %v6641_v28, %v3943_v36  ;;  %v3948_v28 = vsel %vm3768_vm1, %v3899_v41, 0.0  ;;  %v3079_v27 = vshll.u32 %v3075_v8, 16 }
 0x38f   : > { %v3263_v44 = vadd.s32 %v3262_v58, %v3252_v34  ;;  %vm3459_vm7 = vcmp.ne.s32.totalorder %v6750_v50, 0  ;;  %vm3495_vm11 = vcmp.lt.s32.totalorder %v6750_v50, 0  ;;  %vm3081_vm14 = vc.u32 %v3073_v16, %v3077_v6 }
 0x390   : > { %v6747_v5 = vadd.f32 %v3833_v30, %v3832_v42  ;;  %v3947_v15 = vadd.f32 %v3946_v46, %v3945_v20  ;;  %v3083_v9 = vadd.s32 %v3077_v6, %v3073_v16  ;;  %v2867_v3 = vand.u32 65535, %v6760_v56  ;;  %vm6777_vm6 = vmand %vm3495_vm11, %vm3459_vm7 }
 0x391   : > { %v3264_v59 = vadd.s32 %v3263_v44, %v3254_v14  ;;  %v2868_v33 = vshrl.u32 %v6760_v56, 16  ;;  %v3567_v54 = vadd.s32 18, %v6750_v50  ;;  %v3078_v1 = vshrl.u32 %v3074_v49, 16 }
 0x392   : > { %v6753_v32 = vadd.f32 %v3948_v28, %v3947_v15  ;;  %v3082_v46 = vsel %vm3081_vm14, 1, %v4605_v39  ;;  %vm3085_vm15 = vc.u32 %v3083_v9, %v3079_v27  ;;  %v2870_v17 = vmul.u32 14564, %v2867_v3 }
 0x393   : > { %v3265_v38 = vshrl.u32 %v3264_v59, 4  ;;  %v3084_v21 = vadd.s32 %v3082_v46, %v3076_v26  ;;  %v2871_v37 = vmul.u32 58254, %v2867_v3  ;;  %v3080_v7 = vshrl.u32 %v3075_v8, 16 }
 0x394   : > { %v3086_v12 = vsel %vm3085_vm15, 1, %v4605_v39  ;;  %v2872_v2 = vmul.u32 14564, %v2868_v33  ;;  %v6782_v53 = vadd.s32 240, %v5689_v19  ;;  %v2873_v13 = vmul.u32 58254, %v2868_v33 }
 0x395   : > { %v3266_v60 = vmul.u32 18, %v3265_v38  ;;  %v3088_v4 = vadd.s32 %v3086_v12, %v3084_v21  ;;  %v2874_v31 = vshll.u32 %v2871_v37, 16  ;;  %v3603_v36 = vsel %vm6777_vm6, %v3567_v54, %v6750_v50 }
 0x396   : > { %v2876_v11 = vshll.u32 %v2872_v2, 16  ;;  %v2875_v62 = vshrl.u32 %v2871_v37, 16  ;;  %v3273_v34 = vand.u32 65535, %v6782_v53  ;;  %v3274_v42 = vshrl.u32 %v6782_v53, 16 }
 0x397   : > { %v3267_v25 = vsub.s32 %v6638_v18, %v3266_v60  ;;  %v3089_v61 = vadd.s32 %v3088_v4, %v3078_v1  ;;  %vm2878_vm8 = vc.u32 %v2870_v17, %v2874_v31  ;;  %v2880_v30 = vadd.s32 %v2874_v31, %v2870_v17 }
 0x398   : > { %v2321_v10 = vpop.f32.mrf.mxu2  ;;  %v2879_v52 = vsel %vm2878_vm8, 1, %v4605_v39  ;;  %v2877_v43 = vshrl.u32 %v2872_v2, 16  ;;  %v3276_v47 = vmul.u32 14564, %v3273_v34  ;;  %v3277_v14 = vmul.u32 58254, %v3273_v34 }
 0x399   : > { %v6771_v0 = vsel %vm6755_vm5, %v2321_v10, 0.0  ;;  %vm3473_vm9 = vcmp.ne.s32.totalorder %v3267_v25, 0  ;;  %v3090_v41 = vadd.s32 %v3089_v61, %v3080_v7  ;;  %vm2882_vm0 = vc.u32 %v2880_v30, %v2876_v11 }
 0x39a   : > { %3791 = vst.msk [vmem:[%s5886_s20 + $0xb0] sm:$0xff] %vm3768_vm1, %v6771_v0  ;;  %vm3509_vm2 = vcmp.lt.s32.totalorder %v3267_v25, 0  ;;  %v2881_v48 = vadd.s32 %v2879_v52, %v2873_v13  ;;  %v2883_v18 = vsel %vm2882_vm0, 1, %v4605_v39  ;;  %v3581_v23 = vadd.s32 18, %v3267_v25 }
 0x39b   : > { %v3091_v20 = vshrl.u32 %v3090_v41, 4  ;;  %v3278_v15 = vmul.u32 14564, %v3274_v42  ;;  %v6796_v50 = vadd.s32 192, %v5689_v19  ;;  %vm6799_vm12 = vmand %vm3509_vm2, %vm3473_vm9  ;;  %v3279_v16 = vmul.u32 58254, %v3274_v42 }
 0x39c   : > { %v2885_v29 = vadd.s32 %v2883_v18, %v2881_v48  ;;  %v3280_v49 = vshll.u32 %v3277_v14, 16  ;;  %vm6803_vm13 = vcmp.lt.s32.totalorder %v3603_v36, 16  ;;  %v3617_v9 = vsel %vm6799_vm12, %v3581_v23, %v3267_v25 }
 0x39d   : > { %v3092_v28 = vmul.u32 18, %v3091_v20  ;;  %v3282_v51 = vshll.u32 %v3278_v15, 16  ;;  %v3099_v26 = vand.u32 65535, %v6796_v50  ;;  %v3100_v27 = vshrl.u32 %v6796_v50, 16 }
 0x39e   : > { %v2886_v8 = vadd.s32 %v2885_v29, %v2875_v62  ;;  %vm3284_vm3 = vc.u32 %v3276_v47, %v3280_v49  ;;  %v3286_v59 = vadd.s32 %v3280_v49, %v3276_v47  ;;  %v3281_v33 = vshrl.u32 %v3277_v14, 16 }
 0x39f   : > { %v3093_v6 = vsub.s32 %v6721_v45, %v3092_v28  ;;  %v3285_v54 = vsel %vm3284_vm3, 1, %v4605_v39  ;;  %v3103_v46 = vmul.u32 58254, %v3099_v26  ;;  %v3104_v17 = vmul.u32 14564, %v3100_v27 }
 0x3a0   : > { %v2887_v3 = vadd.s32 %v2886_v8, %v2877_v43  ;;  %v3287_v1 = vadd.s32 %v3285_v54, %v3279_v16  ;;  %vm3288_vm5 = vc.u32 %v3286_v59, %v3282_v51  ;;  %v3903_v37 = vmul.f32 %v6181_v22, %v6181_v22 }
 0x3a1   : > { %vm3467_vm10 = vcmp.ne.s32.totalorder %v3093_v6, 0  ;;  %vm3503_vm4 = vcmp.lt.s32.totalorder %v3093_v6, 0  ;;  %v3289_v10 = vsel %vm3288_vm5, 1, %v4605_v39  ;;  %v3102_v60 = vmul.u32 14564, %v3099_v26 }
 0x3a2   : > { %v2888_v21 = vshrl.u32 %v2887_v3, 4  ;;  %vm3653_vm7 = vcmp.lt.s32.totalorder %v3617_v9, 16  ;;  %v3575_v7 = vadd.s32 18, %v3093_v6  ;;  %v3291_v2 = vadd.s32 %v3289_v10, %v3287_v1  ;;  %vm6827_vm11 = vmand %vm3503_vm4, %vm3467_vm10 }
 0x3a3   : > { %v3904_v57 = vmul.f32 %v6317_v40, %v6317_v40  ;;  %v3283_v31 = vshrl.u32 %v3278_v15, 16  ;;  %v3106_v25 = vshll.u32 %v3103_v46, 16  ;;  %v3105_v61 = vmul.u32 58254, %v3100_v27 }
 0x3a4   : > { %v2889_v12 = vmul.u32 18, %v2888_v21  ;;  %v3292_v11 = vadd.s32 %v3291_v2, %v3281_v33  ;;  %v3108_v30 = vshll.u32 %v3104_v17, 16  ;;  %v6832_v36 = vadd.s32 136, %v5689_v19 }
 0x3a5   : > { %v2300_v38 = vpop.f32.mrf.mxu1  ;;  %v6836_v62 = vsel %vm3768_vm1, %v6181_v22, 0.0  ;;  %vm3110_vm14 = vc.u32 %v3102_v60, %v3106_v25  ;;  %v3112_v52 = vadd.s32 %v3106_v25, %v3102_v60  ;;  %v6841_v34 = vsel %vm3768_vm1, %v3903_v37, 0.0 }
 0x3a6   : > { %v6815_v45 = vsel %vm6803_vm13, %v2300_v38, 0.0  ;;  %v6845_v48 = vsel %vm3768_vm1, %v6317_v40, 0.0  ;;  %v3611_v18 = vsel %vm6827_vm11, %v3575_v7, %v3093_v6  ;;  %v6853_v22 = vsub.s32 %v6760_v56, %v2889_v12 }
 0x3a7   : > { %3784 = vst.msk [vmem:[%s5886_s20 + $0x78] sm:$0xff] %vm3768_vm1, %v6815_v45  ;;  %v6856_v42 = vsel %vm3768_vm1, %v3904_v57, 0.0  ;;  %v3293_v20 = vadd.s32 %v3292_v11, %v3283_v31  ;;  %v3111_v43 = vsel %vm3110_vm14, 1, %v4605_v39  ;;  %vm3114_vm15 = vc.u32 %v3112_v52, %v3108_v30 }
 0x3a8   : > { %v3107_v47 = vshrl.u32 %v3103_v46, 16  ;;  %v3113_v14 = vadd.s32 %v3111_v43, %v3105_v61  ;;  %v3115_v40 = vsel %vm3114_vm15, 1, %v4605_v39  ;;  %v2896_v23 = vand.u32 65535, %v6832_v36 }
 0x3a9   : > { %vm6861_vm6 = vcmp.lt.s32.totalorder %v3611_v18, 16  ;;  %v3294_v15 = vshrl.u32 %v3293_v20, 4  ;;  %v3109_v56 = vshrl.u32 %v3104_v17, 16  ;;  %v2897_v58 = vshrl.u32 %v6832_v36, 16 }
 0x3aa   : > { %v2342_v13 = vpop.f32.mrf.mxu3  ;;  %v6867_v28 = vadd.s32 248, %v5689_v19  ;;  %vm3460_vm8 = vcmp.ne.s32.totalorder %v6853_v22, 0  ;;  %v3117_v16 = vadd.s32 %v3115_v40, %v3113_v14  ;;  %v2899_v49 = vmul.u32 14564, %v2896_v23 }
 0x3ab   : > { %v6838_v41 = vsel %vm3653_vm7, %v2342_v13, 0.0  ;;  %v2900_v44 = vmul.u32 58254, %v2896_v23  ;;  %vm3496_vm9 = vcmp.lt.s32.totalorder %v6853_v22, 0  ;;  %v3295_v8 = vmul.u32 18, %v3294_v15 }
 0x3ac   : > { %3798 = vst.msk [vmem:[%s5886_s20 + $0xe8] sm:$0xff] %vm3768_vm1, %v6838_v41  ;;  %v2901_v51 = vmul.u32 14564, %v2897_v58  ;;  %v3302_v26 = vand.u32 65535, %v6867_v28  ;;  %v3118_v6 = vadd.s32 %v3117_v16, %v3107_v47  ;;  %v2902_v59 = vmul.u32 58254, %v2897_v58  ;;  %vm6877_vm0 = vmand %vm3496_vm9, %vm3460_vm8 }
 0x3ad   : > { %v2903_v27 = vshll.u32 %v2900_v44, 16  ;;  %v3303_v9 = vshrl.u32 %v6867_v28, 16  ;;  %v3568_v3 = vadd.s32 18, %v6853_v22  ;;  %v3296_v33 = vsub.s32 %v6782_v53, %v3295_v8 }
 0x3ae   : > { %v2904_v54 = vshrl.u32 %v2900_v44, 16  ;;  %v2905_v38 = vshll.u32 %v2901_v51, 16  ;;  %v3119_v46 = vadd.s32 %v3118_v6, %v3109_v56  ;;  %v3306_v17 = vmul.u32 58254, %v3302_v26 }
 0x3af   : > { %vm2907_vm2 = vc.u32 %v2899_v49, %v2903_v27  ;;  %v2909_v21 = vadd.s32 %v2903_v27, %v2899_v49  ;;  %vm3474_vm12 = vcmp.ne.s32.totalorder %v3296_v33, 0  ;;  %vm3510_vm13 = vcmp.lt.s32.totalorder %v3296_v33, 0 }
 0x3b0   : > { %v2908_v37 = vsel %vm2907_vm2, 1, %v4605_v39  ;;  %v3305_v10 = vmul.u32 14564, %v3302_v26  ;;  %v3120_v60 = vshrl.u32 %v3119_v46, 4  ;;  %v3307_v53 = vmul.u32 14564, %v3303_v9  ;;  %vm6890_vm10 = vmand %vm3510_vm13, %vm3474_vm12 }
 0x3b1   : > { %v2910_v7 = vadd.s32 %v2908_v37, %v2902_v59  ;;  %vm2911_vm3 = vc.u32 %v2909_v21, %v2905_v38  ;;  %v3604_v12 = vsel %vm6877_vm0, %v3568_v3, %v6853_v22  ;;  %v3308_v57 = vmul.u32 58254, %v3303_v9 }
 0x3b2   : > { %v2912_v2 = vsel %vm2911_vm3, 1, %v4605_v39  ;;  %v3309_v4 = vshll.u32 %v3306_v17, 16  ;;  %v3582_v31 = vadd.s32 18, %v3296_v33  ;;  %v3121_v25 = vmul.u32 18, %v3120_v60 }
 0x3b3   : > { %v2906_v13 = vshrl.u32 %v2901_v51, 16  ;;  %v2914_v11 = vadd.s32 %v2912_v2, %v2910_v7  ;;  %v3905_v61 = vmul.f32 %v6436_v55, %v6436_v55  ;;  %v3311_v18 = vshll.u32 %v3307_v53, 16 }
 0x3b4   : > { %vm3313_vm4 = vc.u32 %v3305_v10, %v3309_v4  ;;  %v3315_v22 = vadd.s32 %v3309_v4, %v3305_v10  ;;  %v6899_v43 = vsub.s32 %v6796_v50, %v3121_v25  ;;  %v3906_v40 = vmul.f32 %v6630_v63, %v6630_v63 }
 0x3b5   : > { %v2915_v47 = vadd.s32 %v2914_v11, %v2904_v54  ;;  %v3314_v14 = vsel %vm3313_vm4, 1, %v4605_v39  ;;  %vm3640_vm5 = vcmp.lt.s32.totalorder %v3604_v12, 16  ;;  %v3835_v29 = vsel %vm3768_vm1, %v6815_v45, 0.0 }
 0x3b6   : > { %v3316_v23 = vadd.s32 %v3314_v14, %v3308_v57  ;;  %vm3317_vm7 = vc.u32 %v3315_v22, %v3311_v18  ;;  %v3618_v50 = vsel %vm6890_vm10, %v3582_v31, %v3296_v33  ;;  %v3310_v56 = vshrl.u32 %v3306_v17, 16 }
 0x3b7   : > { %v2916_v15 = vadd.s32 %v2915_v47, %v2906_v13  ;;  %vm3468_vm11 = vcmp.ne.s32.totalorder %v6899_v43, 0  ;;  %v3312_v16 = vshrl.u32 %v3307_v53, 16  ;;  %v3318_v49 = vsel %vm3317_vm7, 1, %v4605_v39 }
 0x3b8   : > { %v6914_v44 = vadd.s32 200, %v5689_v19  ;;  %vm3504_vm14 = vcmp.lt.s32.totalorder %v6899_v43, 0  ;;  %v3320_v26 = vadd.s32 %v3318_v49, %v3316_v23  ;;  %v3900_v6 = vmul.f32 %v6815_v45, %v6815_v45 }
 0x3b9   : > { %v2324_v30 = vpop.f32.mrf.mxu2  ;;  %v2917_v51 = vshrl.u32 %v2916_v15, 4  ;;  %vm6924_vm15 = vcmp.lt.s32.totalorder %v3618_v50, 16  ;;  %v3576_v27 = vadd.s32 18, %v6899_v43  ;;  %v6932_v38 = vadd.s32 256, %v5689_v19 }
 0x3ba   : > { %v6896_v20 = vsel %vm6861_vm6, %v2324_v30, 0.0  ;;  %v3128_v9 = vand.u32 65535, %v6914_v44  ;;  %v3321_v33 = vadd.s32 %v3320_v26, %v3310_v56  ;;  %v3129_v54 = vshrl.u32 %v6914_v44, 16  ;;  %vm6949_vm6 = vmand %vm3504_vm14, %vm3468_vm11 }
 0x3bb   : > { %3792 = vst.msk [vmem:[%s5886_s20 + $0xb8] sm:$0xff] %vm3768_vm1, %v6896_v20  ;;  %v2918_v3 = vmul.u32 18, %v2917_v51  ;;  %v6936_v45 = vsel %vm3768_vm1, %v6436_v55, 0.0  ;;  %v6939_v1 = vsel %vm3768_vm1, %v3905_v61, 0.0  ;;  %v6943_v46 = vsel %vm3768_vm1, %v6630_v63, 0.0 }
 0x3bc   : > { %v3132_v17 = vmul.u32 58254, %v3128_v9  ;;  %v3322_v10 = vadd.s32 %v3321_v33, %v3312_v16  ;;  %v3131_v60 = vmul.u32 14564, %v3128_v9  ;;  %v3133_v7 = vmul.u32 14564, %v3129_v54 }
 0x3bd   : > { %v2303_v58 = vpop.f32.mrf.mxu1  ;;  %v6954_v55 = vsub.s32 %v6832_v36, %v2918_v3  ;;  %v6957_v53 = vsel %vm3768_vm1, %v3906_v40, 0.0  ;;  %v6960_v63 = vadd.f32 %v3835_v29, %v6747_v5  ;;  %v3950_v57 = vsel %vm3768_vm1, %v3900_v6, 0.0 }
 0x3be   : > { %v6916_v8 = vsel %vm3640_vm5, %v2303_v58, 0.0  ;;  %v3135_v2 = vshll.u32 %v3132_v17, 16  ;;  %v3612_v36 = vsel %vm6949_vm6, %v3576_v27, %v6899_v43  ;;  %v3134_v4 = vmul.u32 58254, %v3129_v54 }
 0x3bf   : > { %3785 = vst.msk [vmem:[%s5886_s20 + $0x80] sm:$0xff] %vm3768_vm1, %v6916_v8  ;;  %v3331_v31 = vand.u32 65535, %v6932_v38  ;;  %vm3461_vm8 = vcmp.ne.s32.totalorder %v6954_v55, 0  ;;  %vm3497_vm9 = vcmp.lt.s32.totalorder %v6954_v55, 0  ;;  %v3323_v5 = vshrl.u32 %v3322_v10, 4 }
 0x3c0   : > { %v3137_v25 = vshll.u32 %v3133_v7, 16  ;;  %v3901_v13 = vmul.f32 %v6916_v8, %v6916_v8  ;;  %vm3139_vm0 = vc.u32 %v3131_v60, %v3135_v2  ;;  %v3141_v11 = vadd.s32 %v3135_v2, %v3131_v60  ;;  %vm6981_vm2 = vmand %vm3497_vm9, %vm3461_vm8 }
 0x3c1   : > { %v3332_v61 = vshrl.u32 %v6932_v38, 16  ;;  %v3569_v30 = vadd.s32 18, %v6954_v55  ;;  %v3324_v52 = vmul.u32 18, %v3323_v5  ;;  %v3136_v18 = vshrl.u32 %v3132_v17, 16 }
 0x3c2   : > { %v2345_v37 = vpop.f32.mrf.mxu3  ;;  %v3140_v22 = vsel %vm3139_vm0, 1, %v4605_v39  ;;  %vm3143_vm12 = vc.u32 %v3141_v11, %v3137_v25  ;;  %v3334_v14 = vmul.u32 14564, %v3331_v31  ;;  %v3335_v40 = vmul.u32 58254, %v3331_v31 }
 0x3c3   : > { %v6964_v12 = vsel %vm6924_vm15, %v2345_v37, 0.0  ;;  %v3142_v47 = vadd.s32 %v3140_v22, %v3134_v4  ;;  %v3325_v23 = vsub.s32 %v6867_v28, %v3324_v52  ;;  %v3138_v29 = vshrl.u32 %v3133_v7, 16 }
 0x3c4   : > { %3799 = vst.msk [vmem:[%s5886_s20 + $0xf0] sm:$0xff] %vm3768_vm1, %v6964_v12  ;;  %v3144_v50 = vsel %vm3143_vm12, 1, %v4605_v39  ;;  %v3336_v15 = vmul.u32 14564, %v3332_v61  ;;  %v3337_v58 = vmul.u32 58254, %v3332_v61  ;;  %v3338_v16 = vshll.u32 %v3335_v40, 16 }
 0x3c5   : > { %v3146_v56 = vadd.s32 %v3144_v50, %v3142_v47  ;;  %v6988_v49 = vadd.s32 208, %v5689_v19  ;;  %vm6990_vm13 = vcmp.lt.s32.totalorder %v3612_v36, 16  ;;  %v3605_v26 = vsel %vm6981_vm2, %v3569_v30, %v6954_v55 }
 0x3c6   : > { %vm3475_vm3 = vcmp.ne.s32.totalorder %v3325_v23, 0  ;;  %v3340_v28 = vshll.u32 %v3336_v15, 16  ;;  %vm3511_vm10 = vcmp.lt.s32.totalorder %v3325_v23, 0  ;;  %vm3342_vm4 = vc.u32 %v3334_v14, %v3338_v16 }
 0x3c7   : > { %v3147_v6 = vadd.s32 %v3146_v56, %v3136_v18  ;;  %v3344_v59 = vadd.s32 %v3338_v16, %v3334_v14  ;;  %v3339_v27 = vshrl.u32 %v3335_v40, 16  ;;  %v3343_v9 = vsel %vm3342_vm4, 1, %v4605_v39  ;;  %vm7000_vm7 = vmand %vm3511_vm10, %vm3475_vm3 }
 0x3c8   : > { %v3157_v3 = vand.u32 65535, %v6988_v49  ;;  %v3158_v33 = vshrl.u32 %v6988_v49, 16  ;;  %v3583_v54 = vadd.s32 18, %v3325_v23  ;;  %v3345_v17 = vadd.s32 %v3343_v9, %v3337_v58 }
 0x3c9   : > { %v3148_v21 = vadd.s32 %v3147_v6, %v3138_v29  ;;  %vm3346_vm5 = vc.u32 %v3344_v59, %v3340_v28  ;;  %v3341_v36 = vshrl.u32 %v3336_v15, 16  ;;  %v7010_v31 = vadd.s32 264, %v5689_v19 }
 0x3ca   : > { %v3347_v55 = vsel %vm3346_vm5, 1, %v4605_v39  ;;  %v3160_v10 = vmul.u32 14564, %v3157_v3  ;;  %v7005_v60 = vmul.u32 58254, %v3157_v3  ;;  %v7007_v7 = vmul.u32 14564, %v3158_v33 }
 0x3cb   : > { %v3149_v2 = vshrl.u32 %v3148_v21, 4  ;;  %v3349_v4 = vadd.s32 %v3347_v55, %v3345_v17  ;;  %v3951_v5 = vadd.f32 %v3950_v57, %v6753_v32  ;;  %v3837_v25 = vsel %vm3768_vm1, %v6916_v8, 0.0 }
 0x3cc   : > { %v3164_v11 = vshll.u32 %v7005_v60, 16  ;;  %v3166_v61 = vshll.u32 %v7007_v7, 16  ;;  %v3952_v30 = vsel %vm3768_vm1, %v3901_v13, 0.0  ;;  %vm7018_vm11 = vcmp.lt.s32.totalorder %v3605_v26, 16 }
 0x3cd   : > { %v3619_v22 = vsel %vm7000_vm7, %v3583_v54, %v3325_v23  ;;  %v3350_v43 = vadd.s32 %v3349_v4, %v3339_v27  ;;  %v3360_v57 = vand.u32 65535, %v7010_v31  ;;  %v3907_v13 = vmul.f32 %v6771_v0, %v6771_v0 }
 0x3ce   : > { %vm3168_vm14 = vc.u32 %v3160_v10, %v3164_v11  ;;  %v3170_v8 = vadd.s32 %v3164_v11, %v3160_v10  ;;  %v3150_v47 = vmul.u32 18, %v3149_v2  ;;  %v3163_v40 = vmul.u32 58254, %v3158_v33 }
 0x3cf   : > { %v3351_v14 = vadd.s32 %v3350_v43, %v3341_v36  ;;  %v3838_v23 = vadd.f32 %v3837_v25, %v6960_v63  ;;  %v3953_v29 = vadd.f32 %v3952_v30, %v3951_v5  ;;  %v3169_v15 = vsel %vm3168_vm14, 1, %v4605_v39 }
 0x3d0   : > { %vm3172_vm15 = vc.u32 %v3170_v8, %v3166_v61  ;;  %vm7038_vm6 = vcmp.lt.s32.totalorder %v3619_v22, 16  ;;  %v3165_v16 = vshrl.u32 %v7005_v60, 16  ;;  %v3361_v51 = vshrl.u32 %v7010_v31, 16 }
 0x3d1   : > { %v3352_v28 = vshrl.u32 %v3351_v14, 4  ;;  %v7047_v6 = vmul.u32 58254, %v3360_v57  ;;  %v3151_v27 = vsub.s32 %v6914_v44, %v3150_v47  ;;  %v3171_v9 = vadd.s32 %v3169_v15, %v3163_v40 }
 0x3d2   : > { %v2327_v52 = vpop.f32.mrf.mxu2  ;;  %v3173_v3 = vsel %vm3172_vm15, 1, %v4605_v39  ;;  %v3167_v21 = vshrl.u32 %v7007_v7, 16  ;;  %v7054_v17 = vadd.s32 272, %v5689_v19  ;;  %v3363_v2 = vmul.u32 14564, %v3360_v57 }
 0x3d3   : > { %v7026_v32 = vsel %vm6990_vm13, %v2327_v52, 0.0  ;;  %v3353_v54 = vmul.u32 18, %v3352_v28  ;;  %v3175_v60 = vadd.s32 %v3173_v3, %v3171_v9  ;;  %v3365_v4 = vmul.u32 14564, %v3361_v51 }
 0x3d4   : > { %3793 = vst.msk [vmem:[%s5886_s20 + $0xc0] sm:$0xff] %vm3768_vm1, %v7026_v32  ;;  %v3367_v5 = vshll.u32 %v7047_v6, 16  ;;  %vm3469_vm8 = vcmp.ne.s32.totalorder %v3151_v27, 0  ;;  %vm3505_vm9 = vcmp.lt.s32.totalorder %v3151_v27, 0  ;;  %v3366_v11 = vmul.u32 58254, %v3361_v51 }
 0x3d5   : > { %v2306_v50 = vpop.f32.mrf.mxu1  ;;  %v3354_v36 = vsub.s32 %v6932_v38, %v3353_v54  ;;  %v3849_v61 = vsel %vm3768_vm1, %v6771_v0, 0.0  ;;  %v3577_v52 = vadd.s32 18, %v3151_v27  ;;  %vm7072_vm12 = vmand %vm3505_vm9, %vm3469_vm8  ;;  %v3369_v22 = vshll.u32 %v3365_v4, 16 }
 0x3d6   : > { %v3749_v56 = vsel %vm7018_vm11, %v2306_v50, 0.0  ;;  %vm3371_vm13 = vc.u32 %v3363_v2, %v3367_v5  ;;  %v3964_v43 = vsel %vm3768_vm1, %v3907_v13, 0.0  ;;  %v3373_v47 = vadd.s32 %v3367_v5, %v3363_v2 }
 0x3d7   : > { %3786 = vst.msk [vmem:[%s5886_s20 + $0x88] sm:$0xff] %vm3768_vm1, %v3749_v56  ;;  %v3839_v63 = vsel %vm3768_vm1, %v3749_v56, 0.0  ;;  %v3902_v26 = vmul.f32 %v3749_v56, %v3749_v56  ;;  %vm3476_vm0 = vcmp.ne.s32.totalorder %v3354_v36, 0  ;;  %vm3512_vm2 = vcmp.lt.s32.totalorder %v3354_v36, 0 }
 0x3d8   : > { %v3840_v59 = vadd.f32 %v3839_v63, %v3838_v23  ;;  %vm7081_vm3 = vmand %vm3512_vm2, %vm3476_vm0  ;;  %v3389_v40 = vand.u32 65535, %v7054_v17  ;;  %v3613_v13 = vsel %vm7072_vm12, %v3577_v52, %v3151_v27  ;;  %v3368_v50 = vshrl.u32 %v7047_v6, 16 }
 0x3d9   : > { %v3954_v33 = vsel %vm3768_vm1, %v3902_v26, 0.0  ;;  %vm3375_vm10 = vc.u32 %v3373_v47, %v3369_v22  ;;  %v3370_v26 = vshrl.u32 %v3365_v4, 16  ;;  %v7098_v9 = vadd.s32 280, %v5689_v19 }
 0x3da   : > { %v3842_v37 = vadd.f32 %v6836_v62, %v3840_v59  ;;  %v3955_v55 = vadd.f32 %v3954_v33, %v3953_v29  ;;  %v2348_v10 = vpop.f32.mrf.mxu3  ;;  %v3176_v62 = vadd.s32 %v3175_v60, %v3165_v16  ;;  %v3393_v15 = vmul.u32 58254, %v3389_v40 }
 0x3db   : > { %v7059_v44 = vsel %vm7038_vm6, %v2348_v10, 0.0  ;;  %v3376_v58 = vsel %vm3375_vm10, 1, %v4605_v39  ;;  %v3392_v16 = vmul.u32 14564, %v3389_v40  ;;  %vm3649_vm4 = vcmp.lt.s32.totalorder %v3613_v13, 16 }
 0x3dc   : > { %v3844_v7 = vadd.f32 %v6845_v48, %v3842_v37  ;;  %v3957_v25 = vadd.f32 %v6841_v34, %v3955_v55  ;;  %3800 = vst.msk [vmem:[%s5886_s20 + $0xf8] sm:$0xff] %vm3768_vm1, %v7059_v44  ;;  %v3584_v34 = vadd.s32 18, %v3354_v36  ;;  %v3177_v18 = vadd.s32 %v3176_v62, %v3167_v21 }
 0x3dd   : > { %v3396_v59 = vshll.u32 %v3393_v15, 16  ;;  %v3418_v2 = vand.u32 65535, %v7098_v9  ;;  %v3397_v5 = vshrl.u32 %v3393_v15, 16  ;;  %v3851_v52 = vsel %vm3768_vm1, %v6896_v20, 0.0 }
 0x3de   : > { %v3846_v38 = vadd.f32 %v6936_v45, %v3844_v7  ;;  %v3959_v30 = vadd.f32 %v6856_v42, %v3957_v25  ;;  %v3372_v42 = vsel %vm3371_vm13, 1, %v4605_v39  ;;  %v3178_v45 = vshrl.u32 %v3177_v18, 4 }
 0x3df   : > { %v3374_v14 = vadd.s32 %v3372_v42, %v3366_v11  ;;  %v3620_v29 = vsel %vm7081_vm3, %v3584_v34, %v3354_v36  ;;  %vm3400_vm7 = vc.u32 %v3392_v16, %v3396_v59  ;;  %v3402_v6 = vadd.s32 %v3396_v59, %v3392_v16 }
 0x3e0   : > { %v3961_v8 = vadd.f32 %v6939_v1, %v3959_v30  ;;  %v3848_v57 = vadd.f32 %v6943_v46, %v3846_v38  ;;  %v3390_v46 = vshrl.u32 %v7054_v17, 16  ;;  %v3179_v63 = vmul.u32 18, %v3178_v45 }
 0x3e1   : > { %v3378_v28 = vadd.s32 %v3376_v58, %v3374_v14  ;;  %vm3656_vm5 = vcmp.lt.s32.totalorder %v3620_v29, 16  ;;  %v3401_v37 = vsel %vm3400_vm7, 1, %v4605_v39  ;;  %v3908_v7 = vmul.f32 %v6896_v20, %v6896_v20 }
 0x3e2   : > { %v7089_v23 = vadd.f32 %v3849_v61, %v3848_v57  ;;  %v3963_v1 = vadd.f32 %v6957_v53, %v3961_v8  ;;  %v3394_v51 = vmul.u32 14564, %v3390_v46  ;;  %v3395_v27 = vmul.u32 58254, %v3390_v46 }
 0x3e3   : > { %v3379_v3 = vadd.s32 %v3378_v28, %v3368_v50  ;;  %v3180_v54 = vsub.s32 %v6988_v49, %v3179_v63  ;;  %v3419_v61 = vshrl.u32 %v7098_v9, 16  ;;  %v3421_v38 = vmul.u32 14564, %v3418_v2 }
 0x3e4   : > { %v3965_v56 = vadd.f32 %v3964_v43, %v3963_v1  ;;  %v3398_v53 = vshll.u32 %v3394_v51, 16  ;;  %v3403_v60 = vadd.s32 %v3401_v37, %v3395_v27  ;;  %v3399_v62 = vshrl.u32 %v3394_v51, 16 }
 0x3e5   : > { %v3380_v21 = vadd.s32 %v3379_v3, %v3370_v26  ;;  %vm3470_vm14 = vcmp.ne.s32.totalorder %v3180_v54, 0  ;;  %vm3506_vm15 = vcmp.lt.s32.totalorder %v3180_v54, 0  ;;  %v3422_v30 = vmul.u32 58254, %v3418_v2 }
 0x3e6   : > { %vm3404_vm11 = vc.u32 %v3402_v6, %v3398_v53  ;;  %v3423_v18 = vmul.u32 14564, %v3419_v61  ;;  %v3966_v22 = vsel %vm3768_vm1, %v3908_v7, 0.0  ;;  %v3578_v43 = vadd.s32 18, %v3180_v54  ;;  %vm7118_vm6 = vmand %vm3506_vm15, %vm3470_vm14 }
 0x3e7   : > { %v3381_v4 = vshrl.u32 %v3380_v21, 4  ;;  %v3405_v49 = vsel %vm3404_vm11, 1, %v4605_v39  ;;  %v3424_v8 = vmul.u32 58254, %v3419_v61  ;;  %v3425_v57 = vshll.u32 %v3422_v30, 16 }
 0x3e8   : > { %v3407_v11 = vadd.s32 %v3405_v49, %v3403_v60  ;;  %v3909_v20 = vmul.f32 %v7026_v32, %v7026_v32  ;;  %v3427_v47 = vshll.u32 %v3423_v18, 16  ;;  %v3852_v40 = vadd.f32 %v3851_v52, %v7089_v23 }
 0x3e9   : > { %v2330_v33 = vpop.f32.mrf.mxu2  ;;  %v3382_v25 = vmul.u32 18, %v3381_v4  ;;  %vm3429_vm2 = vc.u32 %v3421_v38, %v3425_v57  ;;  %v3431_v14 = vadd.s32 %v3425_v57, %v3421_v38  ;;  %v3967_v13 = vadd.f32 %v3966_v22, %v3965_v56 }
 0x3ea   : > { %v3757_v55 = vsel %vm3649_vm4, %v2330_v33, 0.0  ;;  %v2351_v10 = vpop.f32.mrf.mxu3  ;;  %v3408_v34 = vadd.s32 %v3407_v11, %v3397_v5  ;;  %v3430_v46 = vsel %vm3429_vm2, 1, %v4605_v39  ;;  %v3614_v29 = vsel %vm7118_vm6, %v3578_v43, %v3180_v54 }
 0x3eb   : > { %3794 = vst.msk [vmem:[%s5886_s20 + $0xc8] sm:$0xff] %vm3768_vm1, %v3757_v55  ;;  %v7105_v36 = vsel %vm3656_vm5, %v2351_v10, 0.0  ;;  %v3383_v48 = vsub.s32 %v7010_v31, %v3382_v25  ;;  %v3426_v50 = vshrl.u32 %v3422_v30, 16  ;;  %v3432_v15 = vadd.s32 %v3430_v46, %v3424_v8 }
 0x3ec   : > { %3801 = vst.msk [vmem:[%s5886_s20 + $0x100] sm:$0xff] %vm3768_vm1, %v7105_v36  ;;  %v3409_v45 = vadd.s32 %v3408_v34, %v3399_v62  ;;  %vm3433_vm12 = vc.u32 %v3431_v14, %v3427_v47  ;;  %v3910_v58 = vmul.f32 %v3757_v55, %v3757_v55  ;;  %v3428_v26 = vshrl.u32 %v3423_v18, 16 }
 0x3ed   : > { %vm3477_vm8 = vcmp.ne.s32.totalorder %v3383_v48, 0  ;;  %vm3513_vm9 = vcmp.lt.s32.totalorder %v3383_v48, 0  ;;  %v3585_v42 = vadd.s32 18, %v3383_v48  ;;  %v3434_v63 = vsel %vm3433_vm12, 1, %v4605_v39 }
 0x3ee   : > { %vm7124_vm0 = vmand %vm3513_vm9, %vm3477_vm8  ;;  %v3410_v1 = vshrl.u32 %v3409_v45, 4  ;;  %v3436_v28 = vadd.s32 %v3434_v63, %v3432_v15  ;;  %v3853_v23 = vsel %vm3768_vm1, %v7026_v32, 0.0  ;;  %v3855_v56 = vsel %vm3768_vm1, %v3757_v55, 0.0 }
 0x3ef   : > { %v3621_v16 = vsel %vm7124_vm0, %v3585_v42, %v3383_v48  ;;  %vm3650_vm13 = vcmp.lt.s32.totalorder %v3614_v29, 16  ;;  %v3968_v27 = vsel %vm3768_vm1, %v3909_v20, 0.0  ;;  %v3854_v53 = vadd.f32 %v3853_v23, %v3852_v40 }
 0x3f0   : > { %v3411_v51 = vmul.u32 18, %v3410_v1  ;;  %vm7140_vm3 = vcmp.lt.s32.totalorder %v3621_v16, 16  ;;  %v3437_v6 = vadd.s32 %v3436_v28, %v3426_v50  ;;  %v3969_v39 = vadd.f32 %v3968_v27, %v3967_v13 }
 0x3f1   : > { %v3970_v33 = vsel %vm3768_vm1, %v3910_v58, 0.0  ;;  %v3856_v32 = vadd.f32 %v3855_v56, %v3854_v53  ;;  %v3912_v10 = vmul.f32 %v6548_v35, %v6548_v35  ;;  %v3913_v7 = vmul.f32 %v6728_v24, %v6728_v24 }
 0x3f2   : > { %v3412_v59 = vsub.s32 %v7054_v17, %v3411_v51  ;;  %v3438_v55 = vadd.s32 %v3437_v6, %v3428_v26  ;;  %v3971_v49 = vadd.f32 %v3970_v33, %v3969_v39  ;;  %v3859_v62 = vsel %vm3768_vm1, %v6548_v35, 0.0 }
 0x3f3   : > { %v3914_v38 = vmul.f32 %v6838_v41, %v6838_v41  ;;  %v3974_v34 = vsel %vm3768_vm1, %v3912_v10, 0.0  ;;  %v3861_v18 = vsel %vm3768_vm1, %v6728_v24, 0.0  ;;  %v3976_v43 = vsel %vm3768_vm1, %v3913_v7, 0.0 }
 0x3f4   : > { %vm3478_vm10 = vcmp.ne.s32.totalorder %v3412_v59, 0  ;;  %vm3514_vm4 = vcmp.lt.s32.totalorder %v3412_v59, 0  ;;  %v3586_v17 = vadd.s32 18, %v3412_v59  ;;  %v3439_v61 = vshrl.u32 %v3438_v55, 4 }
 0x3f5   : > { %vm7152_vm5 = vmand %vm3514_vm4, %vm3478_vm10  ;;  %v3863_v57 = vsel %vm3768_vm1, %v6838_v41, 0.0  ;;  %v3915_v0 = vmul.f32 %v6964_v12, %v6964_v12  ;;  %v3978_v45 = vsel %vm3768_vm1, %v3914_v38, 0.0  ;;  %v3865_v24 = vsel %vm3768_vm1, %v6964_v12, 0.0 }
 0x3f6   : > { %v3622_v48 = vsel %vm7152_vm5, %v3586_v17, %v3412_v59  ;;  %v3440_v22 = vmul.u32 18, %v3439_v61  ;;  %v3916_v47 = vmul.f32 %v7059_v44, %v7059_v44  ;;  %v3867_v12 = vsel %vm3768_vm1, %v7059_v44, 0.0 }
 0x3f7   : > { %vm3658_vm7 = vcmp.lt.s32.totalorder %v3622_v48, 16  ;;  %v3980_v46 = vsel %vm3768_vm1, %v3915_v0, 0.0  ;;  %v3917_v29 = vmul.f32 %v7105_v36, %v7105_v36  ;;  %v3869_v51 = vsel %vm3768_vm1, %v7105_v36, 0.0 }
 0x3f8   : > { %v3441_v42 = vsub.s32 %v7098_v9, %v3440_v22  ;;  %v3982_v16 = vsel %vm3768_vm1, %v3916_v47, 0.0  ;;  %vm3805_vm8 = vcmp.eq.s32.totalorder %v5689_v19, 0 }
 0x3f9   : > { %v2333_v54 = vpop.f32.mrf.mxu2  ;;  %v3984_v44 = vsel %vm3768_vm1, %v3917_v29, 0.0 }
 0x3fa   : > { %v3758_v21 = vsel %vm3650_vm13, %v2333_v54, 0.0  ;;  %v2354_v37 = vpop.f32.mrf.mxu3  ;;  %vm3479_vm11 = vcmp.ne.s32.totalorder %v3441_v42, 0  ;;  %vm3515_vm14 = vcmp.lt.s32.totalorder %v3441_v42, 0  ;;  %v3587_v41 = vadd.s32 18, %v3441_v42 }
 0x3fb   : > { %3795 = vst.msk [vmem:[%s5886_s20 + $0xd0] sm:$0xff] %vm3768_vm1, %v3758_v21  ;;  %v3857_v60 = vsel %vm3768_vm1, %v3758_v21, 0.0  ;;  %v3911_v2 = vmul.f32 %v3758_v21, %v3758_v21  ;;  %v3765_v4 = vsel %vm7140_vm3, %v2354_v37, 0.0  ;;  %vm7181_vm15 = vmand %vm3515_vm14, %vm3479_vm11 }
 0x3fc   : > { %v3858_v25 = vadd.f32 %v3857_v60, %v3856_v32  ;;  %3802 = vst.msk [vmem:[%s5886_s20 + $0x108] sm:$0xff] %vm3768_vm1, %v3765_v4  ;;  %v3623_v58 = vsel %vm7181_vm15, %v3587_v41, %v3441_v42  ;;  %v3918_v63 = vmul.f32 %v3765_v4, %v3765_v4  ;;  %v3871_v23 = vsel %vm3768_vm1, %v3765_v4, 0.0 }
 0x3fd   : > { %v3972_v11 = vsel %vm3768_vm1, %v3911_v2, 0.0  ;;  %vm3659_vm6 = vcmp.lt.s32.totalorder %v3623_v58, 16 }
 0x3fe   : > { %v3860_v30 = vadd.f32 %v3859_v62, %v3858_v25  ;;  %v3973_v52 = vadd.f32 %v3972_v11, %v3971_v49  ;;  %v3986_v53 = vsel %vm3768_vm1, %v3918_v63, 0.0 }
 0x400   : > { %v3862_v35 = vadd.f32 %v3861_v18, %v3860_v30  ;;  %v3975_v8 = vadd.f32 %v3974_v34, %v3973_v52 }
 0x402   : > { %v3864_v20 = vadd.f32 %v3863_v57, %v3862_v35  ;;  %v3977_v31 = vadd.f32 %v3976_v43, %v3975_v8 }
 0x403   : > { %v2357_v14 = vpop.f32.mrf.mxu3 }
 0x404   : > { %v3979_v40 = vadd.f32 %v3978_v45, %v3977_v31  ;;  %v3866_v13 = vadd.f32 %v3865_v24, %v3864_v20  ;;  %v3766_v1 = vsel %vm3658_vm7, %v2357_v14, 0.0 }
 0x405   : > { %3803 = vst.msk [vmem:[%s5886_s20 + $0x110] sm:$0xff] %vm3768_vm1, %v3766_v1  ;;  %v3919_v56 = vmul.f32 %v3766_v1, %v3766_v1  ;;  %v3873_v3 = vsel %vm3768_vm1, %v3766_v1, 0.0 }
 0x406   : > { %v3868_v50 = vadd.f32 %v3867_v12, %v3866_v13  ;;  %v3981_v15 = vadd.f32 %v3980_v46, %v3979_v40 }
 0x407   : > { %v3988_v54 = vsel %vm3768_vm1, %v3919_v56, 0.0 }
 0x408   : > { %v3870_v26 = vadd.f32 %v3869_v51, %v3868_v50  ;;  %v3983_v28 = vadd.f32 %v3982_v16, %v3981_v15 }
 0x40a   : > { %v3872_v59 = vadd.f32 %v3871_v23, %v3870_v26  ;;  %v3985_v27 = vadd.f32 %v3984_v44, %v3983_v28 }
 0x40b   : > { %v2360_v6 = vpop.f32.mrf.mxu3 }
 0x40c   : > { %v3987_v39 = vadd.f32 %v3986_v53, %v3985_v27  ;;  %v3874_v33 = vadd.f32 %v3873_v3, %v3872_v59  ;;  %v3767_v36 = vsel %vm3659_vm6, %v2360_v6, 0.0 }
 0x40d   : > { %3804 = vst.msk [vmem:[%s5886_s20 + $0x118] sm:$0xff] %vm3768_vm1, %v3767_v36  ;;  %v3875_v32 = vsel %vm3768_vm1, %v3767_v36, 0.0  ;;  %v3920_v21 = vmul.f32 %v3767_v36, %v3767_v36 }
 0x40e   : > { %v3989_v37 = vadd.f32 %v3988_v54, %v3987_v39  ;;  %v3876_v17 = vadd.f32 %v3875_v32, %v3874_v33 }
 0x40f   : > { %v3990_v55 = vsel %vm3768_vm1, %v3920_v21, 0.0 }
 0x410   : > { %v3877_v10 = vrot.slane %v3876_v17, 4  ;;  %v3991_v60 = vadd.f32 %v3990_v55, %v3989_v37 }
 0x412   : > { %v3878_v2 = vadd.f32 %v3877_v10, %v3876_v17  ;;  %v3992_v4 = vrot.slane %v3991_v60, 4 }
 0x414   : > { %v3879_v5 = vrot.slane %v3878_v2, 2  ;;  %v3993_v7 = vadd.f32 %v3992_v4, %v3991_v60 }
 0x416   : > { %v3880_v49 = vadd.f32 %v3879_v5, %v3878_v2  ;;  %v3994_v25 = vrot.slane %v3993_v7, 2 }
 0x418   : > { %v3881_v62 = vrot.slane %v3880_v49, 1  ;;  %v3995_v11 = vadd.f32 %v3994_v25, %v3993_v7 }
 0x41a   : > { %v3882_v61 = vadd.f32 %v3881_v62, %v3880_v49  ;;  %v3996_v38 = vrot.slane %v3995_v11, 1 }
 0x41c   : > { %v3883_v30 = vsel %vm3805_vm8, %v3882_v61, 0.0  ;;  %v3997_v52 = vadd.f32 %v3996_v38, %v3995_v11 }
 0x41d   : > { %3884 = vst.msk [vmem:[%s250_s24] sm:$0xff] %vm3768_vm1, %v3883_v30 }
 0x41e   : > { %v3998_v48 = vsel %vm3805_vm8, %v3997_v52, 0.0 }
 0x41f   : > { %3999 = vst.msk [vmem:[%s257_s27] sm:$0xff] %vm3768_vm1, %v3998_v48 }
 0x420 PF: > { %s15_s17 = sadd.s32 1, %s4595_s17   ;;  %s7352_s15 = smov %s4591_s16 }
 0x421   : > { %p12_p5 = scmp.ge.s32.totalorder %s15_s17, 4   ;;  %s7353_s16 = smov %s7355_s18 }
 0x423   :  { %14 = sbr.rel (!%p12_p5) target bundleno = 2 (0x2), region = 91 }

</bundles_post_ra>
